<compile_context>
chip_gen: v7x
topology: tpu7x:2x2x1
jax: 0.10.0
libtpu: 0.0.40
codegen_flags: <defaults>
</compile_context>

<pallas_src>
import functools

import jax
import jax.numpy as jnp
from jax.experimental import pallas as pl
from jax.experimental.pallas import tpu as pltpu


# MXU operand dtype (feedback: bf16 operands, f32 accumulate/epilogue).
# Set to jnp.float32 to recover full-precision numerics.
MXU_DTYPE = jnp.bfloat16
VMEM_LIMIT_BYTES = 48 * 1024 * 1024   # < v7x 64MiB physical, >> v5e 16MiB default


def _pick_batch_tile(batch, preferred):
    """Batch tile that divides the batch (keeps blocks layout-friendly)."""
    if batch >= preferred and batch % preferred == 0:
        return preferred
    return batch


# ---------------------------------------------------------------------------
# Conv2d(k=5, s=2, p=2) + LeakyReLU(0.2)  as a 9-tap space-to-depth matmul
# ---------------------------------------------------------------------------
def _conv_tap_kernel(x_ref, w_ref, b_ref, o_ref, *, Ho, Wo, Bt):
    # x_ref: (Bt, 3, Hs*Wo, 4*Cin)   (3 = column shifts, rows flattened (hh, wo))
    # w_ref: (9, 4*Cin, Cout)        (space-to-depth 3x3 taps, zero-padded 6x6)
    # b_ref: (1, Cout) f32
    # o_ref: (Bt, Ho*Wo, Cout)
    M = Ho * Wo
    cout = o_ref.shape[-1]
    bias = b_ref[...]                                    # f32, hoisted
    for bi in range(Bt):
        acc = jnp.zeros((M, cout), jnp.float32)
        for qy in range(3):
            for qx in range(3):
                patch = x_ref[bi, qx, qy * Wo:qy * Wo + M, :]      # (M, 4*Cin)
                wt = w_ref[qy * 3 + qx]                            # (4*Cin, Cout)
                acc = acc + jnp.dot(patch, wt,
                                    preferred_element_type=jnp.float32)
        y = acc + bias
        y = jnp.maximum(y, 0.2 * y)                      # LeakyReLU(0.2), f32 epilogue
        o_ref[bi, :, :] = y.astype(o_ref.dtype)


def conv5x5_s2_lrelu(x_nhwc, w9, b_row):
    """x: (B,H,W,Cin), w9: (9, 4*Cin, Cout), b_row: (1, Cout) -> (B,Ho,Wo,Cout)."""
    B, H, W, Cin = x_nhwc.shape
    Ho, Wo = (H - 1) // 2 + 1, (W - 1) // 2 + 1
    Hs, Ws = Ho + 2, Wo + 2
    C4 = 4 * Cin
    Cout = w9.shape[-1]
    M = Ho * Wo

    # Host layout prep (cheap, ~3x activation bytes; replaces im2col patches).
    xp = jnp.pad(x_nhwc,
                 ((0, 0), (2, 2 * Hs - H - 2), (2, 2 * Ws - W - 2), (0, 0)))
    xs = (xp.reshape(B, Hs, 2, Ws, 2, Cin)
            .transpose(0, 1, 3, 2, 4, 5)
            .reshape(B, Hs, Ws, C4))                     # space-to-depth
    xw = jnp.stack([xs[:, :, dx:dx + Wo, :] for dx in range(3)], axis=1)
    xw = xw.reshape(B, 3, Hs * Wo, C4).astype(w9.dtype)  # bf16 operands in HBM

    Bt = _pick_batch_tile(B, 8)
    kernel = functools.partial(_conv_tap_kernel, Ho=Ho, Wo=Wo, Bt=Bt)
    y = pl.pallas_call(
        kernel,
        out_shape=jax.ShapeDtypeStruct((B, M, Cout), w9.dtype),
        grid=(B // Bt,),
        in_specs=[
            pl.BlockSpec((Bt, 3, Hs * Wo, C4), lambda i: (i, 0, 0, 0)),
            pl.BlockSpec((9, C4, Cout), lambda i: (0, 0, 0)),     # resident
            pl.BlockSpec((1, Cout), lambda i: (0, 0)),            # resident
        ],
        out_specs=pl.BlockSpec((Bt, M, Cout), lambda i: (i, 0, 0)),
        compiler_params=pltpu.CompilerParams(
            dimension_semantics=("parallel",),
            vmem_limit_bytes=VMEM_LIMIT_BYTES),
    )(xw, w9, b_row)
    return y.reshape(B, Ho, Wo, Cout)


# ---------------------------------------------------------------------------
# Fused tail:  expand -> concat(z) -> Linear+LeakyReLU -> Linear(dim, 1)
# ---------------------------------------------------------------------------
def _tail_kernel(h_ref, z_ref, we_ref, be_ref, w0_ref, b0_ref, w1_ref, b1_ref,
                 o_ref, *, z_dim):
    mxu = we_ref.dtype
    # expand (no activation)
    e = jnp.dot(h_ref[...].astype(mxu), we_ref[...],
                preferred_element_type=jnp.float32) + be_ref[...]       # (Bt, z)
    # classify[0] on concat([e, z]) == e @ W0[:z] + z @ W0[z:]  (no concat)
    c = jnp.dot(e.astype(mxu), w0_ref[0:z_dim, :],
                preferred_element_type=jnp.float32)
    c = c + jnp.dot(z_ref[...].astype(mxu), w0_ref[z_dim:2 * z_dim, :],
                    preferred_element_type=jnp.float32)
    c = c + b0_ref[...]
    c = jnp.maximum(c, 0.2 * c)                                         # (Bt, dim)
    # classify[1] has N=1: lane-dense VPU row-reduction instead of 1-wide matmul
    out = jnp.sum(c * w1_ref[...], axis=-1, keepdims=True) + b1_ref[...]
    o_ref[...] = out.astype(o_ref.dtype)


def tail_mlp(h, z, prep):
    B, Fin = h.shape
    z_dim = z.shape[1]
    dim = prep["cls0_w"].shape[1]
    Bt = _pick_batch_tile(B, 128)
    kernel = functools.partial(_tail_kernel, z_dim=z_dim)
    out = pl.pallas_call(
        kernel,
        out_shape=jax.ShapeDtypeStruct((B, 1), jnp.float32),
        grid=(B // Bt,),
        in_specs=[
            pl.BlockSpec((Bt, Fin), lambda i: (i, 0)),
            pl.BlockSpec((Bt, z_dim), lambda i: (i, 0)),
            pl.BlockSpec((Fin, z_dim), lambda i: (0, 0)),
            pl.BlockSpec((1, z_dim), lambda i: (0, 0)),
            pl.BlockSpec((2 * z_dim, dim), lambda i: (0, 0)),
            pl.BlockSpec((1, dim), lambda i: (0, 0)),
            pl.BlockSpec((1, dim), lambda i: (0, 0)),
            pl.BlockSpec((1, 1), lambda i: (0, 0)),
        ],
        out_specs=pl.BlockSpec((Bt, 1), lambda i: (i, 0)),
        compiler_params=pltpu.CompilerParams(
            dimension_semantics=("parallel",),
            vmem_limit_bytes=VMEM_LIMIT_BYTES),
    )(h, z, prep["expand_w"], prep["expand_b"], prep["cls0_w"], prep["cls0_b"],
      prep["cls1_w"], prep["cls1_b"])
    return out[:, 0]                                     # squeeze(-1)


# ---------------------------------------------------------------------------
# One-time parameter preparation (PyTorch layout -> kernel layout)
# ---------------------------------------------------------------------------
def prepare_params(params, mxu_dtype=MXU_DTYPE):
    prep = {}
    for i in range(4):
        w = params[f"conv{i}_w"]                         # (Cout, Cin, 5, 5)
        Cout, Cin, _, _ = w.shape
        wp = jnp.pad(w, ((0, 0), (0, 0), (0, 1), (0, 1)))          # zero-pad to 6x6
        wt = wp.reshape(Cout, Cin, 3, 2, 3, 2).transpose(2, 4, 3, 5, 1, 0)
        prep[f"conv{i}_w9"] = wt.reshape(9, 4 * Cin, Cout).astype(mxu_dtype)
        prep[f"conv{i}_b"] = params[f"conv{i}_b"].reshape(1, Cout).astype(jnp.float32)

    We = params["expand_w"]                              # (z_dim, hw*dim)
    z_dim, fin = We.shape
    dim = params["cls0_w"].shape[0]
    hw = fin // dim
    # Fold the PyTorch NCHW flatten order (c, hw) into the weight rows so the
    # NHWC-flattened activation (hw, c) can be used directly (no transposes).
    We_r = We.reshape(z_dim, dim, hw).transpose(2, 1, 0).reshape(fin, z_dim)
    prep["expand_w"] = We_r.astype(mxu_dtype)
    prep["expand_b"] = params["expand_b"].reshape(1, z_dim).astype(jnp.float32)
    prep["cls0_w"] = params["cls0_w"].T.astype(mxu_dtype)            # (2*z_dim, dim)
    prep["cls0_b"] = params["cls0_b"].reshape(1, dim).astype(jnp.float32)
    prep["cls1_w"] = params["cls1_w"].reshape(1, dim).astype(jnp.float32)
    prep["cls1_b"] = params["cls1_b"].reshape(1, 1).astype(jnp.float32)
    return prep


# ---------------------------------------------------------------------------
# Full forward pass (StatisticsNetwork.forward)
# ---------------------------------------------------------------------------
def statistics_network_forward(prep, x_nchw, z):
    B = x_nchw.shape[0]
    h = jnp.transpose(x_nchw, (0, 2, 3, 1))              # NCHW -> NHWC
    for i in range(4):
        h = conv5x5_s2_lrelu(h, prep[f"conv{i}_w9"], prep[f"conv{i}_b"])
    flat = h.reshape(B, -1)                              # (B, 2*2*dim), (hw, c) order
    return tail_mlp(flat, z, prep)                       # (B,)


# ---------------------------------------------------------------------------
# Deterministic parameter init (shapes / init rules from the PyTorch module)
# ---------------------------------------------------------------------------
def init_params(key, input_dim=1, z_dim=128, dim=512):
    keys = jax.random.split(key, 16)
    chans = [input_dim, dim // 8, dim // 4, dim // 2, dim]
    params = {}
    k = 0
    for i in range(4):
        cin, cout = chans[i], chans[i + 1]
        params[f"conv{i}_w"] = 0.02 * jax.random.normal(
            keys[k], (cout, cin, 5, 5), jnp.float32)
        k += 1
        bound = 1.0 / float(jnp.sqrt(cin * 25.0))
        params[f"conv{i}_b"] = jax.random.uniform(
            keys[k], (cout,), jnp.float32, -bound, bound)
        k += 1

    def linear_init(kw_, kb_, fin, fout):
        bound = 1.0 / float(jnp.sqrt(float(fin)))
        w = jax.random.uniform(kw_, (fout, fin), jnp.float32, -bound, bound)
        b = jax.random.uniform(kb_, (fout,), jnp.float32, -bound, bound)
        return w, b

    params["expand_w"], params["expand_b"] = linear_init(
        keys[k], keys[k + 1], 2 * 2 * dim, z_dim); k += 2
    params["cls0_w"], params["cls0_b"] = linear_init(
        keys[k], keys[k + 1], z_dim * 2, dim); k += 2
    params["cls1_w"], params["cls1_b"] = linear_init(
        keys[k], keys[k + 1], dim, 1); k += 2
    return params


if __name__ == "__main__":
    # Four stride-2 convs need 32x32 input to end at 2x2 spatial
    # (matching Linear(2*2*dim, z_dim)).  Small dim / z_dim for the test.
    B, INPUT_DIM, Z_DIM, DIM, SPATIAL = 2, 1, 16, 32, 32

    root = jax.random.PRNGKey(0)
    k_params, k_x, k_z = jax.random.split(root, 3)
    params = init_params(k_params, input_dim=INPUT_DIM, z_dim=Z_DIM, dim=DIM)
    prepared = prepare_params(params)

    x = jax.random.normal(k_x, (B, INPUT_DIM, SPATIAL, SPATIAL), jnp.float32)
    z = jax.random.normal(k_z, (B, Z_DIM), jnp.float32)

    fwd = jax.jit(statistics_network_forward)
    out = fwd(prepared, x, z)
    jax.block_until_ready(out)
    assert out.shape == (B,), out.shape
    print("KERNEL_OK")
</pallas_src>

<mosaic_0001>
module attributes {stable_mosaic.version = 11 : i64} {
  func.func @_conv_tap_kernel(%arg0: i32, %arg1: memref<2x3x288x4xbf16, #tpu.memory_space<vmem>>, %arg2: memref<9x4x4xbf16, #tpu.memory_space<vmem>>, %arg3: memref<1x4xf32, #tpu.memory_space<vmem>>, %arg4: memref<2x256x4xbf16, #tpu.memory_space<vmem>>) attributes {dimension_semantics = [#tpu.dimension_semantics<parallel>], iteration_bounds = array<i64: 1>, scalar_prefetch = 0 : i64, scratch_operands = 0 : i64, tpu.core_type = #tpu.core_type<tc>, window_params = [{transform_indices = @transform_0, window_bounds = array<i64: 2, 3, 288, 4>}, {pipeline_mode = #tpu.pipeline_mode<synchronous>, transform_indices = @transform_1, window_bounds = array<i64: 9, 4, 4>}, {pipeline_mode = #tpu.pipeline_mode<synchronous>, transform_indices = @transform_2, window_bounds = array<i64: 1, 4>}, {transform_indices = @transform_3, window_bounds = array<i64: 2, 256, 4>}]} {
    %c0 = arith.constant 0 : index
    %c0_0 = arith.constant 0 : index
    %0 = vector.load %arg3[%c0, %c0_0] : memref<1x4xf32, #tpu.memory_space<vmem>>, vector<1x4xf32>
    %cst = arith.constant 0.000000e+00 : f32
    %1 = vector.broadcast %cst : f32 to vector<256x4xf32>
    %c0_1 = arith.constant 0 : index
    %c0_2 = arith.constant 0 : index
    %c0_3 = arith.constant 0 : index
    %c0_4 = arith.constant 0 : index
    %2 = vector.load %arg1[%c0_1, %c0_2, %c0_3, %c0_4] : memref<2x3x288x4xbf16, #tpu.memory_space<vmem>>, vector<1x1x256x4xbf16>
    %3 = vector.shape_cast %2 : vector<1x1x256x4xbf16> to vector<256x4xbf16>
    %c0_5 = arith.constant 0 : index
    %c0_6 = arith.constant 0 : index
    %c0_7 = arith.constant 0 : index
    %4 = vector.load %arg2[%c0_5, %c0_6, %c0_7] : memref<9x4x4xbf16, #tpu.memory_space<vmem>>, vector<1x4x4xbf16>
    %5 = vector.shape_cast %4 : vector<1x4x4xbf16> to vector<4x4xbf16>
    %cst_8 = arith.constant dense<0.000000e+00> : vector<256x4xf32>
    %6 = tpu.matmul %3, %5, %cst_8 {dimension_numbers = #tpu.dot_dimension_numbers<[1], [0], [0], [1], [0, 0, 1, 1], [], []>} : vector<256x4xbf16>, vector<4x4xbf16>, vector<256x4xf32> -> vector<256x4xf32>
    %7 = arith.addf %1, %6 : vector<256x4xf32>
    %c0_9 = arith.constant 0 : index
    %c1 = arith.constant 1 : index
    %c0_10 = arith.constant 0 : index
    %c0_11 = arith.constant 0 : index
    %8 = vector.load %arg1[%c0_9, %c1, %c0_10, %c0_11] : memref<2x3x288x4xbf16, #tpu.memory_space<vmem>>, vector<1x1x256x4xbf16>
    %9 = vector.shape_cast %8 : vector<1x1x256x4xbf16> to vector<256x4xbf16>
    %c1_12 = arith.constant 1 : index
    %c0_13 = arith.constant 0 : index
    %c0_14 = arith.constant 0 : index
    %10 = vector.load %arg2[%c1_12, %c0_13, %c0_14] : memref<9x4x4xbf16, #tpu.memory_space<vmem>>, vector<1x4x4xbf16>
    %11 = vector.shape_cast %10 : vector<1x4x4xbf16> to vector<4x4xbf16>
    %cst_15 = arith.constant dense<0.000000e+00> : vector<256x4xf32>
    %12 = tpu.matmul %9, %11, %cst_15 {dimension_numbers = #tpu.dot_dimension_numbers<[1], [0], [0], [1], [0, 0, 1, 1], [], []>} : vector<256x4xbf16>, vector<4x4xbf16>, vector<256x4xf32> -> vector<256x4xf32>
    %13 = arith.addf %7, %12 : vector<256x4xf32>
    %c0_16 = arith.constant 0 : index
    %c2 = arith.constant 2 : index
    %c0_17 = arith.constant 0 : index
    %c0_18 = arith.constant 0 : index
    %14 = vector.load %arg1[%c0_16, %c2, %c0_17, %c0_18] : memref<2x3x288x4xbf16, #tpu.memory_space<vmem>>, vector<1x1x256x4xbf16>
    %15 = vector.shape_cast %14 : vector<1x1x256x4xbf16> to vector<256x4xbf16>
    %c2_19 = arith.constant 2 : index
    %c0_20 = arith.constant 0 : index
    %c0_21 = arith.constant 0 : index
    %16 = vector.load %arg2[%c2_19, %c0_20, %c0_21] : memref<9x4x4xbf16, #tpu.memory_space<vmem>>, vector<1x4x4xbf16>
    %17 = vector.shape_cast %16 : vector<1x4x4xbf16> to vector<4x4xbf16>
    %cst_22 = arith.constant dense<0.000000e+00> : vector<256x4xf32>
    %18 = tpu.matmul %15, %17, %cst_22 {dimension_numbers = #tpu.dot_dimension_numbers<[1], [0], [0], [1], [0, 0, 1, 1], [], []>} : vector<256x4xbf16>, vector<4x4xbf16>, vector<256x4xf32> -> vector<256x4xf32>
    %19 = arith.addf %13, %18 : vector<256x4xf32>
    %c0_23 = arith.constant 0 : index
    %c0_24 = arith.constant 0 : index
    %c16 = arith.constant 16 : index
    %c0_25 = arith.constant 0 : index
    %20 = vector.load %arg1[%c0_23, %c0_24, %c16, %c0_25] : memref<2x3x288x4xbf16, #tpu.memory_space<vmem>>, vector<1x1x256x4xbf16>
    %21 = vector.shape_cast %20 : vector<1x1x256x4xbf16> to vector<256x4xbf16>
    %c3 = arith.constant 3 : index
    %c0_26 = arith.constant 0 : index
    %c0_27 = arith.constant 0 : index
    %22 = vector.load %arg2[%c3, %c0_26, %c0_27] : memref<9x4x4xbf16, #tpu.memory_space<vmem>>, vector<1x4x4xbf16>
    %23 = vector.shape_cast %22 : vector<1x4x4xbf16> to vector<4x4xbf16>
    %cst_28 = arith.constant dense<0.000000e+00> : vector<256x4xf32>
    %24 = tpu.matmul %21, %23, %cst_28 {dimension_numbers = #tpu.dot_dimension_numbers<[1], [0], [0], [1], [0, 0, 1, 1], [], []>} : vector<256x4xbf16>, vector<4x4xbf16>, vector<256x4xf32> -> vector<256x4xf32>
    %25 = arith.addf %19, %24 : vector<256x4xf32>
    %c0_29 = arith.constant 0 : index
    %c1_30 = arith.constant 1 : index
    %c16_31 = arith.constant 16 : index
    %c0_32 = arith.constant 0 : index
    %26 = vector.load %arg1[%c0_29, %c1_30, %c16_31, %c0_32] : memref<2x3x288x4xbf16, #tpu.memory_space<vmem>>, vector<1x1x256x4xbf16>
    %27 = vector.shape_cast %26 : vector<1x1x256x4xbf16> to vector<256x4xbf16>
    %c4 = arith.constant 4 : index
    %c0_33 = arith.constant 0 : index
    %c0_34 = arith.constant 0 : index
    %28 = vector.load %arg2[%c4, %c0_33, %c0_34] : memref<9x4x4xbf16, #tpu.memory_space<vmem>>, vector<1x4x4xbf16>
    %29 = vector.shape_cast %28 : vector<1x4x4xbf16> to vector<4x4xbf16>
    %cst_35 = arith.constant dense<0.000000e+00> : vector<256x4xf32>
    %30 = tpu.matmul %27, %29, %cst_35 {dimension_numbers = #tpu.dot_dimension_numbers<[1], [0], [0], [1], [0, 0, 1, 1], [], []>} : vector<256x4xbf16>, vector<4x4xbf16>, vector<256x4xf32> -> vector<256x4xf32>
    %31 = arith.addf %25, %30 : vector<256x4xf32>
    %c0_36 = arith.constant 0 : index
    %c2_37 = arith.constant 2 : index
    %c16_38 = arith.constant 16 : index
    %c0_39 = arith.constant 0 : index
    %32 = vector.load %arg1[%c0_36, %c2_37, %c16_38, %c0_39] : memref<2x3x288x4xbf16, #tpu.memory_space<vmem>>, vector<1x1x256x4xbf16>
    %33 = vector.shape_cast %32 : vector<1x1x256x4xbf16> to vector<256x4xbf16>
    %c5 = arith.constant 5 : index
    %c0_40 = arith.constant 0 : index
    %c0_41 = arith.constant 0 : index
    %34 = vector.load %arg2[%c5, %c0_40, %c0_41] : memref<9x4x4xbf16, #tpu.memory_space<vmem>>, vector<1x4x4xbf16>
    %35 = vector.shape_cast %34 : vector<1x4x4xbf16> to vector<4x4xbf16>
    %cst_42 = arith.constant dense<0.000000e+00> : vector<256x4xf32>
    %36 = tpu.matmul %33, %35, %cst_42 {dimension_numbers = #tpu.dot_dimension_numbers<[1], [0], [0], [1], [0, 0, 1, 1], [], []>} : vector<256x4xbf16>, vector<4x4xbf16>, vector<256x4xf32> -> vector<256x4xf32>
    %37 = arith.addf %31, %36 : vector<256x4xf32>
    %c0_43 = arith.constant 0 : index
    %c0_44 = arith.constant 0 : index
    %c32 = arith.constant 32 : index
    %c0_45 = arith.constant 0 : index
    %38 = vector.load %arg1[%c0_43, %c0_44, %c32, %c0_45] : memref<2x3x288x4xbf16, #tpu.memory_space<vmem>>, vector<1x1x256x4xbf16>
    %39 = vector.shape_cast %38 : vector<1x1x256x4xbf16> to vector<256x4xbf16>
    %c6 = arith.constant 6 : index
    %c0_46 = arith.constant 0 : index
    %c0_47 = arith.constant 0 : index
    %40 = vector.load %arg2[%c6, %c0_46, %c0_47] : memref<9x4x4xbf16, #tpu.memory_space<vmem>>, vector<1x4x4xbf16>
    %41 = vector.shape_cast %40 : vector<1x4x4xbf16> to vector<4x4xbf16>
    %cst_48 = arith.constant dense<0.000000e+00> : vector<256x4xf32>
    %42 = tpu.matmul %39, %41, %cst_48 {dimension_numbers = #tpu.dot_dimension_numbers<[1], [0], [0], [1], [0, 0, 1, 1], [], []>} : vector<256x4xbf16>, vector<4x4xbf16>, vector<256x4xf32> -> vector<256x4xf32>
    %43 = arith.addf %37, %42 : vector<256x4xf32>
    %c0_49 = arith.constant 0 : index
    %c1_50 = arith.constant 1 : index
    %c32_51 = arith.constant 32 : index
    %c0_52 = arith.constant 0 : index
    %44 = vector.load %arg1[%c0_49, %c1_50, %c32_51, %c0_52] : memref<2x3x288x4xbf16, #tpu.memory_space<vmem>>, vector<1x1x256x4xbf16>
    %45 = vector.shape_cast %44 : vector<1x1x256x4xbf16> to vector<256x4xbf16>
    %c7 = arith.constant 7 : index
    %c0_53 = arith.constant 0 : index
    %c0_54 = arith.constant 0 : index
    %46 = vector.load %arg2[%c7, %c0_53, %c0_54] : memref<9x4x4xbf16, #tpu.memory_space<vmem>>, vector<1x4x4xbf16>
    %47 = vector.shape_cast %46 : vector<1x4x4xbf16> to vector<4x4xbf16>
    %cst_55 = arith.constant dense<0.000000e+00> : vector<256x4xf32>
    %48 = tpu.matmul %45, %47, %cst_55 {dimension_numbers = #tpu.dot_dimension_numbers<[1], [0], [0], [1], [0, 0, 1, 1], [], []>} : vector<256x4xbf16>, vector<4x4xbf16>, vector<256x4xf32> -> vector<256x4xf32>
    %49 = arith.addf %43, %48 : vector<256x4xf32>
    %c0_56 = arith.constant 0 : index
    %c2_57 = arith.constant 2 : index
    %c32_58 = arith.constant 32 : index
    %c0_59 = arith.constant 0 : index
    %50 = vector.load %arg1[%c0_56, %c2_57, %c32_58, %c0_59] : memref<2x3x288x4xbf16, #tpu.memory_space<vmem>>, vector<1x1x256x4xbf16>
    %51 = vector.shape_cast %50 : vector<1x1x256x4xbf16> to vector<256x4xbf16>
    %c8 = arith.constant 8 : index
    %c0_60 = arith.constant 0 : index
    %c0_61 = arith.constant 0 : index
    %52 = vector.load %arg2[%c8, %c0_60, %c0_61] : memref<9x4x4xbf16, #tpu.memory_space<vmem>>, vector<1x4x4xbf16>
    %53 = vector.shape_cast %52 : vector<1x4x4xbf16> to vector<4x4xbf16>
    %cst_62 = arith.constant dense<0.000000e+00> : vector<256x4xf32>
    %54 = tpu.matmul %51, %53, %cst_62 {dimension_numbers = #tpu.dot_dimension_numbers<[1], [0], [0], [1], [0, 0, 1, 1], [], []>} : vector<256x4xbf16>, vector<4x4xbf16>, vector<256x4xf32> -> vector<256x4xf32>
    %55 = arith.addf %49, %54 : vector<256x4xf32>
    %56 = vector.broadcast %0 : vector<1x4xf32> to vector<256x4xf32>
    %57 = arith.addf %55, %56 : vector<256x4xf32>
    %cst_63 = arith.constant 2.000000e-01 : f32
    %58 = vector.broadcast %cst_63 : f32 to vector<256x4xf32>
    %59 = arith.mulf %58, %57 : vector<256x4xf32>
    %60 = arith.maximumf %57, %59 : vector<256x4xf32>
    %61 = arith.truncf %60 : vector<256x4xf32> to vector<256x4xbf16>
    %c0_64 = arith.constant 0 : index
    %c0_65 = arith.constant 0 : index
    %c0_66 = arith.constant 0 : index
    %62 = vector.load %arg4[%c0_64, %c0_65, %c0_66] : memref<2x256x4xbf16, #tpu.memory_space<vmem>>, vector<1x256x4xbf16>
    %63 = vector.shape_cast %62 : vector<1x256x4xbf16> to vector<256x4xbf16>
    %64 = vector.shape_cast %61 : vector<256x4xbf16> to vector<1x256x4xbf16>
    tpu.vector_store %arg4[%c0_64, %c0_65, %c0_66], %64 {strides = array<i32>} : memref<2x256x4xbf16, #tpu.memory_space<vmem>>, vector<1x256x4xbf16>,
    %cst_67 = arith.constant 0.000000e+00 : f32
    %65 = vector.broadcast %cst_67 : f32 to vector<256x4xf32>
    %c1_68 = arith.constant 1 : index
    %c0_69 = arith.constant 0 : index
    %c0_70 = arith.constant 0 : index
    %c0_71 = arith.constant 0 : index
    %66 = vector.load %arg1[%c1_68, %c0_69, %c0_70, %c0_71] : memref<2x3x288x4xbf16, #tpu.memory_space<vmem>>, vector<1x1x256x4xbf16>
    %67 = vector.shape_cast %66 : vector<1x1x256x4xbf16> to vector<256x4xbf16>
    %c0_72 = arith.constant 0 : index
    %c0_73 = arith.constant 0 : index
    %c0_74 = arith.constant 0 : index
    %68 = vector.load %arg2[%c0_72, %c0_73, %c0_74] : memref<9x4x4xbf16, #tpu.memory_space<vmem>>, vector<1x4x4xbf16>
    %69 = vector.shape_cast %68 : vector<1x4x4xbf16> to vector<4x4xbf16>
    %cst_75 = arith.constant dense<0.000000e+00> : vector<256x4xf32>
    %70 = tpu.matmul %67, %69, %cst_75 {dimension_numbers = #tpu.dot_dimension_numbers<[1], [0], [0], [1], [0, 0, 1, 1], [], []>} : vector<256x4xbf16>, vector<4x4xbf16>, vector<256x4xf32> -> vector<256x4xf32>
    %71 = arith.addf %65, %70 : vector<256x4xf32>
    %c1_76 = arith.constant 1 : index
    %c1_77 = arith.constant 1 : index
    %c0_78 = arith.constant 0 : index
    %c0_79 = arith.constant 0 : index
    %72 = vector.load %arg1[%c1_76, %c1_77, %c0_78, %c0_79] : memref<2x3x288x4xbf16, #tpu.memory_space<vmem>>, vector<1x1x256x4xbf16>
    %73 = vector.shape_cast %72 : vector<1x1x256x4xbf16> to vector<256x4xbf16>
    %c1_80 = arith.constant 1 : index
    %c0_81 = arith.constant 0 : index
    %c0_82 = arith.constant 0 : index
    %74 = vector.load %arg2[%c1_80, %c0_81, %c0_82] : memref<9x4x4xbf16, #tpu.memory_space<vmem>>, vector<1x4x4xbf16>
    %75 = vector.shape_cast %74 : vector<1x4x4xbf16> to vector<4x4xbf16>
    %cst_83 = arith.constant dense<0.000000e+00> : vector<256x4xf32>
    %76 = tpu.matmul %73, %75, %cst_83 {dimension_numbers = #tpu.dot_dimension_numbers<[1], [0], [0], [1], [0, 0, 1, 1], [], []>} : vector<256x4xbf16>, vector<4x4xbf16>, vector<256x4xf32> -> vector<256x4xf32>
    %77 = arith.addf %71, %76 : vector<256x4xf32>
    %c1_84 = arith.constant 1 : index
    %c2_85 = arith.constant 2 : index
    %c0_86 = arith.constant 0 : index
    %c0_87 = arith.constant 0 : index
    %78 = vector.load %arg1[%c1_84, %c2_85, %c0_86, %c0_87] : memref<2x3x288x4xbf16, #tpu.memory_space<vmem>>, vector<1x1x256x4xbf16>
    %79 = vector.shape_cast %78 : vector<1x1x256x4xbf16> to vector<256x4xbf16>
    %c2_88 = arith.constant 2 : index
    %c0_89 = arith.constant 0 : index
    %c0_90 = arith.constant 0 : index
    %80 = vector.load %arg2[%c2_88, %c0_89, %c0_90] : memref<9x4x4xbf16, #tpu.memory_space<vmem>>, vector<1x4x4xbf16>
    %81 = vector.shape_cast %80 : vector<1x4x4xbf16> to vector<4x4xbf16>
    %cst_91 = arith.constant dense<0.000000e+00> : vector<256x4xf32>
    %82 = tpu.matmul %79, %81, %cst_91 {dimension_numbers = #tpu.dot_dimension_numbers<[1], [0], [0], [1], [0, 0, 1, 1], [], []>} : vector<256x4xbf16>, vector<4x4xbf16>, vector<256x4xf32> -> vector<256x4xf32>
    %83 = arith.addf %77, %82 : vector<256x4xf32>
    %c1_92 = arith.constant 1 : index
    %c0_93 = arith.constant 0 : index
    %c16_94 = arith.constant 16 : index
    %c0_95 = arith.constant 0 : index
    %84 = vector.load %arg1[%c1_92, %c0_93, %c16_94, %c0_95] : memref<2x3x288x4xbf16, #tpu.memory_space<vmem>>, vector<1x1x256x4xbf16>
    %85 = vector.shape_cast %84 : vector<1x1x256x4xbf16> to vector<256x4xbf16>
    %c3_96 = arith.constant 3 : index
    %c0_97 = arith.constant 0 : index
    %c0_98 = arith.constant 0 : index
    %86 = vector.load %arg2[%c3_96, %c0_97, %c0_98] : memref<9x4x4xbf16, #tpu.memory_space<vmem>>, vector<1x4x4xbf16>
    %87 = vector.shape_cast %86 : vector<1x4x4xbf16> to vector<4x4xbf16>
    %cst_99 = arith.constant dense<0.000000e+00> : vector<256x4xf32>
    %88 = tpu.matmul %85, %87, %cst_99 {dimension_numbers = #tpu.dot_dimension_numbers<[1], [0], [0], [1], [0, 0, 1, 1], [], []>} : vector<256x4xbf16>, vector<4x4xbf16>, vector<256x4xf32> -> vector<256x4xf32>
    %89 = arith.addf %83, %88 : vector<256x4xf32>
    %c1_100 = arith.constant 1 : index
    %c1_101 = arith.constant 1 : index
    %c16_102 = arith.constant 16 : index
    %c0_103 = arith.constant 0 : index
    %90 = vector.load %arg1[%c1_100, %c1_101, %c16_102, %c0_103] : memref<2x3x288x4xbf16, #tpu.memory_space<vmem>>, vector<1x1x256x4xbf16>
    %91 = vector.shape_cast %90 : vector<1x1x256x4xbf16> to vector<256x4xbf16>
    %c4_104 = arith.constant 4 : index
    %c0_105 = arith.constant 0 : index
    %c0_106 = arith.constant 0 : index
    %92 = vector.load %arg2[%c4_104, %c0_105, %c0_106] : memref<9x4x4xbf16, #tpu.memory_space<vmem>>, vector<1x4x4xbf16>
    %93 = vector.shape_cast %92 : vector<1x4x4xbf16> to vector<4x4xbf16>
    %cst_107 = arith.constant dense<0.000000e+00> : vector<256x4xf32>
    %94 = tpu.matmul %91, %93, %cst_107 {dimension_numbers = #tpu.dot_dimension_numbers<[1], [0], [0], [1], [0, 0, 1, 1], [], []>} : vector<256x4xbf16>, vector<4x4xbf16>, vector<256x4xf32> -> vector<256x4xf32>
    %95 = arith.addf %89, %94 : vector<256x4xf32>
    %c1_108 = arith.constant 1 : index
    %c2_109 = arith.constant 2 : index
    %c16_110 = arith.constant 16 : index
    %c0_111 = arith.constant 0 : index
    %96 = vector.load %arg1[%c1_108, %c2_109, %c16_110, %c0_111] : memref<2x3x288x4xbf16, #tpu.memory_space<vmem>>, vector<1x1x256x4xbf16>
    %97 = vector.shape_cast %96 : vector<1x1x256x4xbf16> to vector<256x4xbf16>
    %c5_112 = arith.constant 5 : index
    %c0_113 = arith.constant 0 : index
    %c0_114 = arith.constant 0 : index
    %98 = vector.load %arg2[%c5_112, %c0_113, %c0_114] : memref<9x4x4xbf16, #tpu.memory_space<vmem>>, vector<1x4x4xbf16>
    %99 = vector.shape_cast %98 : vector<1x4x4xbf16> to vector<4x4xbf16>
    %cst_115 = arith.constant dense<0.000000e+00> : vector<256x4xf32>
    %100 = tpu.matmul %97, %99, %cst_115 {dimension_numbers = #tpu.dot_dimension_numbers<[1], [0], [0], [1], [0, 0, 1, 1], [], []>} : vector<256x4xbf16>, vector<4x4xbf16>, vector<256x4xf32> -> vector<256x4xf32>
    %101 = arith.addf %95, %100 : vector<256x4xf32>
    %c1_116 = arith.constant 1 : index
    %c0_117 = arith.constant 0 : index
    %c32_118 = arith.constant 32 : index
    %c0_119 = arith.constant 0 : index
    %102 = vector.load %arg1[%c1_116, %c0_117, %c32_118, %c0_119] : memref<2x3x288x4xbf16, #tpu.memory_space<vmem>>, vector<1x1x256x4xbf16>
    %103 = vector.shape_cast %102 : vector<1x1x256x4xbf16> to vector<256x4xbf16>
    %c6_120 = arith.constant 6 : index
    %c0_121 = arith.constant 0 : index
    %c0_122 = arith.constant 0 : index
    %104 = vector.load %arg2[%c6_120, %c0_121, %c0_122] : memref<9x4x4xbf16, #tpu.memory_space<vmem>>, vector<1x4x4xbf16>
    %105 = vector.shape_cast %104 : vector<1x4x4xbf16> to vector<4x4xbf16>
    %cst_123 = arith.constant dense<0.000000e+00> : vector<256x4xf32>
    %106 = tpu.matmul %103, %105, %cst_123 {dimension_numbers = #tpu.dot_dimension_numbers<[1], [0], [0], [1], [0, 0, 1, 1], [], []>} : vector<256x4xbf16>, vector<4x4xbf16>, vector<256x4xf32> -> vector<256x4xf32>
    %107 = arith.addf %101, %106 : vector<256x4xf32>
    %c1_124 = arith.constant 1 : index
    %c1_125 = arith.constant 1 : index
    %c32_126 = arith.constant 32 : index
    %c0_127 = arith.constant 0 : index
    %108 = vector.load %arg1[%c1_124, %c1_125, %c32_126, %c0_127] : memref<2x3x288x4xbf16, #tpu.memory_space<vmem>>, vector<1x1x256x4xbf16>
    %109 = vector.shape_cast %108 : vector<1x1x256x4xbf16> to vector<256x4xbf16>
    %c7_128 = arith.constant 7 : index
    %c0_129 = arith.constant 0 : index
    %c0_130 = arith.constant 0 : index
    %110 = vector.load %arg2[%c7_128, %c0_129, %c0_130] : memref<9x4x4xbf16, #tpu.memory_space<vmem>>, vector<1x4x4xbf16>
    %111 = vector.shape_cast %110 : vector<1x4x4xbf16> to vector<4x4xbf16>
    %cst_131 = arith.constant dense<0.000000e+00> : vector<256x4xf32>
    %112 = tpu.matmul %109, %111, %cst_131 {dimension_numbers = #tpu.dot_dimension_numbers<[1], [0], [0], [1], [0, 0, 1, 1], [], []>} : vector<256x4xbf16>, vector<4x4xbf16>, vector<256x4xf32> -> vector<256x4xf32>
    %113 = arith.addf %107, %112 : vector<256x4xf32>
    %c1_132 = arith.constant 1 : index
    %c2_133 = arith.constant 2 : index
    %c32_134 = arith.constant 32 : index
    %c0_135 = arith.constant 0 : index
    %114 = vector.load %arg1[%c1_132, %c2_133, %c32_134, %c0_135] : memref<2x3x288x4xbf16, #tpu.memory_space<vmem>>, vector<1x1x256x4xbf16>
    %115 = vector.shape_cast %114 : vector<1x1x256x4xbf16> to vector<256x4xbf16>
    %c8_136 = arith.constant 8 : index
    %c0_137 = arith.constant 0 : index
    %c0_138 = arith.constant 0 : index
    %116 = vector.load %arg2[%c8_136, %c0_137, %c0_138] : memref<9x4x4xbf16, #tpu.memory_space<vmem>>, vector<1x4x4xbf16>
    %117 = vector.shape_cast %116 : vector<1x4x4xbf16> to vector<4x4xbf16>
    %cst_139 = arith.constant dense<0.000000e+00> : vector<256x4xf32>
    %118 = tpu.matmul %115, %117, %cst_139 {dimension_numbers = #tpu.dot_dimension_numbers<[1], [0], [0], [1], [0, 0, 1, 1], [], []>} : vector<256x4xbf16>, vector<4x4xbf16>, vector<256x4xf32> -> vector<256x4xf32>
    %119 = arith.addf %113, %118 : vector<256x4xf32>
    %120 = vector.broadcast %0 : vector<1x4xf32> to vector<256x4xf32>
    %121 = arith.addf %119, %120 : vector<256x4xf32>
    %cst_140 = arith.constant 2.000000e-01 : f32
    %122 = vector.broadcast %cst_140 : f32 to vector<256x4xf32>
    %123 = arith.mulf %122, %121 : vector<256x4xf32>
    %124 = arith.maximumf %121, %123 : vector<256x4xf32>
    %125 = arith.truncf %124 : vector<256x4xf32> to vector<256x4xbf16>
    %c1_141 = arith.constant 1 : index
    %c0_142 = arith.constant 0 : index
    %c0_143 = arith.constant 0 : index
    %126 = vector.load %arg4[%c1_141, %c0_142, %c0_143] : memref<2x256x4xbf16, #tpu.memory_space<vmem>>, vector<1x256x4xbf16>
    %127 = vector.shape_cast %126 : vector<1x256x4xbf16> to vector<256x4xbf16>
    %128 = vector.shape_cast %125 : vector<256x4xbf16> to vector<1x256x4xbf16>
    tpu.vector_store %arg4[%c1_141, %c0_142, %c0_143], %128 {strides = array<i32>} : memref<2x256x4xbf16, #tpu.memory_space<vmem>>, vector<1x256x4xbf16>,
    return
  }
  func.func @transform_0(%arg0: i32) -> (i32, i32, i32, i32) {
    %c0_i32 = arith.constant 0 : i32
    %c0_i32_0 = arith.constant 0 : i32
    %c0_i32_1 = arith.constant 0 : i32
    %c0_i32_2 = arith.constant 0 : i32
    return %arg0, %c0_i32, %c0_i32_0, %c0_i32_1 : i32, i32, i32, i32
  }
  func.func @transform_1(%arg0: i32) -> (i32, i32, i32) {
    %c0_i32 = arith.constant 0 : i32
    %c0_i32_0 = arith.constant 0 : i32
    %c0_i32_1 = arith.constant 0 : i32
    %c0_i32_2 = arith.constant 0 : i32
    return %c0_i32, %c0_i32_0, %c0_i32_1 : i32, i32, i32
  }
  func.func @transform_2(%arg0: i32) -> (i32, i32) {
    %c0_i32 = arith.constant 0 : i32
    %c0_i32_0 = arith.constant 0 : i32
    %c0_i32_1 = arith.constant 0 : i32
    return %c0_i32, %c0_i32_0 : i32, i32
  }
  func.func @transform_3(%arg0: i32) -> (i32, i32, i32) {
    %c0_i32 = arith.constant 0 : i32
    %c0_i32_0 = arith.constant 0 : i32
    %c0_i32_1 = arith.constant 0 : i32
    return %arg0, %c0_i32, %c0_i32_0 : i32, i32, i32
  }
}

module attributes {stable_mosaic.version = 11 : i64} {
  func.func @_conv_tap_kernel(%arg0: i32, %arg1: memref<2x3x80x16xbf16, #tpu.memory_space<vmem>>, %arg2: memref<9x16x8xbf16, #tpu.memory_space<vmem>>, %arg3: memref<1x8xf32, #tpu.memory_space<vmem>>, %arg4: memref<2x64x8xbf16, #tpu.memory_space<vmem>>) attributes {dimension_semantics = [#tpu.dimension_semantics<parallel>], iteration_bounds = array<i64: 1>, scalar_prefetch = 0 : i64, scratch_operands = 0 : i64, tpu.core_type = #tpu.core_type<tc>, window_params = [{transform_indices = @transform_0, window_bounds = array<i64: 2, 3, 80, 16>}, {pipeline_mode = #tpu.pipeline_mode<synchronous>, transform_indices = @transform_1, window_bounds = array<i64: 9, 16, 8>}, {pipeline_mode = #tpu.pipeline_mode<synchronous>, transform_indices = @transform_2, window_bounds = array<i64: 1, 8>}, {transform_indices = @transform_3, window_bounds = array<i64: 2, 64, 8>}]} {
    %c0 = arith.constant 0 : index
    %c0_0 = arith.constant 0 : index
    %0 = vector.load %arg3[%c0, %c0_0] : memref<1x8xf32, #tpu.memory_space<vmem>>, vector<1x8xf32>
    %cst = arith.constant 0.000000e+00 : f32
    %1 = vector.broadcast %cst : f32 to vector<64x8xf32>
    %c0_1 = arith.constant 0 : index
    %c0_2 = arith.constant 0 : index
    %c0_3 = arith.constant 0 : index
    %c0_4 = arith.constant 0 : index
    %2 = vector.load %arg1[%c0_1, %c0_2, %c0_3, %c0_4] : memref<2x3x80x16xbf16, #tpu.memory_space<vmem>>, vector<1x1x64x16xbf16>
    %3 = vector.shape_cast %2 : vector<1x1x64x16xbf16> to vector<64x16xbf16>
    %c0_5 = arith.constant 0 : index
    %c0_6 = arith.constant 0 : index
    %c0_7 = arith.constant 0 : index
    %4 = vector.load %arg2[%c0_5, %c0_6, %c0_7] : memref<9x16x8xbf16, #tpu.memory_space<vmem>>, vector<1x16x8xbf16>
    %5 = vector.shape_cast %4 : vector<1x16x8xbf16> to vector<16x8xbf16>
    %cst_8 = arith.constant dense<0.000000e+00> : vector<64x8xf32>
    %6 = tpu.matmul %3, %5, %cst_8 {dimension_numbers = #tpu.dot_dimension_numbers<[1], [0], [0], [1], [0, 0, 1, 1], [], []>} : vector<64x16xbf16>, vector<16x8xbf16>, vector<64x8xf32> -> vector<64x8xf32>
    %7 = arith.addf %1, %6 : vector<64x8xf32>
    %c0_9 = arith.constant 0 : index
    %c1 = arith.constant 1 : index
    %c0_10 = arith.constant 0 : index
    %c0_11 = arith.constant 0 : index
    %8 = vector.load %arg1[%c0_9, %c1, %c0_10, %c0_11] : memref<2x3x80x16xbf16, #tpu.memory_space<vmem>>, vector<1x1x64x16xbf16>
    %9 = vector.shape_cast %8 : vector<1x1x64x16xbf16> to vector<64x16xbf16>
    %c1_12 = arith.constant 1 : index
    %c0_13 = arith.constant 0 : index
    %c0_14 = arith.constant 0 : index
    %10 = vector.load %arg2[%c1_12, %c0_13, %c0_14] : memref<9x16x8xbf16, #tpu.memory_space<vmem>>, vector<1x16x8xbf16>
    %11 = vector.shape_cast %10 : vector<1x16x8xbf16> to vector<16x8xbf16>
    %cst_15 = arith.constant dense<0.000000e+00> : vector<64x8xf32>
    %12 = tpu.matmul %9, %11, %cst_15 {dimension_numbers = #tpu.dot_dimension_numbers<[1], [0], [0], [1], [0, 0, 1, 1], [], []>} : vector<64x16xbf16>, vector<16x8xbf16>, vector<64x8xf32> -> vector<64x8xf32>
    %13 = arith.addf %7, %12 : vector<64x8xf32>
    %c0_16 = arith.constant 0 : index
    %c2 = arith.constant 2 : index
    %c0_17 = arith.constant 0 : index
    %c0_18 = arith.constant 0 : index
    %14 = vector.load %arg1[%c0_16, %c2, %c0_17, %c0_18] : memref<2x3x80x16xbf16, #tpu.memory_space<vmem>>, vector<1x1x64x16xbf16>
    %15 = vector.shape_cast %14 : vector<1x1x64x16xbf16> to vector<64x16xbf16>
    %c2_19 = arith.constant 2 : index
    %c0_20 = arith.constant 0 : index
    %c0_21 = arith.constant 0 : index
    %16 = vector.load %arg2[%c2_19, %c0_20, %c0_21] : memref<9x16x8xbf16, #tpu.memory_space<vmem>>, vector<1x16x8xbf16>
    %17 = vector.shape_cast %16 : vector<1x16x8xbf16> to vector<16x8xbf16>
    %cst_22 = arith.constant dense<0.000000e+00> : vector<64x8xf32>
    %18 = tpu.matmul %15, %17, %cst_22 {dimension_numbers = #tpu.dot_dimension_numbers<[1], [0], [0], [1], [0, 0, 1, 1], [], []>} : vector<64x16xbf16>, vector<16x8xbf16>, vector<64x8xf32> -> vector<64x8xf32>
    %19 = arith.addf %13, %18 : vector<64x8xf32>
    %c0_23 = arith.constant 0 : index
    %c0_24 = arith.constant 0 : index
    %c8 = arith.constant 8 : index
    %c0_25 = arith.constant 0 : index
    %20 = vector.load %arg1[%c0_23, %c0_24, %c8, %c0_25] : memref<2x3x80x16xbf16, #tpu.memory_space<vmem>>, vector<1x1x64x16xbf16>
    %21 = vector.shape_cast %20 : vector<1x1x64x16xbf16> to vector<64x16xbf16>
    %c3 = arith.constant 3 : index
    %c0_26 = arith.constant 0 : index
    %c0_27 = arith.constant 0 : index
    %22 = vector.load %arg2[%c3, %c0_26, %c0_27] : memref<9x16x8xbf16, #tpu.memory_space<vmem>>, vector<1x16x8xbf16>
    %23 = vector.shape_cast %22 : vector<1x16x8xbf16> to vector<16x8xbf16>
    %cst_28 = arith.constant dense<0.000000e+00> : vector<64x8xf32>
    %24 = tpu.matmul %21, %23, %cst_28 {dimension_numbers = #tpu.dot_dimension_numbers<[1], [0], [0], [1], [0, 0, 1, 1], [], []>} : vector<64x16xbf16>, vector<16x8xbf16>, vector<64x8xf32> -> vector<64x8xf32>
    %25 = arith.addf %19, %24 : vector<64x8xf32>
    %c0_29 = arith.constant 0 : index
    %c1_30 = arith.constant 1 : index
    %c8_31 = arith.constant 8 : index
    %c0_32 = arith.constant 0 : index
    %26 = vector.load %arg1[%c0_29, %c1_30, %c8_31, %c0_32] : memref<2x3x80x16xbf16, #tpu.memory_space<vmem>>, vector<1x1x64x16xbf16>
    %27 = vector.shape_cast %26 : vector<1x1x64x16xbf16> to vector<64x16xbf16>
    %c4 = arith.constant 4 : index
    %c0_33 = arith.constant 0 : index
    %c0_34 = arith.constant 0 : index
    %28 = vector.load %arg2[%c4, %c0_33, %c0_34] : memref<9x16x8xbf16, #tpu.memory_space<vmem>>, vector<1x16x8xbf16>
    %29 = vector.shape_cast %28 : vector<1x16x8xbf16> to vector<16x8xbf16>
    %cst_35 = arith.constant dense<0.000000e+00> : vector<64x8xf32>
    %30 = tpu.matmul %27, %29, %cst_35 {dimension_numbers = #tpu.dot_dimension_numbers<[1], [0], [0], [1], [0, 0, 1, 1], [], []>} : vector<64x16xbf16>, vector<16x8xbf16>, vector<64x8xf32> -> vector<64x8xf32>
    %31 = arith.addf %25, %30 : vector<64x8xf32>
    %c0_36 = arith.constant 0 : index
    %c2_37 = arith.constant 2 : index
    %c8_38 = arith.constant 8 : index
    %c0_39 = arith.constant 0 : index
    %32 = vector.load %arg1[%c0_36, %c2_37, %c8_38, %c0_39] : memref<2x3x80x16xbf16, #tpu.memory_space<vmem>>, vector<1x1x64x16xbf16>
    %33 = vector.shape_cast %32 : vector<1x1x64x16xbf16> to vector<64x16xbf16>
    %c5 = arith.constant 5 : index
    %c0_40 = arith.constant 0 : index
    %c0_41 = arith.constant 0 : index
    %34 = vector.load %arg2[%c5, %c0_40, %c0_41] : memref<9x16x8xbf16, #tpu.memory_space<vmem>>, vector<1x16x8xbf16>
    %35 = vector.shape_cast %34 : vector<1x16x8xbf16> to vector<16x8xbf16>
    %cst_42 = arith.constant dense<0.000000e+00> : vector<64x8xf32>
    %36 = tpu.matmul %33, %35, %cst_42 {dimension_numbers = #tpu.dot_dimension_numbers<[1], [0], [0], [1], [0, 0, 1, 1], [], []>} : vector<64x16xbf16>, vector<16x8xbf16>, vector<64x8xf32> -> vector<64x8xf32>
    %37 = arith.addf %31, %36 : vector<64x8xf32>
    %c0_43 = arith.constant 0 : index
    %c0_44 = arith.constant 0 : index
    %c16 = arith.constant 16 : index
    %c0_45 = arith.constant 0 : index
    %38 = vector.load %arg1[%c0_43, %c0_44, %c16, %c0_45] : memref<2x3x80x16xbf16, #tpu.memory_space<vmem>>, vector<1x1x64x16xbf16>
    %39 = vector.shape_cast %38 : vector<1x1x64x16xbf16> to vector<64x16xbf16>
    %c6 = arith.constant 6 : index
    %c0_46 = arith.constant 0 : index
    %c0_47 = arith.constant 0 : index
    %40 = vector.load %arg2[%c6, %c0_46, %c0_47] : memref<9x16x8xbf16, #tpu.memory_space<vmem>>, vector<1x16x8xbf16>
    %41 = vector.shape_cast %40 : vector<1x16x8xbf16> to vector<16x8xbf16>
    %cst_48 = arith.constant dense<0.000000e+00> : vector<64x8xf32>
    %42 = tpu.matmul %39, %41, %cst_48 {dimension_numbers = #tpu.dot_dimension_numbers<[1], [0], [0], [1], [0, 0, 1, 1], [], []>} : vector<64x16xbf16>, vector<16x8xbf16>, vector<64x8xf32> -> vector<64x8xf32>
    %43 = arith.addf %37, %42 : vector<64x8xf32>
    %c0_49 = arith.constant 0 : index
    %c1_50 = arith.constant 1 : index
    %c16_51 = arith.constant 16 : index
    %c0_52 = arith.constant 0 : index
    %44 = vector.load %arg1[%c0_49, %c1_50, %c16_51, %c0_52] : memref<2x3x80x16xbf16, #tpu.memory_space<vmem>>, vector<1x1x64x16xbf16>
    %45 = vector.shape_cast %44 : vector<1x1x64x16xbf16> to vector<64x16xbf16>
    %c7 = arith.constant 7 : index
    %c0_53 = arith.constant 0 : index
    %c0_54 = arith.constant 0 : index
    %46 = vector.load %arg2[%c7, %c0_53, %c0_54] : memref<9x16x8xbf16, #tpu.memory_space<vmem>>, vector<1x16x8xbf16>
    %47 = vector.shape_cast %46 : vector<1x16x8xbf16> to vector<16x8xbf16>
    %cst_55 = arith.constant dense<0.000000e+00> : vector<64x8xf32>
    %48 = tpu.matmul %45, %47, %cst_55 {dimension_numbers = #tpu.dot_dimension_numbers<[1], [0], [0], [1], [0, 0, 1, 1], [], []>} : vector<64x16xbf16>, vector<16x8xbf16>, vector<64x8xf32> -> vector<64x8xf32>
    %49 = arith.addf %43, %48 : vector<64x8xf32>
    %c0_56 = arith.constant 0 : index
    %c2_57 = arith.constant 2 : index
    %c16_58 = arith.constant 16 : index
    %c0_59 = arith.constant 0 : index
    %50 = vector.load %arg1[%c0_56, %c2_57, %c16_58, %c0_59] : memref<2x3x80x16xbf16, #tpu.memory_space<vmem>>, vector<1x1x64x16xbf16>
    %51 = vector.shape_cast %50 : vector<1x1x64x16xbf16> to vector<64x16xbf16>
    %c8_60 = arith.constant 8 : index
    %c0_61 = arith.constant 0 : index
    %c0_62 = arith.constant 0 : index
    %52 = vector.load %arg2[%c8_60, %c0_61, %c0_62] : memref<9x16x8xbf16, #tpu.memory_space<vmem>>, vector<1x16x8xbf16>
    %53 = vector.shape_cast %52 : vector<1x16x8xbf16> to vector<16x8xbf16>
    %cst_63 = arith.constant dense<0.000000e+00> : vector<64x8xf32>
    %54 = tpu.matmul %51, %53, %cst_63 {dimension_numbers = #tpu.dot_dimension_numbers<[1], [0], [0], [1], [0, 0, 1, 1], [], []>} : vector<64x16xbf16>, vector<16x8xbf16>, vector<64x8xf32> -> vector<64x8xf32>
    %55 = arith.addf %49, %54 : vector<64x8xf32>
    %56 = vector.broadcast %0 : vector<1x8xf32> to vector<64x8xf32>
    %57 = arith.addf %55, %56 : vector<64x8xf32>
    %cst_64 = arith.constant 2.000000e-01 : f32
    %58 = vector.broadcast %cst_64 : f32 to vector<64x8xf32>
    %59 = arith.mulf %58, %57 : vector<64x8xf32>
    %60 = arith.maximumf %57, %59 : vector<64x8xf32>
    %61 = arith.truncf %60 : vector<64x8xf32> to vector<64x8xbf16>
    %c0_65 = arith.constant 0 : index
    %c0_66 = arith.constant 0 : index
    %c0_67 = arith.constant 0 : index
    %62 = vector.load %arg4[%c0_65, %c0_66, %c0_67] : memref<2x64x8xbf16, #tpu.memory_space<vmem>>, vector<1x64x8xbf16>
    %63 = vector.shape_cast %62 : vector<1x64x8xbf16> to vector<64x8xbf16>
    %64 = vector.shape_cast %61 : vector<64x8xbf16> to vector<1x64x8xbf16>
    tpu.vector_store %arg4[%c0_65, %c0_66, %c0_67], %64 {strides = array<i32>} : memref<2x64x8xbf16, #tpu.memory_space<vmem>>, vector<1x64x8xbf16>,
    %cst_68 = arith.constant 0.000000e+00 : f32
    %65 = vector.broadcast %cst_68 : f32 to vector<64x8xf32>
    %c1_69 = arith.constant 1 : index
    %c0_70 = arith.constant 0 : index
    %c0_71 = arith.constant 0 : index
    %c0_72 = arith.constant 0 : index
    %66 = vector.load %arg1[%c1_69, %c0_70, %c0_71, %c0_72] : memref<2x3x80x16xbf16, #tpu.memory_space<vmem>>, vector<1x1x64x16xbf16>
    %67 = vector.shape_cast %66 : vector<1x1x64x16xbf16> to vector<64x16xbf16>
    %c0_73 = arith.constant 0 : index
    %c0_74 = arith.constant 0 : index
    %c0_75 = arith.constant 0 : index
    %68 = vector.load %arg2[%c0_73, %c0_74, %c0_75] : memref<9x16x8xbf16, #tpu.memory_space<vmem>>, vector<1x16x8xbf16>
    %69 = vector.shape_cast %68 : vector<1x16x8xbf16> to vector<16x8xbf16>
    %cst_76 = arith.constant dense<0.000000e+00> : vector<64x8xf32>
    %70 = tpu.matmul %67, %69, %cst_76 {dimension_numbers = #tpu.dot_dimension_numbers<[1], [0], [0], [1], [0, 0, 1, 1], [], []>} : vector<64x16xbf16>, vector<16x8xbf16>, vector<64x8xf32> -> vector<64x8xf32>
    %71 = arith.addf %65, %70 : vector<64x8xf32>
    %c1_77 = arith.constant 1 : index
    %c1_78 = arith.constant 1 : index
    %c0_79 = arith.constant 0 : index
    %c0_80 = arith.constant 0 : index
    %72 = vector.load %arg1[%c1_77, %c1_78, %c0_79, %c0_80] : memref<2x3x80x16xbf16, #tpu.memory_space<vmem>>, vector<1x1x64x16xbf16>
    %73 = vector.shape_cast %72 : vector<1x1x64x16xbf16> to vector<64x16xbf16>
    %c1_81 = arith.constant 1 : index
    %c0_82 = arith.constant 0 : index
    %c0_83 = arith.constant 0 : index
    %74 = vector.load %arg2[%c1_81, %c0_82, %c0_83] : memref<9x16x8xbf16, #tpu.memory_space<vmem>>, vector<1x16x8xbf16>
    %75 = vector.shape_cast %74 : vector<1x16x8xbf16> to vector<16x8xbf16>
    %cst_84 = arith.constant dense<0.000000e+00> : vector<64x8xf32>
    %76 = tpu.matmul %73, %75, %cst_84 {dimension_numbers = #tpu.dot_dimension_numbers<[1], [0], [0], [1], [0, 0, 1, 1], [], []>} : vector<64x16xbf16>, vector<16x8xbf16>, vector<64x8xf32> -> vector<64x8xf32>
    %77 = arith.addf %71, %76 : vector<64x8xf32>
    %c1_85 = arith.constant 1 : index
    %c2_86 = arith.constant 2 : index
    %c0_87 = arith.constant 0 : index
    %c0_88 = arith.constant 0 : index
    %78 = vector.load %arg1[%c1_85, %c2_86, %c0_87, %c0_88] : memref<2x3x80x16xbf16, #tpu.memory_space<vmem>>, vector<1x1x64x16xbf16>
    %79 = vector.shape_cast %78 : vector<1x1x64x16xbf16> to vector<64x16xbf16>
    %c2_89 = arith.constant 2 : index
    %c0_90 = arith.constant 0 : index
    %c0_91 = arith.constant 0 : index
    %80 = vector.load %arg2[%c2_89, %c0_90, %c0_91] : memref<9x16x8xbf16, #tpu.memory_space<vmem>>, vector<1x16x8xbf16>
    %81 = vector.shape_cast %80 : vector<1x16x8xbf16> to vector<16x8xbf16>
    %cst_92 = arith.constant dense<0.000000e+00> : vector<64x8xf32>
    %82 = tpu.matmul %79, %81, %cst_92 {dimension_numbers = #tpu.dot_dimension_numbers<[1], [0], [0], [1], [0, 0, 1, 1], [], []>} : vector<64x16xbf16>, vector<16x8xbf16>, vector<64x8xf32> -> vector<64x8xf32>
    %83 = arith.addf %77, %82 : vector<64x8xf32>
    %c1_93 = arith.constant 1 : index
    %c0_94 = arith.constant 0 : index
    %c8_95 = arith.constant 8 : index
    %c0_96 = arith.constant 0 : index
    %84 = vector.load %arg1[%c1_93, %c0_94, %c8_95, %c0_96] : memref<2x3x80x16xbf16, #tpu.memory_space<vmem>>, vector<1x1x64x16xbf16>
    %85 = vector.shape_cast %84 : vector<1x1x64x16xbf16> to vector<64x16xbf16>
    %c3_97 = arith.constant 3 : index
    %c0_98 = arith.constant 0 : index
    %c0_99 = arith.constant 0 : index
    %86 = vector.load %arg2[%c3_97, %c0_98, %c0_99] : memref<9x16x8xbf16, #tpu.memory_space<vmem>>, vector<1x16x8xbf16>
    %87 = vector.shape_cast %86 : vector<1x16x8xbf16> to vector<16x8xbf16>
    %cst_100 = arith.constant dense<0.000000e+00> : vector<64x8xf32>
    %88 = tpu.matmul %85, %87, %cst_100 {dimension_numbers = #tpu.dot_dimension_numbers<[1], [0], [0], [1], [0, 0, 1, 1], [], []>} : vector<64x16xbf16>, vector<16x8xbf16>, vector<64x8xf32> -> vector<64x8xf32>
    %89 = arith.addf %83, %88 : vector<64x8xf32>
    %c1_101 = arith.constant 1 : index
    %c1_102 = arith.constant 1 : index
    %c8_103 = arith.constant 8 : index
    %c0_104 = arith.constant 0 : index
    %90 = vector.load %arg1[%c1_101, %c1_102, %c8_103, %c0_104] : memref<2x3x80x16xbf16, #tpu.memory_space<vmem>>, vector<1x1x64x16xbf16>
    %91 = vector.shape_cast %90 : vector<1x1x64x16xbf16> to vector<64x16xbf16>
    %c4_105 = arith.constant 4 : index
    %c0_106 = arith.constant 0 : index
    %c0_107 = arith.constant 0 : index
    %92 = vector.load %arg2[%c4_105, %c0_106, %c0_107] : memref<9x16x8xbf16, #tpu.memory_space<vmem>>, vector<1x16x8xbf16>
    %93 = vector.shape_cast %92 : vector<1x16x8xbf16> to vector<16x8xbf16>
    %cst_108 = arith.constant dense<0.000000e+00> : vector<64x8xf32>
    %94 = tpu.matmul %91, %93, %cst_108 {dimension_numbers = #tpu.dot_dimension_numbers<[1], [0], [0], [1], [0, 0, 1, 1], [], []>} : vector<64x16xbf16>, vector<16x8xbf16>, vector<64x8xf32> -> vector<64x8xf32>
    %95 = arith.addf %89, %94 : vector<64x8xf32>
    %c1_109 = arith.constant 1 : index
    %c2_110 = arith.constant 2 : index
    %c8_111 = arith.constant 8 : index
    %c0_112 = arith.constant 0 : index
    %96 = vector.load %arg1[%c1_109, %c2_110, %c8_111, %c0_112] : memref<2x3x80x16xbf16, #tpu.memory_space<vmem>>, vector<1x1x64x16xbf16>
    %97 = vector.shape_cast %96 : vector<1x1x64x16xbf16> to vector<64x16xbf16>
    %c5_113 = arith.constant 5 : index
    %c0_114 = arith.constant 0 : index
    %c0_115 = arith.constant 0 : index
    %98 = vector.load %arg2[%c5_113, %c0_114, %c0_115] : memref<9x16x8xbf16, #tpu.memory_space<vmem>>, vector<1x16x8xbf16>
    %99 = vector.shape_cast %98 : vector<1x16x8xbf16> to vector<16x8xbf16>
    %cst_116 = arith.constant dense<0.000000e+00> : vector<64x8xf32>
    %100 = tpu.matmul %97, %99, %cst_116 {dimension_numbers = #tpu.dot_dimension_numbers<[1], [0], [0], [1], [0, 0, 1, 1], [], []>} : vector<64x16xbf16>, vector<16x8xbf16>, vector<64x8xf32> -> vector<64x8xf32>
    %101 = arith.addf %95, %100 : vector<64x8xf32>
    %c1_117 = arith.constant 1 : index
    %c0_118 = arith.constant 0 : index
    %c16_119 = arith.constant 16 : index
    %c0_120 = arith.constant 0 : index
    %102 = vector.load %arg1[%c1_117, %c0_118, %c16_119, %c0_120] : memref<2x3x80x16xbf16, #tpu.memory_space<vmem>>, vector<1x1x64x16xbf16>
    %103 = vector.shape_cast %102 : vector<1x1x64x16xbf16> to vector<64x16xbf16>
    %c6_121 = arith.constant 6 : index
    %c0_122 = arith.constant 0 : index
    %c0_123 = arith.constant 0 : index
    %104 = vector.load %arg2[%c6_121, %c0_122, %c0_123] : memref<9x16x8xbf16, #tpu.memory_space<vmem>>, vector<1x16x8xbf16>
    %105 = vector.shape_cast %104 : vector<1x16x8xbf16> to vector<16x8xbf16>
    %cst_124 = arith.constant dense<0.000000e+00> : vector<64x8xf32>
    %106 = tpu.matmul %103, %105, %cst_124 {dimension_numbers = #tpu.dot_dimension_numbers<[1], [0], [0], [1], [0, 0, 1, 1], [], []>} : vector<64x16xbf16>, vector<16x8xbf16>, vector<64x8xf32> -> vector<64x8xf32>
    %107 = arith.addf %101, %106 : vector<64x8xf32>
    %c1_125 = arith.constant 1 : index
    %c1_126 = arith.constant 1 : index
    %c16_127 = arith.constant 16 : index
    %c0_128 = arith.constant 0 : index
    %108 = vector.load %arg1[%c1_125, %c1_126, %c16_127, %c0_128] : memref<2x3x80x16xbf16, #tpu.memory_space<vmem>>, vector<1x1x64x16xbf16>
    %109 = vector.shape_cast %108 : vector<1x1x64x16xbf16> to vector<64x16xbf16>
    %c7_129 = arith.constant 7 : index
    %c0_130 = arith.constant 0 : index
    %c0_131 = arith.constant 0 : index
    %110 = vector.load %arg2[%c7_129, %c0_130, %c0_131] : memref<9x16x8xbf16, #tpu.memory_space<vmem>>, vector<1x16x8xbf16>
    %111 = vector.shape_cast %110 : vector<1x16x8xbf16> to vector<16x8xbf16>
    %cst_132 = arith.constant dense<0.000000e+00> : vector<64x8xf32>
    %112 = tpu.matmul %109, %111, %cst_132 {dimension_numbers = #tpu.dot_dimension_numbers<[1], [0], [0], [1], [0, 0, 1, 1], [], []>} : vector<64x16xbf16>, vector<16x8xbf16>, vector<64x8xf32> -> vector<64x8xf32>
    %113 = arith.addf %107, %112 : vector<64x8xf32>
    %c1_133 = arith.constant 1 : index
    %c2_134 = arith.constant 2 : index
    %c16_135 = arith.constant 16 : index
    %c0_136 = arith.constant 0 : index
    %114 = vector.load %arg1[%c1_133, %c2_134, %c16_135, %c0_136] : memref<2x3x80x16xbf16, #tpu.memory_space<vmem>>, vector<1x1x64x16xbf16>
    %115 = vector.shape_cast %114 : vector<1x1x64x16xbf16> to vector<64x16xbf16>
    %c8_137 = arith.constant 8 : index
    %c0_138 = arith.constant 0 : index
    %c0_139 = arith.constant 0 : index
    %116 = vector.load %arg2[%c8_137, %c0_138, %c0_139] : memref<9x16x8xbf16, #tpu.memory_space<vmem>>, vector<1x16x8xbf16>
    %117 = vector.shape_cast %116 : vector<1x16x8xbf16> to vector<16x8xbf16>
    %cst_140 = arith.constant dense<0.000000e+00> : vector<64x8xf32>
    %118 = tpu.matmul %115, %117, %cst_140 {dimension_numbers = #tpu.dot_dimension_numbers<[1], [0], [0], [1], [0, 0, 1, 1], [], []>} : vector<64x16xbf16>, vector<16x8xbf16>, vector<64x8xf32> -> vector<64x8xf32>
    %119 = arith.addf %113, %118 : vector<64x8xf32>
    %120 = vector.broadcast %0 : vector<1x8xf32> to vector<64x8xf32>
    %121 = arith.addf %119, %120 : vector<64x8xf32>
    %cst_141 = arith.constant 2.000000e-01 : f32
    %122 = vector.broadcast %cst_141 : f32 to vector<64x8xf32>
    %123 = arith.mulf %122, %121 : vector<64x8xf32>
    %124 = arith.maximumf %121, %123 : vector<64x8xf32>
    %125 = arith.truncf %124 : vector<64x8xf32> to vector<64x8xbf16>
    %c1_142 = arith.constant 1 : index
    %c0_143 = arith.constant 0 : index
    %c0_144 = arith.constant 0 : index
    %126 = vector.load %arg4[%c1_142, %c0_143, %c0_144] : memref<2x64x8xbf16, #tpu.memory_space<vmem>>, vector<1x64x8xbf16>
    %127 = vector.shape_cast %126 : vector<1x64x8xbf16> to vector<64x8xbf16>
    %128 = vector.shape_cast %125 : vector<64x8xbf16> to vector<1x64x8xbf16>
    tpu.vector_store %arg4[%c1_142, %c0_143, %c0_144], %128 {strides = array<i32>} : memref<2x64x8xbf16, #tpu.memory_space<vmem>>, vector<1x64x8xbf16>,
    return
  }
  func.func @transform_0(%arg0: i32) -> (i32, i32, i32, i32) {
    %c0_i32 = arith.constant 0 : i32
    %c0_i32_0 = arith.constant 0 : i32
    %c0_i32_1 = arith.constant 0 : i32
    %c0_i32_2 = arith.constant 0 : i32
    return %arg0, %c0_i32, %c0_i32_0, %c0_i32_1 : i32, i32, i32, i32
  }
  func.func @transform_1(%arg0: i32) -> (i32, i32, i32) {
    %c0_i32 = arith.constant 0 : i32
    %c0_i32_0 = arith.constant 0 : i32
    %c0_i32_1 = arith.constant 0 : i32
    %c0_i32_2 = arith.constant 0 : i32
    return %c0_i32, %c0_i32_0, %c0_i32_1 : i32, i32, i32
  }
  func.func @transform_2(%arg0: i32) -> (i32, i32) {
    %c0_i32 = arith.constant 0 : i32
    %c0_i32_0 = arith.constant 0 : i32
    %c0_i32_1 = arith.constant 0 : i32
    return %c0_i32, %c0_i32_0 : i32, i32
  }
  func.func @transform_3(%arg0: i32) -> (i32, i32, i32) {
    %c0_i32 = arith.constant 0 : i32
    %c0_i32_0 = arith.constant 0 : i32
    %c0_i32_1 = arith.constant 0 : i32
    return %arg0, %c0_i32, %c0_i32_0 : i32, i32, i32
  }
}

module attributes {stable_mosaic.version = 11 : i64} {
  func.func @_conv_tap_kernel(%arg0: i32, %arg1: memref<2x3x24x32xbf16, #tpu.memory_space<vmem>>, %arg2: memref<9x32x16xbf16, #tpu.memory_space<vmem>>, %arg3: memref<1x16xf32, #tpu.memory_space<vmem>>, %arg4: memref<2x16x16xbf16, #tpu.memory_space<vmem>>) attributes {dimension_semantics = [#tpu.dimension_semantics<parallel>], iteration_bounds = array<i64: 1>, scalar_prefetch = 0 : i64, scratch_operands = 0 : i64, tpu.core_type = #tpu.core_type<tc>, window_params = [{transform_indices = @transform_0, window_bounds = array<i64: 2, 3, 24, 32>}, {pipeline_mode = #tpu.pipeline_mode<synchronous>, transform_indices = @transform_1, window_bounds = array<i64: 9, 32, 16>}, {pipeline_mode = #tpu.pipeline_mode<synchronous>, transform_indices = @transform_2, window_bounds = array<i64: 1, 16>}, {transform_indices = @transform_3, window_bounds = array<i64: 2, 16, 16>}]} {
    %c0 = arith.constant 0 : index
    %c0_0 = arith.constant 0 : index
    %0 = vector.load %arg3[%c0, %c0_0] : memref<1x16xf32, #tpu.memory_space<vmem>>, vector<1x16xf32>
    %cst = arith.constant 0.000000e+00 : f32
    %1 = vector.broadcast %cst : f32 to vector<16x16xf32>
    %c0_1 = arith.constant 0 : index
    %c0_2 = arith.constant 0 : index
    %c0_3 = arith.constant 0 : index
    %c0_4 = arith.constant 0 : index
    %2 = vector.load %arg1[%c0_1, %c0_2, %c0_3, %c0_4] : memref<2x3x24x32xbf16, #tpu.memory_space<vmem>>, vector<1x1x16x32xbf16>
    %3 = vector.shape_cast %2 : vector<1x1x16x32xbf16> to vector<16x32xbf16>
    %c0_5 = arith.constant 0 : index
    %c0_6 = arith.constant 0 : index
    %c0_7 = arith.constant 0 : index
    %4 = vector.load %arg2[%c0_5, %c0_6, %c0_7] : memref<9x32x16xbf16, #tpu.memory_space<vmem>>, vector<1x32x16xbf16>
    %5 = vector.shape_cast %4 : vector<1x32x16xbf16> to vector<32x16xbf16>
    %cst_8 = arith.constant dense<0.000000e+00> : vector<16x16xf32>
    %6 = tpu.matmul %3, %5, %cst_8 {dimension_numbers = #tpu.dot_dimension_numbers<[1], [0], [0], [1], [0, 0, 1, 1], [], []>} : vector<16x32xbf16>, vector<32x16xbf16>, vector<16x16xf32> -> vector<16x16xf32>
    %7 = arith.addf %1, %6 : vector<16x16xf32>
    %c0_9 = arith.constant 0 : index
    %c1 = arith.constant 1 : index
    %c0_10 = arith.constant 0 : index
    %c0_11 = arith.constant 0 : index
    %8 = vector.load %arg1[%c0_9, %c1, %c0_10, %c0_11] : memref<2x3x24x32xbf16, #tpu.memory_space<vmem>>, vector<1x1x16x32xbf16>
    %9 = vector.shape_cast %8 : vector<1x1x16x32xbf16> to vector<16x32xbf16>
    %c1_12 = arith.constant 1 : index
    %c0_13 = arith.constant 0 : index
    %c0_14 = arith.constant 0 : index
    %10 = vector.load %arg2[%c1_12, %c0_13, %c0_14] : memref<9x32x16xbf16, #tpu.memory_space<vmem>>, vector<1x32x16xbf16>
    %11 = vector.shape_cast %10 : vector<1x32x16xbf16> to vector<32x16xbf16>
    %cst_15 = arith.constant dense<0.000000e+00> : vector<16x16xf32>
    %12 = tpu.matmul %9, %11, %cst_15 {dimension_numbers = #tpu.dot_dimension_numbers<[1], [0], [0], [1], [0, 0, 1, 1], [], []>} : vector<16x32xbf16>, vector<32x16xbf16>, vector<16x16xf32> -> vector<16x16xf32>
    %13 = arith.addf %7, %12 : vector<16x16xf32>
    %c0_16 = arith.constant 0 : index
    %c2 = arith.constant 2 : index
    %c0_17 = arith.constant 0 : index
    %c0_18 = arith.constant 0 : index
    %14 = vector.load %arg1[%c0_16, %c2, %c0_17, %c0_18] : memref<2x3x24x32xbf16, #tpu.memory_space<vmem>>, vector<1x1x16x32xbf16>
    %15 = vector.shape_cast %14 : vector<1x1x16x32xbf16> to vector<16x32xbf16>
    %c2_19 = arith.constant 2 : index
    %c0_20 = arith.constant 0 : index
    %c0_21 = arith.constant 0 : index
    %16 = vector.load %arg2[%c2_19, %c0_20, %c0_21] : memref<9x32x16xbf16, #tpu.memory_space<vmem>>, vector<1x32x16xbf16>
    %17 = vector.shape_cast %16 : vector<1x32x16xbf16> to vector<32x16xbf16>
    %cst_22 = arith.constant dense<0.000000e+00> : vector<16x16xf32>
    %18 = tpu.matmul %15, %17, %cst_22 {dimension_numbers = #tpu.dot_dimension_numbers<[1], [0], [0], [1], [0, 0, 1, 1], [], []>} : vector<16x32xbf16>, vector<32x16xbf16>, vector<16x16xf32> -> vector<16x16xf32>
    %19 = arith.addf %13, %18 : vector<16x16xf32>
    %c0_23 = arith.constant 0 : index
    %c0_24 = arith.constant 0 : index
    %c4 = arith.constant 4 : index
    %c0_25 = arith.constant 0 : index
    %20 = vector.load %arg1[%c0_23, %c0_24, %c4, %c0_25] : memref<2x3x24x32xbf16, #tpu.memory_space<vmem>>, vector<1x1x16x32xbf16>
    %21 = vector.shape_cast %20 : vector<1x1x16x32xbf16> to vector<16x32xbf16>
    %c3 = arith.constant 3 : index
    %c0_26 = arith.constant 0 : index
    %c0_27 = arith.constant 0 : index
    %22 = vector.load %arg2[%c3, %c0_26, %c0_27] : memref<9x32x16xbf16, #tpu.memory_space<vmem>>, vector<1x32x16xbf16>
    %23 = vector.shape_cast %22 : vector<1x32x16xbf16> to vector<32x16xbf16>
    %cst_28 = arith.constant dense<0.000000e+00> : vector<16x16xf32>
    %24 = tpu.matmul %21, %23, %cst_28 {dimension_numbers = #tpu.dot_dimension_numbers<[1], [0], [0], [1], [0, 0, 1, 1], [], []>} : vector<16x32xbf16>, vector<32x16xbf16>, vector<16x16xf32> -> vector<16x16xf32>
    %25 = arith.addf %19, %24 : vector<16x16xf32>
    %c0_29 = arith.constant 0 : index
    %c1_30 = arith.constant 1 : index
    %c4_31 = arith.constant 4 : index
    %c0_32 = arith.constant 0 : index
    %26 = vector.load %arg1[%c0_29, %c1_30, %c4_31, %c0_32] : memref<2x3x24x32xbf16, #tpu.memory_space<vmem>>, vector<1x1x16x32xbf16>
    %27 = vector.shape_cast %26 : vector<1x1x16x32xbf16> to vector<16x32xbf16>
    %c4_33 = arith.constant 4 : index
    %c0_34 = arith.constant 0 : index
    %c0_35 = arith.constant 0 : index
    %28 = vector.load %arg2[%c4_33, %c0_34, %c0_35] : memref<9x32x16xbf16, #tpu.memory_space<vmem>>, vector<1x32x16xbf16>
    %29 = vector.shape_cast %28 : vector<1x32x16xbf16> to vector<32x16xbf16>
    %cst_36 = arith.constant dense<0.000000e+00> : vector<16x16xf32>
    %30 = tpu.matmul %27, %29, %cst_36 {dimension_numbers = #tpu.dot_dimension_numbers<[1], [0], [0], [1], [0, 0, 1, 1], [], []>} : vector<16x32xbf16>, vector<32x16xbf16>, vector<16x16xf32> -> vector<16x16xf32>
    %31 = arith.addf %25, %30 : vector<16x16xf32>
    %c0_37 = arith.constant 0 : index
    %c2_38 = arith.constant 2 : index
    %c4_39 = arith.constant 4 : index
    %c0_40 = arith.constant 0 : index
    %32 = vector.load %arg1[%c0_37, %c2_38, %c4_39, %c0_40] : memref<2x3x24x32xbf16, #tpu.memory_space<vmem>>, vector<1x1x16x32xbf16>
    %33 = vector.shape_cast %32 : vector<1x1x16x32xbf16> to vector<16x32xbf16>
    %c5 = arith.constant 5 : index
    %c0_41 = arith.constant 0 : index
    %c0_42 = arith.constant 0 : index
    %34 = vector.load %arg2[%c5, %c0_41, %c0_42] : memref<9x32x16xbf16, #tpu.memory_space<vmem>>, vector<1x32x16xbf16>
    %35 = vector.shape_cast %34 : vector<1x32x16xbf16> to vector<32x16xbf16>
    %cst_43 = arith.constant dense<0.000000e+00> : vector<16x16xf32>
    %36 = tpu.matmul %33, %35, %cst_43 {dimension_numbers = #tpu.dot_dimension_numbers<[1], [0], [0], [1], [0, 0, 1, 1], [], []>} : vector<16x32xbf16>, vector<32x16xbf16>, vector<16x16xf32> -> vector<16x16xf32>
    %37 = arith.addf %31, %36 : vector<16x16xf32>
    %c0_44 = arith.constant 0 : index
    %c0_45 = arith.constant 0 : index
    %c8 = arith.constant 8 : index
    %c0_46 = arith.constant 0 : index
    %38 = vector.load %arg1[%c0_44, %c0_45, %c8, %c0_46] : memref<2x3x24x32xbf16, #tpu.memory_space<vmem>>, vector<1x1x16x32xbf16>
    %39 = vector.shape_cast %38 : vector<1x1x16x32xbf16> to vector<16x32xbf16>
    %c6 = arith.constant 6 : index
    %c0_47 = arith.constant 0 : index
    %c0_48 = arith.constant 0 : index
    %40 = vector.load %arg2[%c6, %c0_47, %c0_48] : memref<9x32x16xbf16, #tpu.memory_space<vmem>>, vector<1x32x16xbf16>
    %41 = vector.shape_cast %40 : vector<1x32x16xbf16> to vector<32x16xbf16>
    %cst_49 = arith.constant dense<0.000000e+00> : vector<16x16xf32>
    %42 = tpu.matmul %39, %41, %cst_49 {dimension_numbers = #tpu.dot_dimension_numbers<[1], [0], [0], [1], [0, 0, 1, 1], [], []>} : vector<16x32xbf16>, vector<32x16xbf16>, vector<16x16xf32> -> vector<16x16xf32>
    %43 = arith.addf %37, %42 : vector<16x16xf32>
    %c0_50 = arith.constant 0 : index
    %c1_51 = arith.constant 1 : index
    %c8_52 = arith.constant 8 : index
    %c0_53 = arith.constant 0 : index
    %44 = vector.load %arg1[%c0_50, %c1_51, %c8_52, %c0_53] : memref<2x3x24x32xbf16, #tpu.memory_space<vmem>>, vector<1x1x16x32xbf16>
    %45 = vector.shape_cast %44 : vector<1x1x16x32xbf16> to vector<16x32xbf16>
    %c7 = arith.constant 7 : index
    %c0_54 = arith.constant 0 : index
    %c0_55 = arith.constant 0 : index
    %46 = vector.load %arg2[%c7, %c0_54, %c0_55] : memref<9x32x16xbf16, #tpu.memory_space<vmem>>, vector<1x32x16xbf16>
    %47 = vector.shape_cast %46 : vector<1x32x16xbf16> to vector<32x16xbf16>
    %cst_56 = arith.constant dense<0.000000e+00> : vector<16x16xf32>
    %48 = tpu.matmul %45, %47, %cst_56 {dimension_numbers = #tpu.dot_dimension_numbers<[1], [0], [0], [1], [0, 0, 1, 1], [], []>} : vector<16x32xbf16>, vector<32x16xbf16>, vector<16x16xf32> -> vector<16x16xf32>
    %49 = arith.addf %43, %48 : vector<16x16xf32>
    %c0_57 = arith.constant 0 : index
    %c2_58 = arith.constant 2 : index
    %c8_59 = arith.constant 8 : index
    %c0_60 = arith.constant 0 : index
    %50 = vector.load %arg1[%c0_57, %c2_58, %c8_59, %c0_60] : memref<2x3x24x32xbf16, #tpu.memory_space<vmem>>, vector<1x1x16x32xbf16>
    %51 = vector.shape_cast %50 : vector<1x1x16x32xbf16> to vector<16x32xbf16>
    %c8_61 = arith.constant 8 : index
    %c0_62 = arith.constant 0 : index
    %c0_63 = arith.constant 0 : index
    %52 = vector.load %arg2[%c8_61, %c0_62, %c0_63] : memref<9x32x16xbf16, #tpu.memory_space<vmem>>, vector<1x32x16xbf16>
    %53 = vector.shape_cast %52 : vector<1x32x16xbf16> to vector<32x16xbf16>
    %cst_64 = arith.constant dense<0.000000e+00> : vector<16x16xf32>
    %54 = tpu.matmul %51, %53, %cst_64 {dimension_numbers = #tpu.dot_dimension_numbers<[1], [0], [0], [1], [0, 0, 1, 1], [], []>} : vector<16x32xbf16>, vector<32x16xbf16>, vector<16x16xf32> -> vector<16x16xf32>
    %55 = arith.addf %49, %54 : vector<16x16xf32>
    %56 = vector.broadcast %0 : vector<1x16xf32> to vector<16x16xf32>
    %57 = arith.addf %55, %56 : vector<16x16xf32>
    %cst_65 = arith.constant 2.000000e-01 : f32
    %58 = vector.broadcast %cst_65 : f32 to vector<16x16xf32>
    %59 = arith.mulf %58, %57 : vector<16x16xf32>
    %60 = arith.maximumf %57, %59 : vector<16x16xf32>
    %61 = arith.truncf %60 : vector<16x16xf32> to vector<16x16xbf16>
    %c0_66 = arith.constant 0 : index
    %c0_67 = arith.constant 0 : index
    %c0_68 = arith.constant 0 : index
    %62 = vector.load %arg4[%c0_66, %c0_67, %c0_68] : memref<2x16x16xbf16, #tpu.memory_space<vmem>>, vector<1x16x16xbf16>
    %63 = vector.shape_cast %62 : vector<1x16x16xbf16> to vector<16x16xbf16>
    %64 = vector.shape_cast %61 : vector<16x16xbf16> to vector<1x16x16xbf16>
    tpu.vector_store %arg4[%c0_66, %c0_67, %c0_68], %64 {strides = array<i32>} : memref<2x16x16xbf16, #tpu.memory_space<vmem>>, vector<1x16x16xbf16>,
    %cst_69 = arith.constant 0.000000e+00 : f32
    %65 = vector.broadcast %cst_69 : f32 to vector<16x16xf32>
    %c1_70 = arith.constant 1 : index
    %c0_71 = arith.constant 0 : index
    %c0_72 = arith.constant 0 : index
    %c0_73 = arith.constant 0 : index
    %66 = vector.load %arg1[%c1_70, %c0_71, %c0_72, %c0_73] : memref<2x3x24x32xbf16, #tpu.memory_space<vmem>>, vector<1x1x16x32xbf16>
    %67 = vector.shape_cast %66 : vector<1x1x16x32xbf16> to vector<16x32xbf16>
    %c0_74 = arith.constant 0 : index
    %c0_75 = arith.constant 0 : index
    %c0_76 = arith.constant 0 : index
    %68 = vector.load %arg2[%c0_74, %c0_75, %c0_76] : memref<9x32x16xbf16, #tpu.memory_space<vmem>>, vector<1x32x16xbf16>
    %69 = vector.shape_cast %68 : vector<1x32x16xbf16> to vector<32x16xbf16>
    %cst_77 = arith.constant dense<0.000000e+00> : vector<16x16xf32>
    %70 = tpu.matmul %67, %69, %cst_77 {dimension_numbers = #tpu.dot_dimension_numbers<[1], [0], [0], [1], [0, 0, 1, 1], [], []>} : vector<16x32xbf16>, vector<32x16xbf16>, vector<16x16xf32> -> vector<16x16xf32>
    %71 = arith.addf %65, %70 : vector<16x16xf32>
    %c1_78 = arith.constant 1 : index
    %c1_79 = arith.constant 1 : index
    %c0_80 = arith.constant 0 : index
    %c0_81 = arith.constant 0 : index
    %72 = vector.load %arg1[%c1_78, %c1_79, %c0_80, %c0_81] : memref<2x3x24x32xbf16, #tpu.memory_space<vmem>>, vector<1x1x16x32xbf16>
    %73 = vector.shape_cast %72 : vector<1x1x16x32xbf16> to vector<16x32xbf16>
    %c1_82 = arith.constant 1 : index
    %c0_83 = arith.constant 0 : index
    %c0_84 = arith.constant 0 : index
    %74 = vector.load %arg2[%c1_82, %c0_83, %c0_84] : memref<9x32x16xbf16, #tpu.memory_space<vmem>>, vector<1x32x16xbf16>
    %75 = vector.shape_cast %74 : vector<1x32x16xbf16> to vector<32x16xbf16>
    %cst_85 = arith.constant dense<0.000000e+00> : vector<16x16xf32>
    %76 = tpu.matmul %73, %75, %cst_85 {dimension_numbers = #tpu.dot_dimension_numbers<[1], [0], [0], [1], [0, 0, 1, 1], [], []>} : vector<16x32xbf16>, vector<32x16xbf16>, vector<16x16xf32> -> vector<16x16xf32>
    %77 = arith.addf %71, %76 : vector<16x16xf32>
    %c1_86 = arith.constant 1 : index
    %c2_87 = arith.constant 2 : index
    %c0_88 = arith.constant 0 : index
    %c0_89 = arith.constant 0 : index
    %78 = vector.load %arg1[%c1_86, %c2_87, %c0_88, %c0_89] : memref<2x3x24x32xbf16, #tpu.memory_space<vmem>>, vector<1x1x16x32xbf16>
    %79 = vector.shape_cast %78 : vector<1x1x16x32xbf16> to vector<16x32xbf16>
    %c2_90 = arith.constant 2 : index
    %c0_91 = arith.constant 0 : index
    %c0_92 = arith.constant 0 : index
    %80 = vector.load %arg2[%c2_90, %c0_91, %c0_92] : memref<9x32x16xbf16, #tpu.memory_space<vmem>>, vector<1x32x16xbf16>
    %81 = vector.shape_cast %80 : vector<1x32x16xbf16> to vector<32x16xbf16>
    %cst_93 = arith.constant dense<0.000000e+00> : vector<16x16xf32>
    %82 = tpu.matmul %79, %81, %cst_93 {dimension_numbers = #tpu.dot_dimension_numbers<[1], [0], [0], [1], [0, 0, 1, 1], [], []>} : vector<16x32xbf16>, vector<32x16xbf16>, vector<16x16xf32> -> vector<16x16xf32>
    %83 = arith.addf %77, %82 : vector<16x16xf32>
    %c1_94 = arith.constant 1 : index
    %c0_95 = arith.constant 0 : index
    %c4_96 = arith.constant 4 : index
    %c0_97 = arith.constant 0 : index
    %84 = vector.load %arg1[%c1_94, %c0_95, %c4_96, %c0_97] : memref<2x3x24x32xbf16, #tpu.memory_space<vmem>>, vector<1x1x16x32xbf16>
    %85 = vector.shape_cast %84 : vector<1x1x16x32xbf16> to vector<16x32xbf16>
    %c3_98 = arith.constant 3 : index
    %c0_99 = arith.constant 0 : index
    %c0_100 = arith.constant 0 : index
    %86 = vector.load %arg2[%c3_98, %c0_99, %c0_100] : memref<9x32x16xbf16, #tpu.memory_space<vmem>>, vector<1x32x16xbf16>
    %87 = vector.shape_cast %86 : vector<1x32x16xbf16> to vector<32x16xbf16>
    %cst_101 = arith.constant dense<0.000000e+00> : vector<16x16xf32>
    %88 = tpu.matmul %85, %87, %cst_101 {dimension_numbers = #tpu.dot_dimension_numbers<[1], [0], [0], [1], [0, 0, 1, 1], [], []>} : vector<16x32xbf16>, vector<32x16xbf16>, vector<16x16xf32> -> vector<16x16xf32>
    %89 = arith.addf %83, %88 : vector<16x16xf32>
    %c1_102 = arith.constant 1 : index
    %c1_103 = arith.constant 1 : index
    %c4_104 = arith.constant 4 : index
    %c0_105 = arith.constant 0 : index
    %90 = vector.load %arg1[%c1_102, %c1_103, %c4_104, %c0_105] : memref<2x3x24x32xbf16, #tpu.memory_space<vmem>>, vector<1x1x16x32xbf16>
    %91 = vector.shape_cast %90 : vector<1x1x16x32xbf16> to vector<16x32xbf16>
    %c4_106 = arith.constant 4 : index
    %c0_107 = arith.constant 0 : index
    %c0_108 = arith.constant 0 : index
    %92 = vector.load %arg2[%c4_106, %c0_107, %c0_108] : memref<9x32x16xbf16, #tpu.memory_space<vmem>>, vector<1x32x16xbf16>
    %93 = vector.shape_cast %92 : vector<1x32x16xbf16> to vector<32x16xbf16>
    %cst_109 = arith.constant dense<0.000000e+00> : vector<16x16xf32>
    %94 = tpu.matmul %91, %93, %cst_109 {dimension_numbers = #tpu.dot_dimension_numbers<[1], [0], [0], [1], [0, 0, 1, 1], [], []>} : vector<16x32xbf16>, vector<32x16xbf16>, vector<16x16xf32> -> vector<16x16xf32>
    %95 = arith.addf %89, %94 : vector<16x16xf32>
    %c1_110 = arith.constant 1 : index
    %c2_111 = arith.constant 2 : index
    %c4_112 = arith.constant 4 : index
    %c0_113 = arith.constant 0 : index
    %96 = vector.load %arg1[%c1_110, %c2_111, %c4_112, %c0_113] : memref<2x3x24x32xbf16, #tpu.memory_space<vmem>>, vector<1x1x16x32xbf16>
    %97 = vector.shape_cast %96 : vector<1x1x16x32xbf16> to vector<16x32xbf16>
    %c5_114 = arith.constant 5 : index
    %c0_115 = arith.constant 0 : index
    %c0_116 = arith.constant 0 : index
    %98 = vector.load %arg2[%c5_114, %c0_115, %c0_116] : memref<9x32x16xbf16, #tpu.memory_space<vmem>>, vector<1x32x16xbf16>
    %99 = vector.shape_cast %98 : vector<1x32x16xbf16> to vector<32x16xbf16>
    %cst_117 = arith.constant dense<0.000000e+00> : vector<16x16xf32>
    %100 = tpu.matmul %97, %99, %cst_117 {dimension_numbers = #tpu.dot_dimension_numbers<[1], [0], [0], [1], [0, 0, 1, 1], [], []>} : vector<16x32xbf16>, vector<32x16xbf16>, vector<16x16xf32> -> vector<16x16xf32>
    %101 = arith.addf %95, %100 : vector<16x16xf32>
    %c1_118 = arith.constant 1 : index
    %c0_119 = arith.constant 0 : index
    %c8_120 = arith.constant 8 : index
    %c0_121 = arith.constant 0 : index
    %102 = vector.load %arg1[%c1_118, %c0_119, %c8_120, %c0_121] : memref<2x3x24x32xbf16, #tpu.memory_space<vmem>>, vector<1x1x16x32xbf16>
    %103 = vector.shape_cast %102 : vector<1x1x16x32xbf16> to vector<16x32xbf16>
    %c6_122 = arith.constant 6 : index
    %c0_123 = arith.constant 0 : index
    %c0_124 = arith.constant 0 : index
    %104 = vector.load %arg2[%c6_122, %c0_123, %c0_124] : memref<9x32x16xbf16, #tpu.memory_space<vmem>>, vector<1x32x16xbf16>
    %105 = vector.shape_cast %104 : vector<1x32x16xbf16> to vector<32x16xbf16>
    %cst_125 = arith.constant dense<0.000000e+00> : vector<16x16xf32>
    %106 = tpu.matmul %103, %105, %cst_125 {dimension_numbers = #tpu.dot_dimension_numbers<[1], [0], [0], [1], [0, 0, 1, 1], [], []>} : vector<16x32xbf16>, vector<32x16xbf16>, vector<16x16xf32> -> vector<16x16xf32>
    %107 = arith.addf %101, %106 : vector<16x16xf32>
    %c1_126 = arith.constant 1 : index
    %c1_127 = arith.constant 1 : index
    %c8_128 = arith.constant 8 : index
    %c0_129 = arith.constant 0 : index
    %108 = vector.load %arg1[%c1_126, %c1_127, %c8_128, %c0_129] : memref<2x3x24x32xbf16, #tpu.memory_space<vmem>>, vector<1x1x16x32xbf16>
    %109 = vector.shape_cast %108 : vector<1x1x16x32xbf16> to vector<16x32xbf16>
    %c7_130 = arith.constant 7 : index
    %c0_131 = arith.constant 0 : index
    %c0_132 = arith.constant 0 : index
    %110 = vector.load %arg2[%c7_130, %c0_131, %c0_132] : memref<9x32x16xbf16, #tpu.memory_space<vmem>>, vector<1x32x16xbf16>
    %111 = vector.shape_cast %110 : vector<1x32x16xbf16> to vector<32x16xbf16>
    %cst_133 = arith.constant dense<0.000000e+00> : vector<16x16xf32>
    %112 = tpu.matmul %109, %111, %cst_133 {dimension_numbers = #tpu.dot_dimension_numbers<[1], [0], [0], [1], [0, 0, 1, 1], [], []>} : vector<16x32xbf16>, vector<32x16xbf16>, vector<16x16xf32> -> vector<16x16xf32>
    %113 = arith.addf %107, %112 : vector<16x16xf32>
    %c1_134 = arith.constant 1 : index
    %c2_135 = arith.constant 2 : index
    %c8_136 = arith.constant 8 : index
    %c0_137 = arith.constant 0 : index
    %114 = vector.load %arg1[%c1_134, %c2_135, %c8_136, %c0_137] : memref<2x3x24x32xbf16, #tpu.memory_space<vmem>>, vector<1x1x16x32xbf16>
    %115 = vector.shape_cast %114 : vector<1x1x16x32xbf16> to vector<16x32xbf16>
    %c8_138 = arith.constant 8 : index
    %c0_139 = arith.constant 0 : index
    %c0_140 = arith.constant 0 : index
    %116 = vector.load %arg2[%c8_138, %c0_139, %c0_140] : memref<9x32x16xbf16, #tpu.memory_space<vmem>>, vector<1x32x16xbf16>
    %117 = vector.shape_cast %116 : vector<1x32x16xbf16> to vector<32x16xbf16>
    %cst_141 = arith.constant dense<0.000000e+00> : vector<16x16xf32>
    %118 = tpu.matmul %115, %117, %cst_141 {dimension_numbers = #tpu.dot_dimension_numbers<[1], [0], [0], [1], [0, 0, 1, 1], [], []>} : vector<16x32xbf16>, vector<32x16xbf16>, vector<16x16xf32> -> vector<16x16xf32>
    %119 = arith.addf %113, %118 : vector<16x16xf32>
    %120 = vector.broadcast %0 : vector<1x16xf32> to vector<16x16xf32>
    %121 = arith.addf %119, %120 : vector<16x16xf32>
    %cst_142 = arith.constant 2.000000e-01 : f32
    %122 = vector.broadcast %cst_142 : f32 to vector<16x16xf32>
    %123 = arith.mulf %122, %121 : vector<16x16xf32>
    %124 = arith.maximumf %121, %123 : vector<16x16xf32>
    %125 = arith.truncf %124 : vector<16x16xf32> to vector<16x16xbf16>
    %c1_143 = arith.constant 1 : index
    %c0_144 = arith.constant 0 : index
    %c0_145 = arith.constant 0 : index
    %126 = vector.load %arg4[%c1_143, %c0_144, %c0_145] : memref<2x16x16xbf16, #tpu.memory_space<vmem>>, vector<1x16x16xbf16>
    %127 = vector.shape_cast %126 : vector<1x16x16xbf16> to vector<16x16xbf16>
    %128 = vector.shape_cast %125 : vector<16x16xbf16> to vector<1x16x16xbf16>
    tpu.vector_store %arg4[%c1_143, %c0_144, %c0_145], %128 {strides = array<i32>} : memref<2x16x16xbf16, #tpu.memory_space<vmem>>, vector<1x16x16xbf16>,
    return
  }
  func.func @transform_0(%arg0: i32) -> (i32, i32, i32, i32) {
    %c0_i32 = arith.constant 0 : i32
    %c0_i32_0 = arith.constant 0 : i32
    %c0_i32_1 = arith.constant 0 : i32
    %c0_i32_2 = arith.constant 0 : i32
    return %arg0, %c0_i32, %c0_i32_0, %c0_i32_1 : i32, i32, i32, i32
  }
  func.func @transform_1(%arg0: i32) -> (i32, i32, i32) {
    %c0_i32 = arith.constant 0 : i32
    %c0_i32_0 = arith.constant 0 : i32
    %c0_i32_1 = arith.constant 0 : i32
    %c0_i32_2 = arith.constant 0 : i32
    return %c0_i32, %c0_i32_0, %c0_i32_1 : i32, i32, i32
  }
  func.func @transform_2(%arg0: i32) -> (i32, i32) {
    %c0_i32 = arith.constant 0 : i32
    %c0_i32_0 = arith.constant 0 : i32
    %c0_i32_1 = arith.constant 0 : i32
    return %c0_i32, %c0_i32_0 : i32, i32
  }
  func.func @transform_3(%arg0: i32) -> (i32, i32, i32) {
    %c0_i32 = arith.constant 0 : i32
    %c0_i32_0 = arith.constant 0 : i32
    %c0_i32_1 = arith.constant 0 : i32
    return %arg0, %c0_i32, %c0_i32_0 : i32, i32, i32
  }
}

module attributes {stable_mosaic.version = 11 : i64} {
  func.func @_conv_tap_kernel(%arg0: i32, %arg1: memref<2x3x8x64xbf16, #tpu.memory_space<vmem>>, %arg2: memref<9x64x32xbf16, #tpu.memory_space<vmem>>, %arg3: memref<1x32xf32, #tpu.memory_space<vmem>>, %arg4: memref<2x4x32xbf16, #tpu.memory_space<vmem>>) attributes {dimension_semantics = [#tpu.dimension_semantics<parallel>], iteration_bounds = array<i64: 1>, scalar_prefetch = 0 : i64, scratch_operands = 0 : i64, tpu.core_type = #tpu.core_type<tc>, window_params = [{transform_indices = @transform_0, window_bounds = array<i64: 2, 3, 8, 64>}, {pipeline_mode = #tpu.pipeline_mode<synchronous>, transform_indices = @transform_1, window_bounds = array<i64: 9, 64, 32>}, {pipeline_mode = #tpu.pipeline_mode<synchronous>, transform_indices = @transform_2, window_bounds = array<i64: 1, 32>}, {transform_indices = @transform_3, window_bounds = array<i64: 2, 4, 32>}]} {
    %c0 = arith.constant 0 : index
    %c0_0 = arith.constant 0 : index
    %0 = vector.load %arg3[%c0, %c0_0] : memref<1x32xf32, #tpu.memory_space<vmem>>, vector<1x32xf32>
    %cst = arith.constant 0.000000e+00 : f32
    %1 = vector.broadcast %cst : f32 to vector<4x32xf32>
    %c0_1 = arith.constant 0 : index
    %c0_2 = arith.constant 0 : index
    %c0_3 = arith.constant 0 : index
    %c0_4 = arith.constant 0 : index
    %2 = vector.load %arg1[%c0_1, %c0_2, %c0_3, %c0_4] : memref<2x3x8x64xbf16, #tpu.memory_space<vmem>>, vector<1x1x4x64xbf16>
    %3 = vector.shape_cast %2 : vector<1x1x4x64xbf16> to vector<4x64xbf16>
    %c0_5 = arith.constant 0 : index
    %c0_6 = arith.constant 0 : index
    %c0_7 = arith.constant 0 : index
    %4 = vector.load %arg2[%c0_5, %c0_6, %c0_7] : memref<9x64x32xbf16, #tpu.memory_space<vmem>>, vector<1x64x32xbf16>
    %5 = vector.shape_cast %4 : vector<1x64x32xbf16> to vector<64x32xbf16>
    %cst_8 = arith.constant dense<0.000000e+00> : vector<4x32xf32>
    %6 = tpu.matmul %3, %5, %cst_8 {dimension_numbers = #tpu.dot_dimension_numbers<[1], [0], [0], [1], [0, 0, 1, 1], [], []>} : vector<4x64xbf16>, vector<64x32xbf16>, vector<4x32xf32> -> vector<4x32xf32>
    %7 = arith.addf %1, %6 : vector<4x32xf32>
    %c0_9 = arith.constant 0 : index
    %c1 = arith.constant 1 : index
    %c0_10 = arith.constant 0 : index
    %c0_11 = arith.constant 0 : index
    %8 = vector.load %arg1[%c0_9, %c1, %c0_10, %c0_11] : memref<2x3x8x64xbf16, #tpu.memory_space<vmem>>, vector<1x1x4x64xbf16>
    %9 = vector.shape_cast %8 : vector<1x1x4x64xbf16> to vector<4x64xbf16>
    %c1_12 = arith.constant 1 : index
    %c0_13 = arith.constant 0 : index
    %c0_14 = arith.constant 0 : index
    %10 = vector.load %arg2[%c1_12, %c0_13, %c0_14] : memref<9x64x32xbf16, #tpu.memory_space<vmem>>, vector<1x64x32xbf16>
    %11 = vector.shape_cast %10 : vector<1x64x32xbf16> to vector<64x32xbf16>
    %cst_15 = arith.constant dense<0.000000e+00> : vector<4x32xf32>
    %12 = tpu.matmul %9, %11, %cst_15 {dimension_numbers = #tpu.dot_dimension_numbers<[1], [0], [0], [1], [0, 0, 1, 1], [], []>} : vector<4x64xbf16>, vector<64x32xbf16>, vector<4x32xf32> -> vector<4x32xf32>
    %13 = arith.addf %7, %12 : vector<4x32xf32>
    %c0_16 = arith.constant 0 : index
    %c2 = arith.constant 2 : index
    %c0_17 = arith.constant 0 : index
    %c0_18 = arith.constant 0 : index
    %14 = vector.load %arg1[%c0_16, %c2, %c0_17, %c0_18] : memref<2x3x8x64xbf16, #tpu.memory_space<vmem>>, vector<1x1x4x64xbf16>
    %15 = vector.shape_cast %14 : vector<1x1x4x64xbf16> to vector<4x64xbf16>
    %c2_19 = arith.constant 2 : index
    %c0_20 = arith.constant 0 : index
    %c0_21 = arith.constant 0 : index
    %16 = vector.load %arg2[%c2_19, %c0_20, %c0_21] : memref<9x64x32xbf16, #tpu.memory_space<vmem>>, vector<1x64x32xbf16>
    %17 = vector.shape_cast %16 : vector<1x64x32xbf16> to vector<64x32xbf16>
    %cst_22 = arith.constant dense<0.000000e+00> : vector<4x32xf32>
    %18 = tpu.matmul %15, %17, %cst_22 {dimension_numbers = #tpu.dot_dimension_numbers<[1], [0], [0], [1], [0, 0, 1, 1], [], []>} : vector<4x64xbf16>, vector<64x32xbf16>, vector<4x32xf32> -> vector<4x32xf32>
    %19 = arith.addf %13, %18 : vector<4x32xf32>
    %c0_23 = arith.constant 0 : index
    %c0_24 = arith.constant 0 : index
    %c2_25 = arith.constant 2 : index
    %c0_26 = arith.constant 0 : index
    %20 = vector.load %arg1[%c0_23, %c0_24, %c2_25, %c0_26] : memref<2x3x8x64xbf16, #tpu.memory_space<vmem>>, vector<1x1x4x64xbf16>
    %21 = vector.shape_cast %20 : vector<1x1x4x64xbf16> to vector<4x64xbf16>
    %c3 = arith.constant 3 : index
    %c0_27 = arith.constant 0 : index
    %c0_28 = arith.constant 0 : index
    %22 = vector.load %arg2[%c3, %c0_27, %c0_28] : memref<9x64x32xbf16, #tpu.memory_space<vmem>>, vector<1x64x32xbf16>
    %23 = vector.shape_cast %22 : vector<1x64x32xbf16> to vector<64x32xbf16>
    %cst_29 = arith.constant dense<0.000000e+00> : vector<4x32xf32>
    %24 = tpu.matmul %21, %23, %cst_29 {dimension_numbers = #tpu.dot_dimension_numbers<[1], [0], [0], [1], [0, 0, 1, 1], [], []>} : vector<4x64xbf16>, vector<64x32xbf16>, vector<4x32xf32> -> vector<4x32xf32>
    %25 = arith.addf %19, %24 : vector<4x32xf32>
    %c0_30 = arith.constant 0 : index
    %c1_31 = arith.constant 1 : index
    %c2_32 = arith.constant 2 : index
    %c0_33 = arith.constant 0 : index
    %26 = vector.load %arg1[%c0_30, %c1_31, %c2_32, %c0_33] : memref<2x3x8x64xbf16, #tpu.memory_space<vmem>>, vector<1x1x4x64xbf16>
    %27 = vector.shape_cast %26 : vector<1x1x4x64xbf16> to vector<4x64xbf16>
    %c4 = arith.constant 4 : index
    %c0_34 = arith.constant 0 : index
    %c0_35 = arith.constant 0 : index
    %28 = vector.load %arg2[%c4, %c0_34, %c0_35] : memref<9x64x32xbf16, #tpu.memory_space<vmem>>, vector<1x64x32xbf16>
    %29 = vector.shape_cast %28 : vector<1x64x32xbf16> to vector<64x32xbf16>
    %cst_36 = arith.constant dense<0.000000e+00> : vector<4x32xf32>
    %30 = tpu.matmul %27, %29, %cst_36 {dimension_numbers = #tpu.dot_dimension_numbers<[1], [0], [0], [1], [0, 0, 1, 1], [], []>} : vector<4x64xbf16>, vector<64x32xbf16>, vector<4x32xf32> -> vector<4x32xf32>
    %31 = arith.addf %25, %30 : vector<4x32xf32>
    %c0_37 = arith.constant 0 : index
    %c2_38 = arith.constant 2 : index
    %c2_39 = arith.constant 2 : index
    %c0_40 = arith.constant 0 : index
    %32 = vector.load %arg1[%c0_37, %c2_38, %c2_39, %c0_40] : memref<2x3x8x64xbf16, #tpu.memory_space<vmem>>, vector<1x1x4x64xbf16>
    %33 = vector.shape_cast %32 : vector<1x1x4x64xbf16> to vector<4x64xbf16>
    %c5 = arith.constant 5 : index
    %c0_41 = arith.constant 0 : index
    %c0_42 = arith.constant 0 : index
    %34 = vector.load %arg2[%c5, %c0_41, %c0_42] : memref<9x64x32xbf16, #tpu.memory_space<vmem>>, vector<1x64x32xbf16>
    %35 = vector.shape_cast %34 : vector<1x64x32xbf16> to vector<64x32xbf16>
    %cst_43 = arith.constant dense<0.000000e+00> : vector<4x32xf32>
    %36 = tpu.matmul %33, %35, %cst_43 {dimension_numbers = #tpu.dot_dimension_numbers<[1], [0], [0], [1], [0, 0, 1, 1], [], []>} : vector<4x64xbf16>, vector<64x32xbf16>, vector<4x32xf32> -> vector<4x32xf32>
    %37 = arith.addf %31, %36 : vector<4x32xf32>
    %c0_44 = arith.constant 0 : index
    %c0_45 = arith.constant 0 : index
    %c4_46 = arith.constant 4 : index
    %c0_47 = arith.constant 0 : index
    %38 = vector.load %arg1[%c0_44, %c0_45, %c4_46, %c0_47] : memref<2x3x8x64xbf16, #tpu.memory_space<vmem>>, vector<1x1x4x64xbf16>
    %39 = vector.shape_cast %38 : vector<1x1x4x64xbf16> to vector<4x64xbf16>
    %c6 = arith.constant 6 : index
    %c0_48 = arith.constant 0 : index
    %c0_49 = arith.constant 0 : index
    %40 = vector.load %arg2[%c6, %c0_48, %c0_49] : memref<9x64x32xbf16, #tpu.memory_space<vmem>>, vector<1x64x32xbf16>
    %41 = vector.shape_cast %40 : vector<1x64x32xbf16> to vector<64x32xbf16>
    %cst_50 = arith.constant dense<0.000000e+00> : vector<4x32xf32>
    %42 = tpu.matmul %39, %41, %cst_50 {dimension_numbers = #tpu.dot_dimension_numbers<[1], [0], [0], [1], [0, 0, 1, 1], [], []>} : vector<4x64xbf16>, vector<64x32xbf16>, vector<4x32xf32> -> vector<4x32xf32>
    %43 = arith.addf %37, %42 : vector<4x32xf32>
    %c0_51 = arith.constant 0 : index
    %c1_52 = arith.constant 1 : index
    %c4_53 = arith.constant 4 : index
    %c0_54 = arith.constant 0 : index
    %44 = vector.load %arg1[%c0_51, %c1_52, %c4_53, %c0_54] : memref<2x3x8x64xbf16, #tpu.memory_space<vmem>>, vector<1x1x4x64xbf16>
    %45 = vector.shape_cast %44 : vector<1x1x4x64xbf16> to vector<4x64xbf16>
    %c7 = arith.constant 7 : index
    %c0_55 = arith.constant 0 : index
    %c0_56 = arith.constant 0 : index
    %46 = vector.load %arg2[%c7, %c0_55, %c0_56] : memref<9x64x32xbf16, #tpu.memory_space<vmem>>, vector<1x64x32xbf16>
    %47 = vector.shape_cast %46 : vector<1x64x32xbf16> to vector<64x32xbf16>
    %cst_57 = arith.constant dense<0.000000e+00> : vector<4x32xf32>
    %48 = tpu.matmul %45, %47, %cst_57 {dimension_numbers = #tpu.dot_dimension_numbers<[1], [0], [0], [1], [0, 0, 1, 1], [], []>} : vector<4x64xbf16>, vector<64x32xbf16>, vector<4x32xf32> -> vector<4x32xf32>
    %49 = arith.addf %43, %48 : vector<4x32xf32>
    %c0_58 = arith.constant 0 : index
    %c2_59 = arith.constant 2 : index
    %c4_60 = arith.constant 4 : index
    %c0_61 = arith.constant 0 : index
    %50 = vector.load %arg1[%c0_58, %c2_59, %c4_60, %c0_61] : memref<2x3x8x64xbf16, #tpu.memory_space<vmem>>, vector<1x1x4x64xbf16>
    %51 = vector.shape_cast %50 : vector<1x1x4x64xbf16> to vector<4x64xbf16>
    %c8 = arith.constant 8 : index
    %c0_62 = arith.constant 0 : index
    %c0_63 = arith.constant 0 : index
    %52 = vector.load %arg2[%c8, %c0_62, %c0_63] : memref<9x64x32xbf16, #tpu.memory_space<vmem>>, vector<1x64x32xbf16>
    %53 = vector.shape_cast %52 : vector<1x64x32xbf16> to vector<64x32xbf16>
    %cst_64 = arith.constant dense<0.000000e+00> : vector<4x32xf32>
    %54 = tpu.matmul %51, %53, %cst_64 {dimension_numbers = #tpu.dot_dimension_numbers<[1], [0], [0], [1], [0, 0, 1, 1], [], []>} : vector<4x64xbf16>, vector<64x32xbf16>, vector<4x32xf32> -> vector<4x32xf32>
    %55 = arith.addf %49, %54 : vector<4x32xf32>
    %56 = vector.broadcast %0 : vector<1x32xf32> to vector<4x32xf32>
    %57 = arith.addf %55, %56 : vector<4x32xf32>
    %cst_65 = arith.constant 2.000000e-01 : f32
    %58 = vector.broadcast %cst_65 : f32 to vector<4x32xf32>
    %59 = arith.mulf %58, %57 : vector<4x32xf32>
    %60 = arith.maximumf %57, %59 : vector<4x32xf32>
    %61 = arith.truncf %60 : vector<4x32xf32> to vector<4x32xbf16>
    %c0_66 = arith.constant 0 : index
    %c0_67 = arith.constant 0 : index
    %c0_68 = arith.constant 0 : index
    %62 = vector.load %arg4[%c0_66, %c0_67, %c0_68] : memref<2x4x32xbf16, #tpu.memory_space<vmem>>, vector<1x4x32xbf16>
    %63 = vector.shape_cast %62 : vector<1x4x32xbf16> to vector<4x32xbf16>
    %64 = vector.shape_cast %61 : vector<4x32xbf16> to vector<1x4x32xbf16>
    tpu.vector_store %arg4[%c0_66, %c0_67, %c0_68], %64 {strides = array<i32>} : memref<2x4x32xbf16, #tpu.memory_space<vmem>>, vector<1x4x32xbf16>,
    %cst_69 = arith.constant 0.000000e+00 : f32
    %65 = vector.broadcast %cst_69 : f32 to vector<4x32xf32>
    %c1_70 = arith.constant 1 : index
    %c0_71 = arith.constant 0 : index
    %c0_72 = arith.constant 0 : index
    %c0_73 = arith.constant 0 : index
    %66 = vector.load %arg1[%c1_70, %c0_71, %c0_72, %c0_73] : memref<2x3x8x64xbf16, #tpu.memory_space<vmem>>, vector<1x1x4x64xbf16>
    %67 = vector.shape_cast %66 : vector<1x1x4x64xbf16> to vector<4x64xbf16>
    %c0_74 = arith.constant 0 : index
    %c0_75 = arith.constant 0 : index
    %c0_76 = arith.constant 0 : index
    %68 = vector.load %arg2[%c0_74, %c0_75, %c0_76] : memref<9x64x32xbf16, #tpu.memory_space<vmem>>, vector<1x64x32xbf16>
    %69 = vector.shape_cast %68 : vector<1x64x32xbf16> to vector<64x32xbf16>
    %cst_77 = arith.constant dense<0.000000e+00> : vector<4x32xf32>
    %70 = tpu.matmul %67, %69, %cst_77 {dimension_numbers = #tpu.dot_dimension_numbers<[1], [0], [0], [1], [0, 0, 1, 1], [], []>} : vector<4x64xbf16>, vector<64x32xbf16>, vector<4x32xf32> -> vector<4x32xf32>
    %71 = arith.addf %65, %70 : vector<4x32xf32>
    %c1_78 = arith.constant 1 : index
    %c1_79 = arith.constant 1 : index
    %c0_80 = arith.constant 0 : index
    %c0_81 = arith.constant 0 : index
    %72 = vector.load %arg1[%c1_78, %c1_79, %c0_80, %c0_81] : memref<2x3x8x64xbf16, #tpu.memory_space<vmem>>, vector<1x1x4x64xbf16>
    %73 = vector.shape_cast %72 : vector<1x1x4x64xbf16> to vector<4x64xbf16>
    %c1_82 = arith.constant 1 : index
    %c0_83 = arith.constant 0 : index
    %c0_84 = arith.constant 0 : index
    %74 = vector.load %arg2[%c1_82, %c0_83, %c0_84] : memref<9x64x32xbf16, #tpu.memory_space<vmem>>, vector<1x64x32xbf16>
    %75 = vector.shape_cast %74 : vector<1x64x32xbf16> to vector<64x32xbf16>
    %cst_85 = arith.constant dense<0.000000e+00> : vector<4x32xf32>
    %76 = tpu.matmul %73, %75, %cst_85 {dimension_numbers = #tpu.dot_dimension_numbers<[1], [0], [0], [1], [0, 0, 1, 1], [], []>} : vector<4x64xbf16>, vector<64x32xbf16>, vector<4x32xf32> -> vector<4x32xf32>
    %77 = arith.addf %71, %76 : vector<4x32xf32>
    %c1_86 = arith.constant 1 : index
    %c2_87 = arith.constant 2 : index
    %c0_88 = arith.constant 0 : index
    %c0_89 = arith.constant 0 : index
    %78 = vector.load %arg1[%c1_86, %c2_87, %c0_88, %c0_89] : memref<2x3x8x64xbf16, #tpu.memory_space<vmem>>, vector<1x1x4x64xbf16>
    %79 = vector.shape_cast %78 : vector<1x1x4x64xbf16> to vector<4x64xbf16>
    %c2_90 = arith.constant 2 : index
    %c0_91 = arith.constant 0 : index
    %c0_92 = arith.constant 0 : index
    %80 = vector.load %arg2[%c2_90, %c0_91, %c0_92] : memref<9x64x32xbf16, #tpu.memory_space<vmem>>, vector<1x64x32xbf16>
    %81 = vector.shape_cast %80 : vector<1x64x32xbf16> to vector<64x32xbf16>
    %cst_93 = arith.constant dense<0.000000e+00> : vector<4x32xf32>
    %82 = tpu.matmul %79, %81, %cst_93 {dimension_numbers = #tpu.dot_dimension_numbers<[1], [0], [0], [1], [0, 0, 1, 1], [], []>} : vector<4x64xbf16>, vector<64x32xbf16>, vector<4x32xf32> -> vector<4x32xf32>
    %83 = arith.addf %77, %82 : vector<4x32xf32>
    %c1_94 = arith.constant 1 : index
    %c0_95 = arith.constant 0 : index
    %c2_96 = arith.constant 2 : index
    %c0_97 = arith.constant 0 : index
    %84 = vector.load %arg1[%c1_94, %c0_95, %c2_96, %c0_97] : memref<2x3x8x64xbf16, #tpu.memory_space<vmem>>, vector<1x1x4x64xbf16>
    %85 = vector.shape_cast %84 : vector<1x1x4x64xbf16> to vector<4x64xbf16>
    %c3_98 = arith.constant 3 : index
    %c0_99 = arith.constant 0 : index
    %c0_100 = arith.constant 0 : index
    %86 = vector.load %arg2[%c3_98, %c0_99, %c0_100] : memref<9x64x32xbf16, #tpu.memory_space<vmem>>, vector<1x64x32xbf16>
    %87 = vector.shape_cast %86 : vector<1x64x32xbf16> to vector<64x32xbf16>
    %cst_101 = arith.constant dense<0.000000e+00> : vector<4x32xf32>
    %88 = tpu.matmul %85, %87, %cst_101 {dimension_numbers = #tpu.dot_dimension_numbers<[1], [0], [0], [1], [0, 0, 1, 1], [], []>} : vector<4x64xbf16>, vector<64x32xbf16>, vector<4x32xf32> -> vector<4x32xf32>
    %89 = arith.addf %83, %88 : vector<4x32xf32>
    %c1_102 = arith.constant 1 : index
    %c1_103 = arith.constant 1 : index
    %c2_104 = arith.constant 2 : index
    %c0_105 = arith.constant 0 : index
    %90 = vector.load %arg1[%c1_102, %c1_103, %c2_104, %c0_105] : memref<2x3x8x64xbf16, #tpu.memory_space<vmem>>, vector<1x1x4x64xbf16>
    %91 = vector.shape_cast %90 : vector<1x1x4x64xbf16> to vector<4x64xbf16>
    %c4_106 = arith.constant 4 : index
    %c0_107 = arith.constant 0 : index
    %c0_108 = arith.constant 0 : index
    %92 = vector.load %arg2[%c4_106, %c0_107, %c0_108] : memref<9x64x32xbf16, #tpu.memory_space<vmem>>, vector<1x64x32xbf16>
    %93 = vector.shape_cast %92 : vector<1x64x32xbf16> to vector<64x32xbf16>
    %cst_109 = arith.constant dense<0.000000e+00> : vector<4x32xf32>
    %94 = tpu.matmul %91, %93, %cst_109 {dimension_numbers = #tpu.dot_dimension_numbers<[1], [0], [0], [1], [0, 0, 1, 1], [], []>} : vector<4x64xbf16>, vector<64x32xbf16>, vector<4x32xf32> -> vector<4x32xf32>
    %95 = arith.addf %89, %94 : vector<4x32xf32>
    %c1_110 = arith.constant 1 : index
    %c2_111 = arith.constant 2 : index
    %c2_112 = arith.constant 2 : index
    %c0_113 = arith.constant 0 : index
    %96 = vector.load %arg1[%c1_110, %c2_111, %c2_112, %c0_113] : memref<2x3x8x64xbf16, #tpu.memory_space<vmem>>, vector<1x1x4x64xbf16>
    %97 = vector.shape_cast %96 : vector<1x1x4x64xbf16> to vector<4x64xbf16>
    %c5_114 = arith.constant 5 : index
    %c0_115 = arith.constant 0 : index
    %c0_116 = arith.constant 0 : index
    %98 = vector.load %arg2[%c5_114, %c0_115, %c0_116] : memref<9x64x32xbf16, #tpu.memory_space<vmem>>, vector<1x64x32xbf16>
    %99 = vector.shape_cast %98 : vector<1x64x32xbf16> to vector<64x32xbf16>
    %cst_117 = arith.constant dense<0.000000e+00> : vector<4x32xf32>
    %100 = tpu.matmul %97, %99, %cst_117 {dimension_numbers = #tpu.dot_dimension_numbers<[1], [0], [0], [1], [0, 0, 1, 1], [], []>} : vector<4x64xbf16>, vector<64x32xbf16>, vector<4x32xf32> -> vector<4x32xf32>
    %101 = arith.addf %95, %100 : vector<4x32xf32>
    %c1_118 = arith.constant 1 : index
    %c0_119 = arith.constant 0 : index
    %c4_120 = arith.constant 4 : index
    %c0_121 = arith.constant 0 : index
    %102 = vector.load %arg1[%c1_118, %c0_119, %c4_120, %c0_121] : memref<2x3x8x64xbf16, #tpu.memory_space<vmem>>, vector<1x1x4x64xbf16>
    %103 = vector.shape_cast %102 : vector<1x1x4x64xbf16> to vector<4x64xbf16>
    %c6_122 = arith.constant 6 : index
    %c0_123 = arith.constant 0 : index
    %c0_124 = arith.constant 0 : index
    %104 = vector.load %arg2[%c6_122, %c0_123, %c0_124] : memref<9x64x32xbf16, #tpu.memory_space<vmem>>, vector<1x64x32xbf16>
    %105 = vector.shape_cast %104 : vector<1x64x32xbf16> to vector<64x32xbf16>
    %cst_125 = arith.constant dense<0.000000e+00> : vector<4x32xf32>
    %106 = tpu.matmul %103, %105, %cst_125 {dimension_numbers = #tpu.dot_dimension_numbers<[1], [0], [0], [1], [0, 0, 1, 1], [], []>} : vector<4x64xbf16>, vector<64x32xbf16>, vector<4x32xf32> -> vector<4x32xf32>
    %107 = arith.addf %101, %106 : vector<4x32xf32>
    %c1_126 = arith.constant 1 : index
    %c1_127 = arith.constant 1 : index
    %c4_128 = arith.constant 4 : index
    %c0_129 = arith.constant 0 : index
    %108 = vector.load %arg1[%c1_126, %c1_127, %c4_128, %c0_129] : memref<2x3x8x64xbf16, #tpu.memory_space<vmem>>, vector<1x1x4x64xbf16>
    %109 = vector.shape_cast %108 : vector<1x1x4x64xbf16> to vector<4x64xbf16>
    %c7_130 = arith.constant 7 : index
    %c0_131 = arith.constant 0 : index
    %c0_132 = arith.constant 0 : index
    %110 = vector.load %arg2[%c7_130, %c0_131, %c0_132] : memref<9x64x32xbf16, #tpu.memory_space<vmem>>, vector<1x64x32xbf16>
    %111 = vector.shape_cast %110 : vector<1x64x32xbf16> to vector<64x32xbf16>
    %cst_133 = arith.constant dense<0.000000e+00> : vector<4x32xf32>
    %112 = tpu.matmul %109, %111, %cst_133 {dimension_numbers = #tpu.dot_dimension_numbers<[1], [0], [0], [1], [0, 0, 1, 1], [], []>} : vector<4x64xbf16>, vector<64x32xbf16>, vector<4x32xf32> -> vector<4x32xf32>
    %113 = arith.addf %107, %112 : vector<4x32xf32>
    %c1_134 = arith.constant 1 : index
    %c2_135 = arith.constant 2 : index
    %c4_136 = arith.constant 4 : index
    %c0_137 = arith.constant 0 : index
    %114 = vector.load %arg1[%c1_134, %c2_135, %c4_136, %c0_137] : memref<2x3x8x64xbf16, #tpu.memory_space<vmem>>, vector<1x1x4x64xbf16>
    %115 = vector.shape_cast %114 : vector<1x1x4x64xbf16> to vector<4x64xbf16>
    %c8_138 = arith.constant 8 : index
    %c0_139 = arith.constant 0 : index
    %c0_140 = arith.constant 0 : index
    %116 = vector.load %arg2[%c8_138, %c0_139, %c0_140] : memref<9x64x32xbf16, #tpu.memory_space<vmem>>, vector<1x64x32xbf16>
    %117 = vector.shape_cast %116 : vector<1x64x32xbf16> to vector<64x32xbf16>
    %cst_141 = arith.constant dense<0.000000e+00> : vector<4x32xf32>
    %118 = tpu.matmul %115, %117, %cst_141 {dimension_numbers = #tpu.dot_dimension_numbers<[1], [0], [0], [1], [0, 0, 1, 1], [], []>} : vector<4x64xbf16>, vector<64x32xbf16>, vector<4x32xf32> -> vector<4x32xf32>
    %119 = arith.addf %113, %118 : vector<4x32xf32>
    %120 = vector.broadcast %0 : vector<1x32xf32> to vector<4x32xf32>
    %121 = arith.addf %119, %120 : vector<4x32xf32>
    %cst_142 = arith.constant 2.000000e-01 : f32
    %122 = vector.broadcast %cst_142 : f32 to vector<4x32xf32>
    %123 = arith.mulf %122, %121 : vector<4x32xf32>
    %124 = arith.maximumf %121, %123 : vector<4x32xf32>
    %125 = arith.truncf %124 : vector<4x32xf32> to vector<4x32xbf16>
    %c1_143 = arith.constant 1 : index
    %c0_144 = arith.constant 0 : index
    %c0_145 = arith.constant 0 : index
    %126 = vector.load %arg4[%c1_143, %c0_144, %c0_145] : memref<2x4x32xbf16, #tpu.memory_space<vmem>>, vector<1x4x32xbf16>
    %127 = vector.shape_cast %126 : vector<1x4x32xbf16> to vector<4x32xbf16>
    %128 = vector.shape_cast %125 : vector<4x32xbf16> to vector<1x4x32xbf16>
    tpu.vector_store %arg4[%c1_143, %c0_144, %c0_145], %128 {strides = array<i32>} : memref<2x4x32xbf16, #tpu.memory_space<vmem>>, vector<1x4x32xbf16>,
    return
  }
  func.func @transform_0(%arg0: i32) -> (i32, i32, i32, i32) {
    %c0_i32 = arith.constant 0 : i32
    %c0_i32_0 = arith.constant 0 : i32
    %c0_i32_1 = arith.constant 0 : i32
    %c0_i32_2 = arith.constant 0 : i32
    return %arg0, %c0_i32, %c0_i32_0, %c0_i32_1 : i32, i32, i32, i32
  }
  func.func @transform_1(%arg0: i32) -> (i32, i32, i32) {
    %c0_i32 = arith.constant 0 : i32
    %c0_i32_0 = arith.constant 0 : i32
    %c0_i32_1 = arith.constant 0 : i32
    %c0_i32_2 = arith.constant 0 : i32
    return %c0_i32, %c0_i32_0, %c0_i32_1 : i32, i32, i32
  }
  func.func @transform_2(%arg0: i32) -> (i32, i32) {
    %c0_i32 = arith.constant 0 : i32
    %c0_i32_0 = arith.constant 0 : i32
    %c0_i32_1 = arith.constant 0 : i32
    return %c0_i32, %c0_i32_0 : i32, i32
  }
  func.func @transform_3(%arg0: i32) -> (i32, i32, i32) {
    %c0_i32 = arith.constant 0 : i32
    %c0_i32_0 = arith.constant 0 : i32
    %c0_i32_1 = arith.constant 0 : i32
    return %arg0, %c0_i32, %c0_i32_0 : i32, i32, i32
  }
}

module attributes {stable_mosaic.version = 11 : i64} {
  func.func @_tail_kernel(%arg0: i32, %arg1: memref<2x128xbf16, #tpu.memory_space<vmem>>, %arg2: memref<2x16xf32, #tpu.memory_space<vmem>>, %arg3: memref<128x16xbf16, #tpu.memory_space<vmem>>, %arg4: memref<1x16xf32, #tpu.memory_space<vmem>>, %arg5: memref<32x32xbf16, #tpu.memory_space<vmem>>, %arg6: memref<1x32xf32, #tpu.memory_space<vmem>>, %arg7: memref<1x32xf32, #tpu.memory_space<vmem>>, %arg8: memref<1x1xf32, #tpu.memory_space<vmem>>, %arg9: memref<2x1xf32, #tpu.memory_space<vmem>>) attributes {dimension_semantics = [#tpu.dimension_semantics<parallel>], iteration_bounds = array<i64: 1>, scalar_prefetch = 0 : i64, scratch_operands = 0 : i64, tpu.core_type = #tpu.core_type<tc>, window_params = [{transform_indices = @transform_0, window_bounds = array<i64: 2, 128>}, {transform_indices = @transform_1, window_bounds = array<i64: 2, 16>}, {pipeline_mode = #tpu.pipeline_mode<synchronous>, transform_indices = @transform_2, window_bounds = array<i64: 128, 16>}, {pipeline_mode = #tpu.pipeline_mode<synchronous>, transform_indices = @transform_3, window_bounds = array<i64: 1, 16>}, {pipeline_mode = #tpu.pipeline_mode<synchronous>, transform_indices = @transform_4, window_bounds = array<i64: 32, 32>}, {pipeline_mode = #tpu.pipeline_mode<synchronous>, transform_indices = @transform_5, window_bounds = array<i64: 1, 32>}, {pipeline_mode = #tpu.pipeline_mode<synchronous>, transform_indices = @transform_6, window_bounds = array<i64: 1, 32>}, {pipeline_mode = #tpu.pipeline_mode<synchronous>, transform_indices = @transform_7, window_bounds = array<i64: 1, 1>}, {transform_indices = @transform_8, window_bounds = array<i64: 2, 1>}]} {
    %c0 = arith.constant 0 : index
    %c0_0 = arith.constant 0 : index
    %0 = vector.load %arg1[%c0, %c0_0] : memref<2x128xbf16, #tpu.memory_space<vmem>>, vector<2x128xbf16>
    %c0_1 = arith.constant 0 : index
    %c0_2 = arith.constant 0 : index
    %1 = vector.load %arg3[%c0_1, %c0_2] : memref<128x16xbf16, #tpu.memory_space<vmem>>, vector<128x16xbf16>
    %cst = arith.constant dense<0.000000e+00> : vector<2x16xf32>
    %2 = tpu.matmul %0, %1, %cst {dimension_numbers = #tpu.dot_dimension_numbers<[1], [0], [0], [1], [0, 0, 1, 1], [], []>} : vector<2x128xbf16>, vector<128x16xbf16>, vector<2x16xf32> -> vector<2x16xf32>
    %c0_3 = arith.constant 0 : index
    %c0_4 = arith.constant 0 : index
    %3 = vector.load %arg4[%c0_3, %c0_4] : memref<1x16xf32, #tpu.memory_space<vmem>>, vector<1x16xf32>
    %4 = vector.broadcast %3 : vector<1x16xf32> to vector<2x16xf32>
    %5 = arith.addf %2, %4 : vector<2x16xf32>
    %6 = arith.truncf %5 : vector<2x16xf32> to vector<2x16xbf16>
    %c0_5 = arith.constant 0 : index
    %c0_6 = arith.constant 0 : index
    %7 = vector.load %arg5[%c0_5, %c0_6] : memref<32x32xbf16, #tpu.memory_space<vmem>>, vector<16x32xbf16>
    %cst_7 = arith.constant dense<0.000000e+00> : vector<2x32xf32>
    %8 = tpu.matmul %6, %7, %cst_7 {dimension_numbers = #tpu.dot_dimension_numbers<[1], [0], [0], [1], [0, 0, 1, 1], [], []>} : vector<2x16xbf16>, vector<16x32xbf16>, vector<2x32xf32> -> vector<2x32xf32>
    %c0_8 = arith.constant 0 : index
    %c0_9 = arith.constant 0 : index
    %9 = vector.load %arg2[%c0_8, %c0_9] : memref<2x16xf32, #tpu.memory_space<vmem>>, vector<2x16xf32>
    %10 = arith.truncf %9 : vector<2x16xf32> to vector<2x16xbf16>
    %c16 = arith.constant 16 : index
    %c0_10 = arith.constant 0 : index
    %11 = vector.load %arg5[%c16, %c0_10] : memref<32x32xbf16, #tpu.memory_space<vmem>>, vector<16x32xbf16>
    %cst_11 = arith.constant dense<0.000000e+00> : vector<2x32xf32>
    %12 = tpu.matmul %10, %11, %cst_11 {dimension_numbers = #tpu.dot_dimension_numbers<[1], [0], [0], [1], [0, 0, 1, 1], [], []>} : vector<2x16xbf16>, vector<16x32xbf16>, vector<2x32xf32> -> vector<2x32xf32>
    %13 = arith.addf %8, %12 : vector<2x32xf32>
    %c0_12 = arith.constant 0 : index
    %c0_13 = arith.constant 0 : index
    %14 = vector.load %arg6[%c0_12, %c0_13] : memref<1x32xf32, #tpu.memory_space<vmem>>, vector<1x32xf32>
    %15 = vector.broadcast %14 : vector<1x32xf32> to vector<2x32xf32>
    %16 = arith.addf %13, %15 : vector<2x32xf32>
    %cst_14 = arith.constant 2.000000e-01 : f32
    %17 = vector.broadcast %cst_14 : f32 to vector<2x32xf32>
    %18 = arith.mulf %17, %16 : vector<2x32xf32>
    %19 = arith.maximumf %16, %18 : vector<2x32xf32>
    %c0_15 = arith.constant 0 : index
    %c0_16 = arith.constant 0 : index
    %20 = vector.load %arg7[%c0_15, %c0_16] : memref<1x32xf32, #tpu.memory_space<vmem>>, vector<1x32xf32>
    %21 = vector.broadcast %20 : vector<1x32xf32> to vector<2x32xf32>
    %22 = arith.mulf %19, %21 : vector<2x32xf32>
    %cst_17 = arith.constant dense<0.000000e+00> : vector<2xf32>
    %23 = vector.multi_reduction <add>, %22, %cst_17 [1] : vector<2x32xf32> to vector<2xf32>
    %24 = vector.shape_cast %23 : vector<2xf32> to vector<2x1xf32>
    %c0_18 = arith.constant 0 : index
    %c0_19 = arith.constant 0 : index
    %25 = vector.load %arg8[%c0_18, %c0_19] : memref<1x1xf32, #tpu.memory_space<vmem>>, vector<1x1xf32>
    %26 = vector.broadcast %25 : vector<1x1xf32> to vector<2x1xf32>
    %27 = arith.addf %24, %26 : vector<2x1xf32>
    %c0_20 = arith.constant 0 : index
    %c0_21 = arith.constant 0 : index
    %28 = vector.load %arg9[%c0_20, %c0_21] : memref<2x1xf32, #tpu.memory_space<vmem>>, vector<2x1xf32>
    tpu.vector_store %arg9[%c0_20, %c0_21], %27 {strides = array<i32>} : memref<2x1xf32, #tpu.memory_space<vmem>>, vector<2x1xf32>,
    return
  }
  func.func @transform_0(%arg0: i32) -> (i32, i32) {
    %c0_i32 = arith.constant 0 : i32
    %c0_i32_0 = arith.constant 0 : i32
    return %arg0, %c0_i32 : i32, i32
  }
  func.func @transform_1(%arg0: i32) -> (i32, i32) {
    %c0_i32 = arith.constant 0 : i32
    %c0_i32_0 = arith.constant 0 : i32
    return %arg0, %c0_i32 : i32, i32
  }
  func.func @transform_2(%arg0: i32) -> (i32, i32) {
    %c0_i32 = arith.constant 0 : i32
    %c0_i32_0 = arith.constant 0 : i32
    %c0_i32_1 = arith.constant 0 : i32
    return %c0_i32, %c0_i32_0 : i32, i32
  }
  func.func @transform_3(%arg0: i32) -> (i32, i32) {
    %c0_i32 = arith.constant 0 : i32
    %c0_i32_0 = arith.constant 0 : i32
    %c0_i32_1 = arith.constant 0 : i32
    return %c0_i32, %c0_i32_0 : i32, i32
  }
  func.func @transform_4(%arg0: i32) -> (i32, i32) {
    %c0_i32 = arith.constant 0 : i32
    %c0_i32_0 = arith.constant 0 : i32
    %c0_i32_1 = arith.constant 0 : i32
    return %c0_i32, %c0_i32_0 : i32, i32
  }
  func.func @transform_5(%arg0: i32) -> (i32, i32) {
    %c0_i32 = arith.constant 0 : i32
    %c0_i32_0 = arith.constant 0 : i32
    %c0_i32_1 = arith.constant 0 : i32
    return %c0_i32, %c0_i32_0 : i32, i32
  }
  func.func @transform_6(%arg0: i32) -> (i32, i32) {
    %c0_i32 = arith.constant 0 : i32
    %c0_i32_0 = arith.constant 0 : i32
    %c0_i32_1 = arith.constant 0 : i32
    return %c0_i32, %c0_i32_0 : i32, i32
  }
  func.func @transform_7(%arg0: i32) -> (i32, i32) {
    %c0_i32 = arith.constant 0 : i32
    %c0_i32_0 = arith.constant 0 : i32
    %c0_i32_1 = arith.constant 0 : i32
    return %c0_i32, %c0_i32_0 : i32, i32
  }
  func.func @transform_8(%arg0: i32) -> (i32, i32) {
    %c0_i32 = arith.constant 0 : i32
    %c0_i32_0 = arith.constant 0 : i32
    return %arg0, %c0_i32 : i32, i32
  }
}

</mosaic_0001>

<bundles_post_ra>
// kernel: statistics_network_forward.6
= control target key start
LH: loop header
LB: loop body
LE: loop exit
PB: predicated region body
PF: predicated region fallthrough
CT: control target
= control target key end

     0   :  { %vm64_vm0 = vcmask 130048   ;;  %vm1162_vm1 = vcmask 60416   ;;  %s3606_s1 = inlined_call_operand.vmem [shape: bf16[9,16,8], index: 1, kind: input, shape index: {}]   ;;  %s3607_s0 = inlined_call_operand.vmem [shape: bf16[2,3,80,16], index: 0, kind: input, shape index: {}]   ;;  %s3608_s2 = inlined_call_operand.vmem [shape: f32[1,8], index: 2, kind: input, shape index: {}]   ;;  %s3609_s3 = inlined_call_operand.vmem [shape: bf16[2,64,8], index: 3, kind: output, shape index: {}]  }
   0x1   :  { %v3069_v0 = vld [vmem:[%s3606_s1 + $0x8] sm:$0xff]   ;;  %v3072_v3 = vld [vmem:[%s3607_s0 + $0xa0] sm:$0xff]   ;;  %v3073_v4 = vld [vmem:[%s3607_s0 + $0x30] sm:$0xff]  }
   0x2   :  { %v3070_v1 = vld [vmem:[%s3606_s1 + $0x8] sm:$0xff]   ;;  %2761 = vmatprep.subr.bf16.mxu0 %v3069_v0  ;;  %2853 = vmatprep.mubr.msk.bf16.mxu1 %vm64_vm0, %v3072_v3  ;;  %v3074_v5 = vld [vmem:[%s3606_s1] sm:$0xff]   ;;  %v3077_v8 = vld [vmem:[%s3607_s0 + $0x38] sm:$0xff]  }
   0x3   :  { %v3071_v2 = vld [vmem:[%s3607_s0 + $0x28] sm:$0xff]   ;;  %2851 = vmatprep.subr.bf16.mxu1 %v3070_v1  ;;  %2762 = vmatpush3.bf16.msra.mxu0 %v3069_v0  ;;  %v3076_v7 = vld [vmem:[%s3606_s1] sm:$0xff]   ;;  %v3078_v9 = vld [vmem:[%s3607_s0 + $0xb0] sm:$0xff]  }
   0x4   :  { %2852 = vmatpush3.bf16.msra.mxu1 %v3070_v1  ;;  %2763 = vmatprep.mubr.msk.bf16.mxu0 %vm64_vm0, %v3071_v2  ;;  %v3075_v6 = vld [vmem:[%s3607_s0 + $0xa8] sm:$0xff]   ;;  %v3079_v10 = vld [vmem:[%s3607_s0 + $0x40] sm:$0xff]   ;;  %v3080_v11 = vld [vmem:[%s3607_s0 + $0xb8] sm:$0xff]  }
   0x5   :  { %2771 = vmatprep.subr.bf16.mxu0 %v3074_v5  ;;  %2861 = vmatprep.subr.bf16.mxu1 %v3076_v7  ;;  %v3081_v12 = vld [vmem:[%s3607_s0] sm:$0xff]   ;;  %v3082_v13 = vld [vmem:[%s3607_s0 + $0x78] sm:$0xff]   ;;  %v3084_v14 = vld [vmem:[%s3606_s1 + $0x10] sm:$0xff]  }
   0x6   :  { %2764 = vmatmul.mubr.msk.bf16.vlgmr.msra.gmra.mrb[0].mxu0 %vm64_vm0, %v3073_v4  ;;  %v3086_v15 = vld [vmem:[%s3606_s1 + $0x10] sm:$0xff]   ;;  %v3083_v16 = vld [vmem:[%s3607_s0 + $0x8] sm:$0xff]   ;;  %v3085_v18 = vld [vmem:[%s3607_s0 + $0x80] sm:$0xff]  }
   0x7   :  { %2854 = vmatmul.mubr.msk.bf16.vlgmr.msra.gmra.mrb[0].mxu1 %vm64_vm0, %v3075_v6  ;;  %2772 = vmatpush3.bf16.msra.mxu0 %v3074_v5  ;;  %v3087_v17 = vld [vmem:[%s3607_s0 + $0x10] sm:$0xff]   ;;  %v3088_v19 = vld [vmem:[%s3607_s0 + $0x88] sm:$0xff]   ;;  %v3089_v20 = vld [vmem:[%s3607_s0 + $0x18] sm:$0xff]  }
   0x8   :  { %2862 = vmatpush3.bf16.msra.mxu1 %v3076_v7  ;;  %2767 = vmatprep.mubr.msk.bf16.mxu0 %vm64_vm0, %v3077_v8  ;;  %v3094_v21 = vld [vmem:[%s3606_s1 + $0x18] sm:$0xff]   ;;  %v3091_v22 = vld [vmem:[%s3607_s0 + $0x50] sm:$0xff]   ;;  %v3092_v25 = vld [vmem:[%s3607_s0 + $0xc8] sm:$0xff]  }
   0x9   :  { %2857 = vmatprep.mubr.msk.bf16.mxu1 %vm64_vm0, %v3078_v9  ;;  %2781 = vmatprep.subr.bf16.mxu0 %v3084_v14  ;;  %v3096_v23 = vld [vmem:[%s3606_s1 + $0x18] sm:$0xff]   ;;  %v3090_v24 = vld [vmem:[%s3607_s0 + $0x90] sm:$0xff]   ;;  %v3097_v28 = vld [vmem:[%s3607_s0 + $0x60] sm:$0xff]  }
   0xa   :  { %2871 = vmatprep.subr.bf16.mxu1 %v3086_v15  ;;  %v3093_v26 = vld [vmem:[%s3607_s0 + $0x58] sm:$0xff]   ;;  %v3095_v27 = vld [vmem:[%s3607_s0 + $0xd0] sm:$0xff]   ;;  %v3104_v29 = vld [vmem:[%s3606_s1 + $0x20] sm:$0xff]  }
   0xb   :  { %v3098_v30 = vld [vmem:[%s3607_s0 + $0xd8] sm:$0xff]   ;;  %v3106_v31 = vld [vmem:[%s3606_s1 + $0x20] sm:$0xff]   ;;  %v3099_v32 = vld [vmem:[%s3607_s0 + $0x68] sm:$0xff]  }
   0xc   :  { %v3101_v33 = vld [vmem:[%s3607_s0 + $0x4] sm:$0xff]   ;;  %v3102_v35 = vld [vmem:[%s3607_s0 + $0x7c] sm:$0xff]   ;;  %v3103_v36 = vld [vmem:[%s3607_s0 + $0xc] sm:$0xff]  }
   0xd   :  { %v3100_v34 = vld [vmem:[%s3607_s0 + $0xe0] sm:$0xff]   ;;  %v3107_v38 = vld [vmem:[%s3607_s0 + $0x14] sm:$0xff]   ;;  %v3114_v39 = vld [vmem:[%s3606_s1 + $0x28] sm:$0xff]  }
   0xe   :  { %2768 = vmatmul.mubr.msk.bf16.gmra.mrb[4].mxu0 %vm64_vm0, %v3079_v10  ;;  %v3105_v37 = vld [vmem:[%s3607_s0 + $0x84] sm:$0xff]   ;;  %v3108_v40 = vld [vmem:[%s3607_s0 + $0x8c] sm:$0xff]   ;;  %v3109_v42 = vld [vmem:[%s3607_s0 + $0x1c] sm:$0xff]  }
   0xf   :  { %2773 = vmatprep.mubr.msk.bf16.mxu0 %vm64_vm0, %v3081_v12  ;;  %2858 = vmatmul.mubr.msk.bf16.gmra.mrb[4].mxu1 %vm64_vm0, %v3080_v11  ;;  %v3116_v41 = vld [vmem:[%s3606_s1 + $0x28] sm:$0xff]   ;;  %v3110_v44 = vld [vmem:[%s3607_s0 + $0x94] sm:$0xff]   ;;  %v3117_v48 = vld [vmem:[%s3607_s0 + $0x3c] sm:$0xff]  }
  0x10   :  { %2863 = vmatprep.mubr.msk.bf16.mxu1 %vm64_vm0, %v3082_v13  ;;  %v3111_v43 = vld [vmem:[%s3607_s0 + $0x2c] sm:$0xff]   ;;  %v3112_v45 = vld [vmem:[%s3607_s0 + $0xa4] sm:$0xff]   ;;  %v3113_v46 = vld [vmem:[%s3607_s0 + $0x34] sm:$0xff]  }
  0x11   :  { %v3115_v47 = vld [vmem:[%s3607_s0 + $0xac] sm:$0xff]   ;;  %v3118_v50 = vld [vmem:[%s3607_s0 + $0xb4] sm:$0xff]   ;;  %v3119_v52 = vld [vmem:[%s3607_s0 + $0x44] sm:$0xff]  }
  0x12   :  { %v3124_v49 = vld [vmem:[%s3606_s1 + $0x30] sm:$0xff]   ;;  %v3120_v54 = vld [vmem:[%s3607_s0 + $0xbc] sm:$0xff]   ;;  %v3127_v58 = vld [vmem:[%s3607_s0 + $0x64] sm:$0xff]  }
  0x13   :  { %v3126_v51 = vld [vmem:[%s3606_s1 + $0x30] sm:$0xff]   ;;  %v3123_v56 = vld [vmem:[%s3607_s0 + $0x5c] sm:$0xff]   ;;  %v3131_v63 = vld [vmem:[%s3607_s0 + $0x8] sm:$0xff]  }
  0x14   :  { %v3121_v53 = vld [vmem:[%s3607_s0 + $0x54] sm:$0xff]   ;;  %v3122_v55 = vld [vmem:[%s3607_s0 + $0xcc] sm:$0xff]   ;;  %v3128_v60 = vld [vmem:[%s3607_s0 + $0xdc] sm:$0xff]  }
  0x15   :  { %v3125_v57 = vld [vmem:[%s3607_s0 + $0xd4] sm:$0xff]   ;;  %v3129_v62 = vld [vmem:[%s3607_s0 + $0x6c] sm:$0xff]   ;;  %v3130_v0 = vld [vmem:[%s3607_s0 + $0xe4] sm:$0xff]  }
  0x16   :  { %2774 = vmatmul.mubr.msk.bf16.vlgmr.msra.gmra.mrb[0].mxu0 %vm64_vm0, %v3083_v16  ;;  %v3134_v59 = vld [vmem:[%s3606_s1 + $0x38] sm:$0xff]   ;;  %v3132_v1 = vld [vmem:[%s3607_s0 + $0x80] sm:$0xff]   ;;  %v3133_v2 = vld [vmem:[%s3607_s0 + $0x10] sm:$0xff]  }
  0x17   :  { %2782 = vmatpush3.bf16.msra.mxu0 %v3084_v14  ;;  %2777 = vmatprep.mubr.msk.bf16.mxu0 %vm64_vm0, %v3087_v17  ;;  %v3136_v61 = vld [vmem:[%s3606_s1 + $0x38] sm:$0xff]   ;;  %v3135_v4 = vld [vmem:[%s3607_s0 + $0x88] sm:$0xff]   ;;  %v3144_v5 = vld [vmem:[%s3606_s1 + $0x40] sm:$0xff]  }
  0x18   :  { %2864 = vmatmul.mubr.msk.bf16.vlgmr.msra.gmra.mrb[0].mxu1 %vm64_vm0, %v3085_v18  ;;  %2791 = vmatprep.subr.bf16.mxu0 %v3094_v21  ;;  %v3137_v3 = vld [vmem:[%s3607_s0 + $0x18] sm:$0xff]   ;;  %v3138_v6 = vld [vmem:[%s3607_s0 + $0x90] sm:$0xff]   ;;  %v3146_v7 = vld [vmem:[%s3606_s1 + $0x40] sm:$0xff]  }
  0x19   :  { %2872 = vmatpush3.bf16.msra.mxu1 %v3086_v15  ;;  %2867 = vmatprep.mubr.msk.bf16.mxu1 %vm64_vm0, %v3088_v19  ;;  %v3139_v8 = vld [vmem:[%s3607_s0 + $0x20] sm:$0xff]   ;;  %v3141_v9 = vld [vmem:[%s3607_s0 + $0x30] sm:$0xff]   ;;  %v3140_v10 = vld [vmem:[%s3607_s0 + $0x98] sm:$0xff]  }
  0x1a   :  { %2881 = vmatprep.subr.bf16.mxu1 %v3096_v23  ;;  %v3142_v11 = vld [vmem:[%s3607_s0 + $0xa8] sm:$0xff]   ;;  %v3143_v12 = vld [vmem:[%s3607_s0 + $0x38] sm:$0xff]   ;;  %v3147_v13 = vld [vmem:[%s3607_s0 + $0x40] sm:$0xff]  }
  0x1b   :  { %v3145_v14 = vld [vmem:[%s3607_s0 + $0xb0] sm:$0xff]   ;;  %v3148_v15 = vld [vmem:[%s3607_s0 + $0xb8] sm:$0xff]   ;;  %v3149_v16 = vld [vmem:[%s3607_s0 + $0x48] sm:$0xff]  }
  0x1c   :  { %v3151_v17 = vld [vmem:[%s3607_s0 + $0x58] sm:$0xff]   ;;  %v3150_v18 = vld [vmem:[%s3607_s0 + $0xc0] sm:$0xff]   ;;  %v3152_v19 = vld [vmem:[%s3607_s0 + $0xd0] sm:$0xff]  }
  0x1e   :  { %2778 = vmatmul.mubr.msk.bf16.gmra.mrb[4].mxu0 %vm64_vm0, %v3089_v20  ;;  %v3153_v20 = vld [vmem:[%s3607_s0 + $0x60] sm:$0xff]  }
  0x1f   :  { %2783 = vmatprep.mubr.msk.bf16.mxu0 %vm64_vm0, %v3091_v22  ;;  %v3154_v22 = vld [vmem:[%s3607_s0 + $0xd8] sm:$0xff]  }
  0x20   :  { %2868 = vmatmul.mubr.msk.bf16.gmra.mrb[4].mxu1 %vm64_vm0, %v3090_v24  ;;  %v3157_v24 = vld [vmem:[%s3607_s0 + $0x70] sm:$0xff]  }
  0x21   :  { %2873 = vmatprep.mubr.msk.bf16.mxu1 %vm64_vm0, %v3092_v25  ;;  %v3158_v25 = vld [vmem:[%s3607_s0 + $0xe8] sm:$0xff]  }
  0x26   :  { %2784 = vmatmul.mubr.msk.bf16.vlgmr.msra.gmra.mrb[0].mxu0 %vm64_vm0, %v3093_v26  ;;  %v3524_v26 = vld [vmem:[%s3608_s2] ss:$0 sm:$0xff] }
  0x27   :  { %2792 = vmatpush3.bf16.msra.mxu0 %v3094_v21  ;;  %2787 = vmatprep.mubr.msk.bf16.mxu0 %vm64_vm0, %v3097_v28  ;;  %v3155_v21 = vld [vmem:[%s3607_s0 + $0x68] sm:$0xff]  }
  0x28   :  { %2874 = vmatmul.mubr.msk.bf16.vlgmr.msra.gmra.mrb[0].mxu1 %vm64_vm0, %v3095_v27  ;;  %2801 = vmatprep.subr.bf16.mxu0 %v3104_v29 }
  0x29   :  { %2882 = vmatpush3.bf16.msra.mxu1 %v3096_v23  ;;  %2877 = vmatprep.mubr.msk.bf16.mxu1 %vm64_vm0, %v3098_v30  ;;  %v3156_v23 = vld [vmem:[%s3607_s0 + $0xe0] sm:$0xff]  }
  0x2a   :  { %2891 = vmatprep.subr.bf16.mxu1 %v3106_v31 }
  0x2e   :  { %2788 = vmatmul.mubr.msk.bf16.gmra.mrb[4].mxu0 %vm64_vm0, %v3099_v32 }
  0x2f   :  { %2793 = vmatprep.mubr.msk.bf16.mxu0 %vm64_vm0, %v3101_v33 }
  0x30   :  { %2878 = vmatmul.mubr.msk.bf16.gmra.mrb[4].mxu1 %vm64_vm0, %v3100_v34 }
  0x31   :  { %2883 = vmatprep.mubr.msk.bf16.mxu1 %vm64_vm0, %v3102_v35 }
  0x36   :  { %2794 = vmatmul.mubr.msk.bf16.vlgmr.msra.gmra.mrb[0].mxu0 %vm64_vm0, %v3103_v36 }
  0x37   :  { %2802 = vmatpush3.bf16.msra.mxu0 %v3104_v29  ;;  %2797 = vmatprep.mubr.msk.bf16.mxu0 %vm64_vm0, %v3107_v38 }
  0x38   :  { %2884 = vmatmul.mubr.msk.bf16.vlgmr.msra.gmra.mrb[0].mxu1 %vm64_vm0, %v3105_v37  ;;  %2811 = vmatprep.subr.bf16.mxu0 %v3114_v39 }
  0x39   :  { %2892 = vmatpush3.bf16.msra.mxu1 %v3106_v31  ;;  %2887 = vmatprep.mubr.msk.bf16.mxu1 %vm64_vm0, %v3108_v40 }
  0x3a   :  { %2901 = vmatprep.subr.bf16.mxu1 %v3116_v41 }
  0x3e   :  { %2798 = vmatmul.mubr.msk.bf16.gmra.mrb[4].mxu0 %vm64_vm0, %v3109_v42 }
  0x3f   :  { %2803 = vmatprep.mubr.msk.bf16.mxu0 %vm64_vm0, %v3111_v43 }
  0x40   :  { %2888 = vmatmul.mubr.msk.bf16.gmra.mrb[4].mxu1 %vm64_vm0, %v3110_v44 }
  0x41   :  { %2893 = vmatprep.mubr.msk.bf16.mxu1 %vm64_vm0, %v3112_v45 }
  0x46   :  { %2804 = vmatmul.mubr.msk.bf16.vlgmr.msra.gmra.mrb[0].mxu0 %vm64_vm0, %v3113_v46 }
  0x47   :  { %2812 = vmatpush3.bf16.msra.mxu0 %v3114_v39  ;;  %2807 = vmatprep.mubr.msk.bf16.mxu0 %vm64_vm0, %v3117_v48 }
  0x48   :  { %2894 = vmatmul.mubr.msk.bf16.vlgmr.msra.gmra.mrb[0].mxu1 %vm64_vm0, %v3115_v47  ;;  %2821 = vmatprep.subr.bf16.mxu0 %v3124_v49 }
  0x49   :  { %2902 = vmatpush3.bf16.msra.mxu1 %v3116_v41  ;;  %2897 = vmatprep.mubr.msk.bf16.mxu1 %vm64_vm0, %v3118_v50 }
  0x4a   :  { %2911 = vmatprep.subr.bf16.mxu1 %v3126_v51 }
  0x4e   :  { %2808 = vmatmul.mubr.msk.bf16.gmra.mrb[4].mxu0 %vm64_vm0, %v3119_v52 }
  0x4f   :  { %2813 = vmatprep.mubr.msk.bf16.mxu0 %vm64_vm0, %v3121_v53 }
  0x50   :  { %2898 = vmatmul.mubr.msk.bf16.gmra.mrb[4].mxu1 %vm64_vm0, %v3120_v54 }
  0x51   :  { %2903 = vmatprep.mubr.msk.bf16.mxu1 %vm64_vm0, %v3122_v55 }
  0x56   :  { %2814 = vmatmul.mubr.msk.bf16.vlgmr.msra.gmra.mrb[0].mxu0 %vm64_vm0, %v3123_v56 }
  0x57   :  { %2822 = vmatpush3.bf16.msra.mxu0 %v3124_v49  ;;  %2817 = vmatprep.mubr.msk.bf16.mxu0 %vm64_vm0, %v3127_v58 }
  0x58   :  { %2904 = vmatmul.mubr.msk.bf16.vlgmr.msra.gmra.mrb[0].mxu1 %vm64_vm0, %v3125_v57  ;;  %2831 = vmatprep.subr.bf16.mxu0 %v3134_v59 }
  0x59   :  { %2912 = vmatpush3.bf16.msra.mxu1 %v3126_v51  ;;  %2907 = vmatprep.mubr.msk.bf16.mxu1 %vm64_vm0, %v3128_v60 }
  0x5a   :  { %2921 = vmatprep.subr.bf16.mxu1 %v3136_v61 }
  0x5e   :  { %2818 = vmatmul.mubr.msk.bf16.gmra.mrb[4].mxu0 %vm64_vm0, %v3129_v62 }
  0x5f   :  { %2823 = vmatprep.mubr.msk.bf16.mxu0 %vm64_vm0, %v3131_v63 }
  0x60   :  { %2908 = vmatmul.mubr.msk.bf16.gmra.mrb[4].mxu1 %vm64_vm0, %v3130_v0 }
  0x61   :  { %2913 = vmatprep.mubr.msk.bf16.mxu1 %vm64_vm0, %v3132_v1 }
  0x66   :  { %2824 = vmatmul.mubr.msk.bf16.vlgmr.msra.gmra.mrb[0].mxu0 %vm64_vm0, %v3133_v2 }
  0x67   :  { %2832 = vmatpush3.bf16.msra.mxu0 %v3134_v59  ;;  %2827 = vmatprep.mubr.msk.bf16.mxu0 %vm64_vm0, %v3137_v3 }
  0x68   :  { %2914 = vmatmul.mubr.msk.bf16.vlgmr.msra.gmra.mrb[0].mxu1 %vm64_vm0, %v3135_v4  ;;  %2841 = vmatprep.subr.bf16.mxu0 %v3144_v5 }
  0x69   :  { %2922 = vmatpush3.bf16.msra.mxu1 %v3136_v61  ;;  %2917 = vmatprep.mubr.msk.bf16.mxu1 %vm64_vm0, %v3138_v6 }
  0x6a   :  { %2931 = vmatprep.subr.bf16.mxu1 %v3146_v7 }
  0x6e   :  { %2828 = vmatmul.mubr.msk.bf16.gmra.mrb[4].mxu0 %vm64_vm0, %v3139_v8 }
  0x6f   :  { %2833 = vmatprep.mubr.msk.bf16.mxu0 %vm64_vm0, %v3141_v9 }
  0x70   :  { %2918 = vmatmul.mubr.msk.bf16.gmra.mrb[4].mxu1 %vm64_vm0, %v3140_v10 }
  0x71   :  { %2923 = vmatprep.mubr.msk.bf16.mxu1 %vm64_vm0, %v3142_v11 }
  0x76   :  { %2834 = vmatmul.mubr.msk.bf16.vlgmr.msra.gmra.mrb[0].mxu0 %vm64_vm0, %v3143_v12 }
  0x77   :  { %2842 = vmatpush3.bf16.msra.mxu0 %v3144_v5  ;;  %2837 = vmatprep.mubr.msk.bf16.mxu0 %vm64_vm0, %v3147_v13 }
  0x78   :  { %2924 = vmatmul.mubr.msk.bf16.vlgmr.msra.gmra.mrb[0].mxu1 %vm64_vm0, %v3145_v14 }
  0x79   :  { %2932 = vmatpush3.bf16.msra.mxu1 %v3146_v7  ;;  %2927 = vmatprep.mubr.msk.bf16.mxu1 %vm64_vm0, %v3148_v15 }
  0x7e   :  { %2838 = vmatmul.mubr.msk.bf16.gmra.mrb[4].mxu0 %vm64_vm0, %v3149_v16 }
  0x7f   :  { %2843 = vmatprep.mubr.msk.bf16.mxu0 %vm64_vm0, %v3151_v17 }
  0x80   :  { %2928 = vmatmul.mubr.msk.bf16.gmra.mrb[4].mxu1 %vm64_vm0, %v3150_v18 }
  0x81   :  { %2933 = vmatprep.mubr.msk.bf16.mxu1 %vm64_vm0, %v3152_v19 }
  0x86   :  { %2844 = vmatmul.mubr.msk.bf16.vlgmr.msra.gmra.mrb[0].mxu0 %vm64_vm0, %v3153_v20 }
  0x87   :  { %2847 = vmatprep.mubr.msk.bf16.mxu0 %vm64_vm0, %v3155_v21 }
  0x88   :  { %2934 = vmatmul.mubr.msk.bf16.vlgmr.msra.gmra.mrb[0].mxu1 %vm64_vm0, %v3154_v22 }
  0x89   :  { %2937 = vmatprep.mubr.msk.bf16.mxu1 %vm64_vm0, %v3156_v23 }
  0x8e   :  { %2848 = vmatmul.mubr.msk.bf16.gmra.mrb[4].mxu0 %vm64_vm0, %v3157_v24 }
  0x90   :  { %2938 = vmatmul.mubr.msk.bf16.gmra.mrb[4].mxu1 %vm64_vm0, %v3158_v25 }
 0x159   :  { %v2845_v27 = vpop.f32.mrb[0].mxu0 }
 0x15a   :  { %v1108_v28 = vadd.f32 %v2845_v27, %v3524_v26  ;;  %v1061_v29 = vpop.f32.mrb[1].mxu0 }
 0x15b   :  { %v2935_v30 = vpop.f32.mrb[0].mxu1  ;;  %v1106_v31 = vadd.f32 %v3524_v26, %v1061_v29  ;;  %v2846_v32 = vpop.f32.mrb[2].mxu0 }
 0x15c   :  { %v1116_v33 = vmul.f32 0.2, %v1108_v28  ;;  %v2249_v34 = vadd.f32 %v2935_v30, %v3524_v26  ;;  %v2208_v35 = vpop.f32.mrb[1].mxu1  ;;  %v1109_v36 = vadd.f32 %v2846_v32, %v3524_v26  ;;  %v1064_v37 = vpop.f32.mrb[3].mxu0 }
 0x15d   :  { %v1114_v38 = vmul.f32 0.2, %v1106_v31  ;;  %v2247_v39 = vadd.f32 %v3524_v26, %v2208_v35  ;;  %v2936_v40 = vpop.f32.mrb[2].mxu1  ;;  %v1107_v41 = vadd.f32 %v3524_v26, %v1064_v37 }
 0x15e   :  { %v1124_v42 = vmax.f32 %v1108_v28, %v1116_v33  ;;  %v2257_v43 = vmul.f32 0.2, %v2249_v34  ;;  %v1117_v44 = vmul.f32 0.2, %v1109_v36  ;;  %v2250_v45 = vadd.f32 %v2936_v40, %v3524_v26  ;;  %v2211_v46 = vpop.f32.mrb[3].mxu1 }
 0x15f   :  { %v1122_v47 = vmax.f32 %v1106_v31, %v1114_v38  ;;  %v2255_v48 = vmul.f32 0.2, %v2247_v39  ;;  %v1115_v49 = vmul.f32 0.2, %v1107_v41  ;;  %v2248_v50 = vadd.f32 %v3524_v26, %v2211_v46 }
 0x160   :  { %v2657_v51 = vpack.c.bf16 %v1124_v42, %v1124_v42  ;;  %v2265_v52 = vmax.f32 %v2249_v34, %v2257_v43  ;;  %v1125_v53 = vmax.f32 %v1109_v36, %v1117_v44  ;;  %v2258_v54 = vmul.f32 0.2, %v2250_v45 }
 0x161   :  { %v2655_v55 = vpack.c.bf16 %v1122_v47, %v1122_v47  ;;  %v2263_v56 = vmax.f32 %v2247_v39, %v2255_v48  ;;  %v1123_v57 = vmax.f32 %v1107_v41, %v1115_v49  ;;  %v2256_v58 = vmul.f32 0.2, %v2248_v50  ;;  %v2849_v59 = vpop.f32.mrb[4].mxu0 }
 0x162   :  { %1165 = vst.msk [vmem:[%s3609_s3 + $0x8] sm:$0xf] %vm1162_vm1, %v2657_v51  ;;  %v2665_v60 = vpack.c.bf16 %v2265_v52, %v2265_v52  ;;  %v2658_v61 = vpack.c.bf16 %v1125_v53, %v1125_v53  ;;  %v2266_v62 = vmax.f32 %v2250_v45, %v2258_v54  ;;  %v1112_v63 = vadd.f32 %v2849_v59, %v3524_v26  ;;  %v1077_v0 = vpop.f32.mrb[5].mxu0 }
 0x163   :  { %1163 = vst.msk [vmem:[%s3609_s3] sm:$0xf] %vm1162_vm1, %v2655_v55  ;;  %v2663_v1 = vpack.c.bf16 %v2263_v56, %v2263_v56  ;;  %v2656_v2 = vpack.c.bf16 %v1123_v57, %v1123_v57  ;;  %v2264_v3 = vmax.f32 %v2248_v50, %v2256_v58  ;;  %v2939_v4 = vpop.f32.mrb[4].mxu1  ;;  %v1110_v5 = vadd.f32 %v3524_v26, %v1077_v0  ;;  %v2850_v6 = vpop.f32.mrb[6].mxu0 }
 0x164   :  { %2649 = vst.msk [vmem:[%s3609_s3 + $0x28] sm:$0xf] %vm1162_vm1, %v2665_v60  ;;  %1166 = vst.msk [vmem:[%s3609_s3 + $0xc] sm:$0xf] %vm1162_vm1, %v2658_v61  ;;  %v2666_v7 = vpack.c.bf16 %v2266_v62, %v2266_v62  ;;  %v1120_v8 = vmul.f32 0.2, %v1112_v63  ;;  %v2253_v9 = vadd.f32 %v2939_v4, %v3524_v26  ;;  %v1113_v11 = vadd.f32 %v2850_v6, %v3524_v26 }
 0x165   :  { %v2224_v10 = vpop.f32.mrb[5].mxu1  ;;  %v1080_v12 = vpop.f32.mrb[7].mxu0  ;;  %2647 = vst.msk [vmem:[%s3609_s3 + $0x20] sm:$0xf] %vm1162_vm1, %v2663_v1  ;;  %1164 = vst.msk [vmem:[%s3609_s3 + $0x4] sm:$0xf] %vm1162_vm1, %v2656_v2  ;;  %v2664_v13 = vpack.c.bf16 %v2264_v3, %v2264_v3 }
 0x166   :  { %v1118_v14 = vmul.f32 0.2, %v1110_v5  ;;  %v2251_v15 = vadd.f32 %v3524_v26, %v2224_v10  ;;  %v2940_v16 = vpop.f32.mrb[6].mxu1  ;;  %v1111_v17 = vadd.f32 %v3524_v26, %v1080_v12  ;;  %2650 = vst.msk [vmem:[%s3609_s3 + $0x2c] sm:$0xf] %vm1162_vm1, %v2666_v7  ;;  %v1128_v18 = vmax.f32 %v1112_v63, %v1120_v8 }
 0x167   :  { %v2261_v19 = vmul.f32 0.2, %v2253_v9  ;;  %v1121_v20 = vmul.f32 0.2, %v1113_v11  ;;  %v2254_v21 = vadd.f32 %v2940_v16, %v3524_v26  ;;  %v2227_v22 = vpop.f32.mrb[7].mxu1 }
 0x168   :  { %2648 = vst.msk [vmem:[%s3609_s3 + $0x24] sm:$0xf] %vm1162_vm1, %v2664_v13  ;;  %v1126_v23 = vmax.f32 %v1110_v5, %v1118_v14  ;;  %v2259_v24 = vmul.f32 0.2, %v2251_v15  ;;  %v1119_v25 = vmul.f32 0.2, %v1111_v17  ;;  %v2252_v27 = vadd.f32 %v3524_v26, %v2227_v22 }
 0x169   :  { %v2661_v28 = vpack.c.bf16 %v1128_v18, %v1128_v18  ;;  %v2269_v29 = vmax.f32 %v2253_v9, %v2261_v19  ;;  %v1129_v30 = vmax.f32 %v1113_v11, %v1121_v20  ;;  %v2262_v31 = vmul.f32 0.2, %v2254_v21 }
 0x16a   :  { %v2659_v32 = vpack.c.bf16 %v1126_v23, %v1126_v23  ;;  %v2267_v33 = vmax.f32 %v2251_v15, %v2259_v24  ;;  %v1127_v34 = vmax.f32 %v1111_v17, %v1119_v25  ;;  %v2260_v35 = vmul.f32 0.2, %v2252_v27 }
 0x16b   :  { %1169 = vst.msk [vmem:[%s3609_s3 + $0x18] sm:$0xf] %vm1162_vm1, %v2661_v28  ;;  %v2669_v36 = vpack.c.bf16 %v2269_v29, %v2269_v29  ;;  %v2662_v37 = vpack.c.bf16 %v1129_v30, %v1129_v30  ;;  %v2270_v38 = vmax.f32 %v2254_v21, %v2262_v31 }
 0x16c   :  { %1167 = vst.msk [vmem:[%s3609_s3 + $0x10] sm:$0xf] %vm1162_vm1, %v2659_v32  ;;  %v2667_v26 = vpack.c.bf16 %v2267_v33, %v2267_v33  ;;  %v2660_v39 = vpack.c.bf16 %v1127_v34, %v1127_v34  ;;  %v2268_v40 = vmax.f32 %v2252_v27, %v2260_v35 }
 0x16d   :  { %2653 = vst.msk [vmem:[%s3609_s3 + $0x38] sm:$0xf] %vm1162_vm1, %v2669_v36  ;;  %1170 = vst.msk [vmem:[%s3609_s3 + $0x1c] sm:$0xf] %vm1162_vm1, %v2662_v37  ;;  %v2670_v41 = vpack.c.bf16 %v2270_v38, %v2270_v38 }
 0x16e   :  { %2651 = vst.msk [vmem:[%s3609_s3 + $0x30] sm:$0xf] %vm1162_vm1, %v2667_v26  ;;  %1168 = vst.msk [vmem:[%s3609_s3 + $0x14] sm:$0xf] %vm1162_vm1, %v2660_v39  ;;  %v2668_v42 = vpack.c.bf16 %v2268_v40, %v2268_v40 }
 0x16f   :  { %2654 = vst.msk [vmem:[%s3609_s3 + $0x3c] sm:$0xf] %vm1162_vm1, %v2670_v41 }
 0x170   :  { %2652 = vst.msk [vmem:[%s3609_s3 + $0x34] sm:$0xf] %vm1162_vm1, %v2668_v42 }

// kernel: statistics_network_forward.7
= control target key start
LH: loop header
LB: loop body
LE: loop exit
PB: predicated region body
PF: predicated region fallthrough
CT: control target
= control target key end

     0   :  { %v1776_v0 = vmov 0.0   ;;  %vm1777_vm0 = vmmov 0   ;;  %vm47_vm1 = vcmask 261120   ;;  %vm240_vm2 = vcmask 1045504   ;;  %s2129_s1 = inlined_call_operand.vmem [shape: bf16[9,32,16], index: 1, kind: input, shape index: {}]   ;;  %s2130_s0 = inlined_call_operand.vmem [shape: bf16[2,3,24,32], index: 0, kind: input, shape index: {}]   ;;  %s2131_s2 = inlined_call_operand.vmem [shape: f32[1,16], index: 2, kind: input, shape index: {}]   ;;  %s2132_s3 = inlined_call_operand.vmem [shape: bf16[2,16,16], index: 3, kind: output, shape index: {}]  }
   0x1   :  { %1570 = vmatprep.subr.bf16.mxu0 %v1776_v0  ;;  %1578 = vmatprep.subr.bf16.mxu1 %v1776_v0  ;;  %v1716_v1 = vld [vmem:[%s2129_s1 + $0x10] sm:$0xff]   ;;  %v1717_v2 = vld [vmem:[%s2129_s1] sm:$0xff]   ;;  %v1718_v3 = vld [vmem:[%s2129_s1 + $0x18] sm:$0xff]   ;;  %vm677_vm3 = vcmask 125952  }
   0x2   :  { %1574 = vmatprep.mubr.msk.bf16.mxu0 %vm1777_vm0, %v1776_v0  ;;  %1582 = vmatprep.mubr.msk.bf16.mxu1 %vm1777_vm0, %v1776_v0  ;;  %v1719_v4 = vld [vmem:[%s2129_s1 + $0x8] sm:$0xff]   ;;  %v1721_v6 = vld [vmem:[%s2130_s0] sm:$0xff]   ;;  %v1723_v8 = vld [vmem:[%s2129_s1 + $0x30] sm:$0xff]  }
   0x3   :  { %1571 = vmatpush3.bf16.msra.mxu0 %v1716_v1  ;;  %1579 = vmatpush3.bf16.msra.mxu1 %v1717_v2  ;;  %v1720_v5 = vld [vmem:[%s2130_s0 + $0xc] sm:$0xff]   ;;  %v1722_v7 = vld [vmem:[%s2129_s1 + $0x20] sm:$0xff]   ;;  %v1725_v10 = vld [vmem:[%s2129_s1 + $0x38] sm:$0xff]  }
   0x4   :  { %1572 = vmatprep.subr.bf16.mxu0 %v1776_v0  ;;  %1580 = vmatprep.subr.bf16.mxu1 %v1776_v0  ;;  %v1724_v9 = vld [vmem:[%s2129_s1 + $0x28] sm:$0xff]   ;;  %v224_v11 = vld [vmem:[%s2130_s0] sm:$0xc]  ;;  %v1847_v12 = vld [vmem:[%s2130_s0 + $0x4] sm:$0xf] }
   0x5   :  { %v1726_v13 = vld [vmem:[%s2130_s0 + $0x18] sm:$0xff]   ;;  %v1361_v14 = vcombine.low %v224_v11, %v1847_v12  ;;  %v1728_v15 = vld [vmem:[%s2130_s0 + $0x8] ss:$0 sps:$4 sm:$0x33]   ;;  %v1729_v18 = vld [vmem:[%s2129_s1 + $0x40] sm:$0xff]  }
   0x6   :  { %v242_v17 = vrot.slane %v1728_v15, 2  ;;  %v1730_v19 = vld [vmem:[%s2129_s1 + $0x50] sm:$0xff]   ;;  %v1366_v21 = vld [vmem:[%s2130_s0 + $0xc] sm:$0xc]  ;;  %v1378_v26 = vld [vmem:[%s2130_s0 + $0x18] sm:$0xc] }
   0x7   :  { %1573 = vmatpush3.bf16.msra.mxu0 %v1718_v3  ;;  %1581 = vmatpush3.bf16.msra.mxu1 %v1719_v4  ;;  %v241_v16 = vrot.slane %v1361_v14, 2  ;;  %v1367_v22 = vld [vmem:[%s2130_s0 + $0x10] sm:$0xf]  ;;  %v1731_v23 = vld [vmem:[%s2129_s1 + $0x48] sm:$0xff]   ;;  %v1379_v27 = vld [vmem:[%s2130_s0 + $0x1c] sm:$0xf] }
   0x8   :  { %1586 = vmatprep.subr.bf16.mxu0 %v1776_v0  ;;  %1594 = vmatprep.subr.bf16.mxu1 %v1776_v0  ;;  %v1373_v24 = vcombine.low %v1366_v21, %v1367_v22  ;;  %v1734_v25 = vld [vmem:[%s2130_s0 + $0x14] ss:$0 sps:$4 sm:$0x33]   ;;  %v1732_v28 = vld [vmem:[%s2129_s1 + $0x58] sm:$0xff]   ;;  %v1385_v31 = vcombine.low %v1378_v26, %v1379_v27  ;;  %v1737_v36 = vld [vmem:[%s2129_s1 + $0x60] sm:$0xff]  }
   0x9   :  { %v243_v20 = vsel %vm240_vm2, %v241_v16, %v242_v17  ;;  %v319_v30 = vrot.slane %v1734_v25, 2  ;;  %v1736_v32 = vld [vmem:[%s2130_s0 + $0x20] ss:$0 sps:$4 sm:$0x33]   ;;  %v1738_v38 = vld [vmem:[%s2129_s1 + $0x70] sm:$0xff]   ;;  %v1739_v39 = vld [vmem:[%s2129_s1 + $0x68] sm:$0xff]  }
   0xa   :  { %1575 = vmatmul.mubr.msk.bf16.vlgmr.msra.gmra.mrb[0].mxu0 %vm47_vm1, %v1720_v5  ;;  %1583 = vmatmul.mubr.msk.bf16.vlgmr.msra.gmra.mrb[0].mxu1 %vm47_vm1, %v1721_v6  ;;  %v318_v29 = vrot.slane %v1373_v24, 2  ;;  %v395_v33 = vrot.slane %v1385_v31, 2  ;;  %v396_v34 = vrot.slane %v1736_v32, 2  ;;  %v1740_v40 = vld [vmem:[%s2129_s1 + $0x78] sm:$0xff]   ;;  %v456_v41 = vld [vmem:[%s2130_s0 + $0x8] sm:$0xf] }
   0xb   :  { %1587 = vmatpush3.bf16.msra.mxu0 %v1722_v7  ;;  %1595 = vmatpush3.bf16.msra.mxu1 %v1723_v8  ;;  %v1398_v42 = vld [vmem:[%s2130_s0 + $0x14] sm:$0xf]  ;;  %v1394_v43 = vcombine.low %v1847_v12, %v456_v41  ;;  %v1743_v45 = vld [vmem:[%s2129_s1 + $0x80] sm:$0xff]   ;;  %v1745_v47 = vld [vmem:[%s2129_s1 + $0x88] sm:$0xff]  }
   0xc   :  { %1588 = vmatprep.subr.bf16.mxu0 %v1776_v0  ;;  %1596 = vmatprep.subr.bf16.mxu1 %v1776_v0  ;;  %v320_v35 = vsel %vm240_vm2, %v318_v29, %v319_v30  ;;  %v397_v37 = vsel %vm240_vm2, %v395_v33, %v396_v34  ;;  %v1403_v44 = vcombine.low %v1367_v22, %v1398_v42  ;;  %v1744_v46 = vld [vmem:[%s2129_s1 + $0x10] sm:$0xff]   ;;  %v1407_v48 = vld [vmem:[%s2130_s0 + $0x20] sm:$0xf]  ;;  %v1746_v49 = vld [vmem:[%s2129_s1 + $0x18] sm:$0xff]  }
   0xd   :  { %1590 = vmatprep.mubr.msk.bf16.mxu0 %vm1777_vm0, %v1776_v0  ;;  %1598 = vmatprep.mubr.msk.bf16.mxu1 %vm1777_vm0, %v1776_v0  ;;  %v1412_v50 = vcombine.low %v1379_v27, %v1407_v48  ;;  %v1748_v51 = vld [vmem:[%s2130_s0 + $0x30] sm:$0xff]   ;;  %v1749_v52 = vld [vmem:[%s2129_s1] sm:$0xff]   ;;  %v1976_v55 = vld [vmem:[%s2130_s0 + $0x28] sm:$0xf] }
   0xe   :  { %v1750_v53 = vld [vmem:[%s2129_s1 + $0x20] sm:$0xff]   ;;  %v1457_v56 = vld [vmem:[%s2130_s0 + $0x30] sm:$0xc]  ;;  %v1984_v57 = vld [vmem:[%s2130_s0 + $0x34] sm:$0xf] }
   0xf   :  { %1589 = vmatpush3.bf16.msra.mxu0 %v1724_v9  ;;  %1597 = vmatpush3.bf16.msra.mxu1 %v1725_v10  ;;  %v1445_v54 = vld [vmem:[%s2130_s0 + $0x24] sm:$0xc]  ;;  %v1751_v58 = vld [vmem:[%s2129_s1 + $0x8] sm:$0xff]   ;;  %v1762_v60 = vld [vmem:[%s2130_s0 + $0x38] ss:$0 sps:$4 sm:$0x33]   ;;  %v1464_v1 = vcombine.low %v1457_v56, %v1984_v57 }
  0x10   :  { %1602 = vmatprep.subr.bf16.mxu0 %v1776_v0  ;;  %1610 = vmatprep.subr.bf16.mxu1 %v1776_v0  ;;  %v1760_v59 = vld [vmem:[%s2130_s0 + $0x2c] ss:$0 sps:$4 sm:$0x33]   ;;  %v1753_v62 = vld [vmem:[%s2130_s0 + $0x24] sm:$0xff]   ;;  %v1452_v63 = vcombine.low %v1445_v54, %v1976_v55  ;;  %v1754_v2 = vld [vmem:[%s2130_s0 + $0x3c] sm:$0xff]   ;;  %v978_v9 = vrot.slane %v1762_v60, 2 }
  0x11   :  { %v1752_v61 = vld [vmem:[%s2129_s1 + $0x28] sm:$0xff]   ;;  %v1755_v3 = vld [vmem:[%s2129_s1 + $0x30] sm:$0xff]   ;;  %v1756_v4 = vld [vmem:[%s2129_s1 + $0x40] sm:$0xff]   ;;  %v902_v7 = vrot.slane %v1760_v59, 2  ;;  %v977_v8 = vrot.slane %v1464_v1, 2 }
  0x12   :  { %1591 = vmatmul.mubr.msk.bf16.vlgmr.msra.gmra.mrb[4].mxu0 %vm47_vm1, %v1726_v13  ;;  %1599 = vmatmul.mubr.msk.bf16.vlgmr.msra.gmra.mrb[4].mxu1 %vm47_vm1, %v243_v20  ;;  %v1757_v5 = vld [vmem:[%s2129_s1 + $0x38] sm:$0xff]   ;;  %v901_v6 = vrot.slane %v1452_v63, 2  ;;  %v1758_v10 = vld [vmem:[%s2129_s1 + $0x48] sm:$0xff]   ;;  %v1470_v12 = vld [vmem:[%s2130_s0 + $0x40] sm:$0xf] }
  0x13   :  { %1603 = vmatpush3.bf16.msra.mxu0 %v1729_v18  ;;  %1611 = vmatpush3.bf16.msra.mxu1 %v1730_v19  ;;  %v1469_v11 = vld [vmem:[%s2130_s0 + $0x3c] sm:$0xc]  ;;  %v1763_v14 = vld [vmem:[%s2129_s1 + $0x50] sm:$0xff]   ;;  %v1768_v16 = vld [vmem:[%s2130_s0 + $0x44] ss:$0 sps:$4 sm:$0x33]   ;;  %v979_v17 = vsel %vm240_vm2, %v977_v8, %v978_v9 }
  0x14   :  { %1604 = vmatprep.subr.bf16.mxu0 %v1776_v0  ;;  %1612 = vmatprep.subr.bf16.mxu1 %v1776_v0  ;;  %v903_v13 = vsel %vm240_vm2, %v901_v6, %v902_v7  ;;  %v1476_v15 = vcombine.low %v1469_v11, %v1470_v12  ;;  %v1764_v18 = vld [vmem:[%s2129_s1 + $0x60] sm:$0xff]   ;;  %v1765_v19 = vld [vmem:[%s2129_s1 + $0x58] sm:$0xff]   ;;  %v1054_v21 = vrot.slane %v1768_v16, 2  ;;  %v1766_v22 = vld [vmem:[%s2129_s1 + $0x68] sm:$0xff]  }
  0x15   :  { %1606 = vmatprep.mubr.msk.bf16.mxu0 %vm1777_vm0, %v1776_v0  ;;  %1614 = vmatprep.mubr.msk.bf16.mxu1 %vm1777_vm0, %v1776_v0  ;;  %v1770_v26 = vld [vmem:[%s2129_s1 + $0x70] sm:$0xff]   ;;  %v1771_v27 = vld [vmem:[%s2129_s1 + $0x80] sm:$0xff]   ;;  %v1490_v29 = vld [vmem:[%s2130_s0 + $0x38] sm:$0xf] }
  0x16   :  { %v1053_v20 = vrot.slane %v1476_v15, 2  ;;  %v1773_v30 = vld [vmem:[%s2129_s1 + $0x88] sm:$0xff]   ;;  %v1499_v31 = vld [vmem:[%s2130_s0 + $0x44] sm:$0xf]  ;;  %v1495_v32 = vcombine.low %v1984_v57, %v1490_v29  ;;  %v2107_v16 = vld [vmem:[%s2131_s2] ss:$0 sm:$0xff] }
  0x17   :  { %1605 = vmatpush3.bf16.msra.mxu0 %v1731_v23  ;;  %1613 = vmatpush3.bf16.msra.mxu1 %v1732_v28  ;;  %v1481_v23 = vld [vmem:[%s2130_s0 + $0x2c] sm:$0xf]  ;;  %v1772_v28 = vld [vmem:[%s2129_s1 + $0x78] sm:$0xff]   ;;  %v1504_v33 = vcombine.low %v1470_v12, %v1499_v31 }
  0x18   :  { %1618 = vmatprep.subr.bf16.mxu0 %v1776_v0  ;;  %1626 = vmatprep.subr.bf16.mxu1 %v1776_v0  ;;  %v1055_v24 = vsel %vm240_vm2, %v1053_v20, %v1054_v21  ;;  %v1486_v25 = vcombine.low %v1976_v55, %v1481_v23 }
  0x1a   :  { %1607 = vmatmul.mubr.msk.bf16.vlgmr.msra.gmra.mrb[8].mxu0 %vm47_vm1, %v320_v35  ;;  %1615 = vmatmul.mubr.msk.bf16.vlgmr.msra.gmra.mrb[8].mxu1 %vm47_vm1, %v397_v37 }
  0x1b   :  { %1619 = vmatpush3.bf16.msra.mxu0 %v1737_v36  ;;  %1627 = vmatpush3.bf16.msra.mxu1 %v1738_v38 }
  0x1c   :  { %1620 = vmatprep.subr.bf16.mxu0 %v1776_v0  ;;  %1628 = vmatprep.subr.bf16.mxu1 %v1776_v0 }
  0x1d   :  { %1622 = vmatprep.mubr.msk.bf16.mxu0 %vm1777_vm0, %v1776_v0  ;;  %1630 = vmatprep.mubr.msk.bf16.mxu1 %vm1777_vm0, %v1776_v0 }
  0x1f   :  { %1621 = vmatpush3.bf16.msra.mxu0 %v1739_v39  ;;  %1629 = vmatpush3.bf16.msra.mxu1 %v1740_v40 }
  0x20   :  { %1634 = vmatprep.subr.bf16.mxu0 %v1776_v0  ;;  %1642 = vmatprep.subr.bf16.mxu1 %v1776_v0 }
  0x22   :  { %1623 = vmatmul.mubr.msk.bf16.vlgmr.msra.gmra.mrb[12].mxu0 %vm47_vm1, %v1394_v43  ;;  %1631 = vmatmul.mubr.msk.bf16.vlgmr.msra.gmra.mrb[12].mxu1 %vm47_vm1, %v1403_v44 }
  0x23   :  { %1635 = vmatpush3.bf16.msra.mxu0 %v1743_v45  ;;  %1643 = vmatpush3.bf16.msra.mxu1 %v1744_v46 }
  0x24   :  { %1636 = vmatprep.subr.bf16.mxu0 %v1776_v0  ;;  %1644 = vmatprep.subr.bf16.mxu1 %v1776_v0 }
  0x25   :  { %1638 = vmatprep.mubr.msk.bf16.mxu0 %vm1777_vm0, %v1776_v0  ;;  %1646 = vmatprep.mubr.msk.bf16.mxu1 %vm1777_vm0, %v1776_v0 }
  0x27   :  { %1637 = vmatpush3.bf16.msra.mxu0 %v1745_v47  ;;  %1645 = vmatpush3.bf16.msra.mxu1 %v1746_v49 }
  0x28   :  { %1650 = vmatprep.subr.bf16.mxu0 %v1776_v0  ;;  %1658 = vmatprep.subr.bf16.mxu1 %v1776_v0 }
  0x2a   :  { %1639 = vmatmul.mubr.msk.bf16.vlgmr.msra.gmra.mrb[16].mxu0 %vm47_vm1, %v1412_v50  ;;  %1647 = vmatmul.mubr.msk.bf16.vlgmr.msra.gmra.mrb[16].mxu1 %vm47_vm1, %v1748_v51 }
  0x2b   :  { %1651 = vmatpush3.bf16.msra.mxu0 %v1749_v52  ;;  %1659 = vmatpush3.bf16.msra.mxu1 %v1750_v53 }
  0x2c   :  { %1652 = vmatprep.subr.bf16.mxu0 %v1776_v0  ;;  %1660 = vmatprep.subr.bf16.mxu1 %v1776_v0 }
  0x2d   :  { %1654 = vmatprep.mubr.msk.bf16.mxu0 %vm1777_vm0, %v1776_v0  ;;  %1662 = vmatprep.mubr.msk.bf16.mxu1 %vm1777_vm0, %v1776_v0 }
  0x2f   :  { %1653 = vmatpush3.bf16.msra.mxu0 %v1751_v58  ;;  %1661 = vmatpush3.bf16.msra.mxu1 %v1752_v61 }
  0x30   :  { %1666 = vmatprep.subr.bf16.mxu0 %v1776_v0  ;;  %1674 = vmatprep.subr.bf16.mxu1 %v1776_v0 }
  0x32   :  { %1655 = vmatmul.mubr.msk.bf16.vlgmr.msra.gmra.mrb[20].mxu0 %vm47_vm1, %v1753_v62  ;;  %1663 = vmatmul.mubr.msk.bf16.vlgmr.msra.gmra.mrb[20].mxu1 %vm47_vm1, %v1754_v2 }
  0x33   :  { %1667 = vmatpush3.bf16.msra.mxu0 %v1755_v3  ;;  %1675 = vmatpush3.bf16.msra.mxu1 %v1756_v4 }
  0x34   :  { %1668 = vmatprep.subr.bf16.mxu0 %v1776_v0  ;;  %1676 = vmatprep.subr.bf16.mxu1 %v1776_v0 }
  0x35   :  { %1670 = vmatprep.mubr.msk.bf16.mxu0 %vm1777_vm0, %v1776_v0  ;;  %1678 = vmatprep.mubr.msk.bf16.mxu1 %vm1777_vm0, %v1776_v0 }
  0x37   :  { %1669 = vmatpush3.bf16.msra.mxu0 %v1757_v5  ;;  %1677 = vmatpush3.bf16.msra.mxu1 %v1758_v10 }
  0x38   :  { %1682 = vmatprep.subr.bf16.mxu0 %v1776_v0  ;;  %1690 = vmatprep.subr.bf16.mxu1 %v1776_v0 }
  0x3a   :  { %1671 = vmatmul.mubr.msk.bf16.vlgmr.msra.gmra.mrb[24].mxu0 %vm47_vm1, %v903_v13  ;;  %1679 = vmatmul.mubr.msk.bf16.vlgmr.msra.gmra.mrb[24].mxu1 %vm47_vm1, %v979_v17 }
  0x3b   :  { %1683 = vmatpush3.bf16.msra.mxu0 %v1763_v14  ;;  %1691 = vmatpush3.bf16.msra.mxu1 %v1764_v18 }
  0x3c   :  { %1684 = vmatprep.subr.bf16.mxu0 %v1776_v0  ;;  %1692 = vmatprep.subr.bf16.mxu1 %v1776_v0 }
  0x3d   :  { %1686 = vmatprep.mubr.msk.bf16.mxu0 %vm1777_vm0, %v1776_v0  ;;  %1694 = vmatprep.mubr.msk.bf16.mxu1 %vm1777_vm0, %v1776_v0 }
  0x3f   :  { %1685 = vmatpush3.bf16.msra.mxu0 %v1765_v19  ;;  %1693 = vmatpush3.bf16.msra.mxu1 %v1766_v22 }
  0x40   :  { %1698 = vmatprep.subr.bf16.mxu0 %v1776_v0  ;;  %1706 = vmatprep.subr.bf16.mxu1 %v1776_v0 }
  0x42   :  { %1687 = vmatmul.mubr.msk.bf16.vlgmr.msra.gmra.mrb[28].mxu0 %vm47_vm1, %v1055_v24  ;;  %1695 = vmatmul.mubr.msk.bf16.vlgmr.msra.gmra.mrb[28].mxu1 %vm47_vm1, %v1486_v25 }
  0x43   :  { %1699 = vmatpush3.bf16.msra.mxu0 %v1770_v26  ;;  %1707 = vmatpush3.bf16.msra.mxu1 %v1771_v27 }
  0x44   :  { %1700 = vmatprep.subr.bf16.mxu0 %v1776_v0  ;;  %1708 = vmatprep.subr.bf16.mxu1 %v1776_v0 }
  0x45   :  { %1702 = vmatprep.mubr.msk.bf16.mxu0 %vm1777_vm0, %v1776_v0  ;;  %1710 = vmatprep.mubr.msk.bf16.mxu1 %vm1777_vm0, %v1776_v0 }
  0x47   :  { %1701 = vmatpush3.bf16.msra.mxu0 %v1772_v28  ;;  %1709 = vmatpush3.bf16.msra.mxu1 %v1773_v30 }
  0x4a   :  { %1703 = vmatmul.mubr.msk.bf16.vlgmr.msra.gmra.mrb[32].mxu0 %vm47_vm1, %v1495_v32  ;;  %1711 = vmatmul.mubr.msk.bf16.vlgmr.msra.gmra.mrb[32].mxu1 %vm47_vm1, %v1504_v33 }
  0xdd   :  { %v85_v34 = vpop.f32.mrb[0].mxu0  ;;  %v146_v35 = vpop.f32.mrb[0].mxu1 }
  0xde   :  { %v1576_v36 = vpop.f32.mrb[1].mxu0  ;;  %v147_v37 = vadd.f32 %v146_v35, %v85_v34  ;;  %v1584_v38 = vpop.f32.mrb[1].mxu1 }
  0xdf   :  { %v88_v39 = vpop.f32.mrb[2].mxu0  ;;  %v149_v40 = vpop.f32.mrb[2].mxu1 }
  0xe0   :  { %v1577_v41 = vpop.f32.mrb[3].mxu0  ;;  %v150_v42 = vadd.f32 %v149_v40, %v88_v39  ;;  %v1585_v43 = vpop.f32.mrb[3].mxu1 }
  0xe5   :  { %v215_v0 = vpop.f32.mrb[4].mxu0  ;;  %v293_v45 = vpop.f32.mrb[4].mxu1 }
  0xe6   :  { %v222_v44 = vadd.f32 %v215_v0, %v147_v37  ;;  %v1592_v46 = vpop.f32.mrb[5].mxu0  ;;  %v1600_v47 = vpop.f32.mrb[5].mxu1 }
  0xe7   :  { %v218_v48 = vpop.f32.mrb[6].mxu0  ;;  %v296_v51 = vpop.f32.mrb[6].mxu1 }
  0xe8   :  { %v300_v49 = vadd.f32 %v293_v45, %v222_v44  ;;  %v223_v50 = vadd.f32 %v218_v48, %v150_v42  ;;  %v1593_v52 = vpop.f32.mrb[7].mxu0  ;;  %v1601_v53 = vpop.f32.mrb[7].mxu1 }
  0xea   :  { %v301_v54 = vadd.f32 %v296_v51, %v223_v50 }
  0xed   :  { %v370_v55 = vpop.f32.mrb[8].mxu0  ;;  %v447_v57 = vpop.f32.mrb[8].mxu1 }
  0xee   :  { %v377_v56 = vadd.f32 %v370_v55, %v300_v49  ;;  %v1608_v58 = vpop.f32.mrb[9].mxu0  ;;  %v1616_v59 = vpop.f32.mrb[9].mxu1 }
  0xef   :  { %v373_v60 = vpop.f32.mrb[10].mxu0  ;;  %v450_v63 = vpop.f32.mrb[10].mxu1 }
  0xf0   :  { %v454_v61 = vadd.f32 %v447_v57, %v377_v56  ;;  %v378_v62 = vadd.f32 %v373_v60, %v301_v54  ;;  %v1609_v1 = vpop.f32.mrb[11].mxu0  ;;  %v1617_v2 = vpop.f32.mrb[11].mxu1 }
  0xf2   :  { %v455_v3 = vadd.f32 %v450_v63, %v378_v62 }
  0xf5   :  { %v514_v4 = vpop.f32.mrb[12].mxu0  ;;  %v581_v6 = vpop.f32.mrb[12].mxu1 }
  0xf6   :  { %v521_v5 = vadd.f32 %v514_v4, %v454_v61  ;;  %v1624_v7 = vpop.f32.mrb[13].mxu0  ;;  %v1632_v8 = vpop.f32.mrb[13].mxu1 }
  0xf7   :  { %v517_v9 = vpop.f32.mrb[14].mxu0  ;;  %v584_v12 = vpop.f32.mrb[14].mxu1 }
  0xf8   :  { %v588_v10 = vadd.f32 %v581_v6, %v521_v5  ;;  %v522_v11 = vadd.f32 %v517_v9, %v455_v3  ;;  %v1625_v13 = vpop.f32.mrb[15].mxu0  ;;  %v1633_v14 = vpop.f32.mrb[15].mxu1 }
  0xfa   :  { %v589_v15 = vadd.f32 %v584_v12, %v522_v11 }
  0xfd   :  { %v648_v17 = vpop.f32.mrb[16].mxu0  ;;  %v748_v19 = vpop.f32.mrb[16].mxu1 }
  0xfe   :  { %v655_v18 = vadd.f32 %v648_v17, %v588_v10  ;;  %v1640_v20 = vpop.f32.mrb[17].mxu0  ;;  %v1648_v21 = vpop.f32.mrb[17].mxu1 }
  0xff   :  { %v651_v22 = vpop.f32.mrb[18].mxu0  ;;  %v751_v25 = vpop.f32.mrb[18].mxu1 }
 0x100   :  { %v663_v23 = vadd.f32 %v2107_v16, %v655_v18  ;;  %v656_v24 = vadd.f32 %v651_v22, %v589_v15  ;;  %v1641_v26 = vpop.f32.mrb[19].mxu0  ;;  %v1649_v27 = vpop.f32.mrb[19].mxu1 }
 0x102   :  { %v665_v28 = vmul.f32 0.2, %v663_v23  ;;  %v664_v29 = vadd.f32 %v2107_v16, %v656_v24 }
 0x104   :  { %v667_v30 = vmax.f32 %v663_v23, %v665_v28  ;;  %v666_v31 = vmul.f32 0.2, %v664_v29 }
 0x105   :  { %v809_v32 = vpop.f32.mrb[20].mxu0  ;;  %v877_v36 = vpop.f32.mrb[20].mxu1 }
 0x106   :  { %v1512_v33 = vpack.c.bf16 %v667_v30, %v667_v30  ;;  %v668_v34 = vmax.f32 %v664_v29, %v666_v31  ;;  %v810_v35 = vadd.f32 %v809_v32, %v748_v19  ;;  %v1656_v37 = vpop.f32.mrb[21].mxu0  ;;  %v1664_v38 = vpop.f32.mrb[21].mxu1 }
 0x107   :  { %v812_v39 = vpop.f32.mrb[22].mxu0  ;;  %v880_v43 = vpop.f32.mrb[22].mxu1 }
 0x108   :  { %678 = vst.msk [vmem:[%s2132_s3] sm:$0xf] %vm677_vm3, %v1512_v33  ;;  %v1513_v40 = vpack.c.bf16 %v668_v34, %v668_v34  ;;  %v884_v41 = vadd.f32 %v877_v36, %v810_v35  ;;  %v813_v42 = vadd.f32 %v812_v39, %v751_v25  ;;  %v1657_v0 = vpop.f32.mrb[23].mxu0  ;;  %v1665_v44 = vpop.f32.mrb[23].mxu1 }
 0x10a   :  { %679 = vst.msk [vmem:[%s2132_s3 + $0x4] sm:$0xf] %vm677_vm3, %v1513_v40  ;;  %v885_v45 = vadd.f32 %v880_v43, %v813_v42 }
 0x10d   :  { %v953_v46 = vpop.f32.mrb[24].mxu0  ;;  %v1029_v48 = vpop.f32.mrb[24].mxu1 }
 0x10e   :  { %v960_v47 = vadd.f32 %v953_v46, %v884_v41  ;;  %v1672_v49 = vpop.f32.mrb[25].mxu0  ;;  %v1680_v50 = vpop.f32.mrb[25].mxu1 }
 0x10f   :  { %v956_v51 = vpop.f32.mrb[26].mxu0  ;;  %v1032_v54 = vpop.f32.mrb[26].mxu1 }
 0x110   :  { %v1036_v52 = vadd.f32 %v1029_v48, %v960_v47  ;;  %v961_v53 = vadd.f32 %v956_v51, %v885_v45  ;;  %v1673_v55 = vpop.f32.mrb[27].mxu0  ;;  %v1681_v56 = vpop.f32.mrb[27].mxu1 }
 0x112   :  { %v1037_v57 = vadd.f32 %v1032_v54, %v961_v53 }
 0x115   :  { %v1105_v58 = vpop.f32.mrb[28].mxu0  ;;  %v1171_v60 = vpop.f32.mrb[28].mxu1 }
 0x116   :  { %v1112_v59 = vadd.f32 %v1105_v58, %v1036_v52  ;;  %v1688_v61 = vpop.f32.mrb[29].mxu0  ;;  %v1696_v62 = vpop.f32.mrb[29].mxu1 }
 0x117   :  { %v1108_v63 = vpop.f32.mrb[30].mxu0  ;;  %v1174_v3 = vpop.f32.mrb[30].mxu1 }
 0x118   :  { %v1178_v1 = vadd.f32 %v1171_v60, %v1112_v59  ;;  %v1113_v2 = vadd.f32 %v1108_v63, %v1037_v57  ;;  %v1689_v4 = vpop.f32.mrb[31].mxu0  ;;  %v1697_v5 = vpop.f32.mrb[31].mxu1 }
 0x11a   :  { %v1179_v6 = vadd.f32 %v1174_v3, %v1113_v2 }
 0x11d   :  { %v1237_v7 = vpop.f32.mrb[32].mxu0  ;;  %v1303_v9 = vpop.f32.mrb[32].mxu1 }
 0x11e   :  { %v1244_v8 = vadd.f32 %v1237_v7, %v1178_v1  ;;  %v1704_v10 = vpop.f32.mrb[33].mxu0  ;;  %v1712_v11 = vpop.f32.mrb[33].mxu1 }
 0x11f   :  { %v1240_v12 = vpop.f32.mrb[34].mxu0  ;;  %v1306_v15 = vpop.f32.mrb[34].mxu1 }
 0x120   :  { %v1310_v13 = vadd.f32 %v1303_v9, %v1244_v8  ;;  %v1245_v14 = vadd.f32 %v1240_v12, %v1179_v6  ;;  %v1705_v17 = vpop.f32.mrb[35].mxu0  ;;  %v1713_v18 = vpop.f32.mrb[35].mxu1 }
 0x122   :  { %v1312_v19 = vadd.f32 %v2107_v16, %v1310_v13  ;;  %v1311_v20 = vadd.f32 %v1306_v15, %v1245_v14 }
 0x124   :  { %v1314_v21 = vmul.f32 0.2, %v1312_v19  ;;  %v1313_v22 = vadd.f32 %v2107_v16, %v1311_v20 }
 0x126   :  { %v1316_v23 = vmax.f32 %v1312_v19, %v1314_v21  ;;  %v1315_v24 = vmul.f32 0.2, %v1313_v22 }
 0x128   :  { %v1514_v25 = vpack.c.bf16 %v1316_v23, %v1316_v23  ;;  %v1317_v26 = vmax.f32 %v1313_v22, %v1315_v24 }
 0x12a   :  { %1510 = vst.msk [vmem:[%s2132_s3 + $0x8] sm:$0xf] %vm677_vm3, %v1514_v25  ;;  %v1515_v27 = vpack.c.bf16 %v1317_v26, %v1317_v26 }
 0x12c   :  { %1511 = vst.msk [vmem:[%s2132_s3 + $0xc] sm:$0xf] %vm677_vm3, %v1515_v27 }

// kernel: statistics_network_forward.5
= control target key start
LH: loop header
LB: loop body
LE: loop exit
PB: predicated region body
PF: predicated region fallthrough
CT: control target
= control target key end

     0   :  { %vm213_vm0 = vcmask 1041408   ;;  %vm164_vm1 = vcmask 31744   ;;  %vm3407_vm2 = vcmask 27648   ;;  %s11457_s1 = inlined_call_operand.vmem [shape: bf16[9,4,4], index: 1, kind: input, shape index: {}]   ;;  %s11458_s0 = inlined_call_operand.vmem [shape: bf16[2,3,288,4], index: 0, kind: input, shape index: {}]   ;;  %s11459_s2 = inlined_call_operand.vmem [shape: f32[1,4], index: 2, kind: input, shape index: {}]   ;;  %s11460_s3 = inlined_call_operand.vmem [shape: bf16[2,256,4], index: 3, kind: output, shape index: {}]  }
   0x1   :  { %v6885_v0 = vld [vmem:[%s11457_s1 + $0x2] sm:$0x3]  ;;  %v9534_v4 = vld [vmem:[%s11458_s0 + $0x90] sm:$0xff]   ;;  %v9536_v6 = vld [vmem:[%s11458_s0 + $0x98] sm:$0xff]  }
   0x2   :  { %v7438_v1 = vld [vmem:[%s11457_s1 + $0x2] sm:$0x3]  ;;  %9516 = vmatprep.subr.msk.bf16.mxu0 %vm213_vm0, %v6885_v0  ;;  %v215_v2 = vsel %vm213_vm0, %v6885_v0, 0  ;;  %8394 = vmatprep.mubr.msk.bf16.mxu0 %vm164_vm1, %v9534_v4  ;;  %v48_v7 = vld [vmem:[%s11457_s1] sm:$0x3]  ;;  %v9537_v8 = vld [vmem:[%s11458_s0 + $0x248] sm:$0xff]  }
   0x3   :  { %9525 = vmatprep.subr.msk.bf16.mxu1 %vm213_vm0, %v7438_v1  ;;  %v3637_v3 = vsel %vm213_vm0, %v7438_v1, 0  ;;  %v9535_v5 = vld [vmem:[%s11458_s0 + $0x240] sm:$0xff]   ;;  %8393 = vmatpush3.bf16.msra.mxu0 %v215_v2  ;;  %v507_v9 = vsel %vm213_vm0, %v48_v7, 0  ;;  %v9539_v13 = vld [vmem:[%s11458_s0 + $0x250] sm:$0xff]   ;;  %v9540_v14 = vld [vmem:[%s11458_s0 + $0xa8] sm:$0xff]  }
   0x4   :  { %8699 = vmatpush3.bf16.msra.mxu1 %v3637_v3  ;;  %8700 = vmatprep.mubr.msk.bf16.mxu1 %vm164_vm1, %v9535_v5  ;;  %v3473_v10 = vld [vmem:[%s11457_s1] sm:$0x3]  ;;  %v9541_v15 = vld [vmem:[%s11458_s0 + $0x258] sm:$0xff]   ;;  %v9542_v16 = vld [vmem:[%s11458_s0 + $0xb0] sm:$0xff]  }
   0x5   :  { %9517 = vmatprep.subr.msk.bf16.mxu0 %vm213_vm0, %v48_v7  ;;  %9526 = vmatprep.subr.msk.bf16.mxu1 %vm213_vm0, %v3473_v10  ;;  %v3929_v11 = vsel %vm213_vm0, %v3473_v10, 0  ;;  %v9538_v12 = vld [vmem:[%s11458_s0 + $0xa0] sm:$0xff]   ;;  %v9544_v18 = vld [vmem:[%s11458_s0 + $0xb8] sm:$0xff]   ;;  %v9545_v19 = vld [vmem:[%s11458_s0 + $0x268] sm:$0xff]  }
   0x6   :  { %8395 = vmatmul.mubr.msk.bf16.vlgmr.msra.gmra.mrb[0].mxu0 %vm164_vm1, %v9536_v6  ;;  %v9543_v17 = vld [vmem:[%s11458_s0 + $0x260] sm:$0xff]   ;;  %v9547_v21 = vld [vmem:[%s11458_s0 + $0x270] sm:$0xff]   ;;  %v9548_v22 = vld [vmem:[%s11458_s0 + $0xc8] sm:$0xff]  }
   0x7   :  { %8701 = vmatmul.mubr.msk.bf16.vlgmr.msra.gmra.mrb[0].mxu1 %vm164_vm1, %v9537_v8  ;;  %8427 = vmatpush3.bf16.msra.mxu0 %v507_v9  ;;  %v9546_v20 = vld [vmem:[%s11458_s0 + $0xc0] sm:$0xff]   ;;  %v9549_v23 = vld [vmem:[%s11458_s0 + $0x278] sm:$0xff]   ;;  %v9550_v24 = vld [vmem:[%s11458_s0 + $0xd0] sm:$0xff]  }
   0x8   :  { %8733 = vmatpush3.bf16.msra.mxu1 %v3929_v11  ;;  %8398 = vmatprep.mubr.msk.bf16.mxu0 %vm164_vm1, %v9538_v12  ;;  %v9551_v25 = vld [vmem:[%s11458_s0 + $0x280] sm:$0xff]   ;;  %v9552_v26 = vld [vmem:[%s11458_s0 + $0xd8] sm:$0xff]   ;;  %v9553_v27 = vld [vmem:[%s11458_s0 + $0x288] sm:$0xff]  }
   0x9   :  { %8704 = vmatprep.mubr.msk.bf16.mxu1 %vm164_vm1, %v9539_v13  ;;  %v9554_v28 = vld [vmem:[%s11458_s0 + $0xe0] sm:$0xff]   ;;  %v9555_v29 = vld [vmem:[%s11458_s0 + $0x290] sm:$0xff]   ;;  %v9556_v32 = vld [vmem:[%s11458_s0 + $0xe8] sm:$0xff]  }
   0xa   :  { %v6982_v30 = vld [vmem:[%s11457_s1 + $0x4] sm:$0x3]  ;;  %v9557_v33 = vld [vmem:[%s11458_s0 + $0x298] sm:$0xff]   ;;  %v9558_v34 = vld [vmem:[%s11458_s0 + $0xf0] sm:$0xff]  }
   0xb   :  { %9518 = vmatprep.subr.msk.bf16.mxu0 %vm213_vm0, %v6982_v30  ;;  %v7535_v31 = vld [vmem:[%s11457_s1 + $0x4] sm:$0x3]  ;;  %v9560_v36 = vld [vmem:[%s11458_s0 + $0xf8] sm:$0xff]   ;;  %v9561_v37 = vld [vmem:[%s11458_s0 + $0x2a8] sm:$0xff]   ;;  %v834_v46 = vsel %vm213_vm0, %v6982_v30, 0 }
   0xc   :  { %9527 = vmatprep.subr.msk.bf16.mxu1 %vm213_vm0, %v7535_v31  ;;  %v9559_v35 = vld [vmem:[%s11458_s0 + $0x2a0] sm:$0xff]   ;;  %v9563_v39 = vld [vmem:[%s11458_s0 + $0x2b0] sm:$0xff]   ;;  %v9564_v40 = vld [vmem:[%s11458_s0 + $0x108] sm:$0xff]   ;;  %v4255_v48 = vsel %vm213_vm0, %v7535_v31, 0 }
   0xd   :  { %v9562_v38 = vld [vmem:[%s11458_s0 + $0x100] sm:$0xff]   ;;  %v9565_v41 = vld [vmem:[%s11458_s0 + $0x2b8] sm:$0xff]   ;;  %v9567_v43 = vld [vmem:[%s11458_s0 + $0x1b0] sm:$0xff]  }
   0xe   :  { %8399 = vmatmul.mubr.msk.bf16.gmra.mrb[4].mxu0 %vm164_vm1, %v9540_v14  ;;  %v9566_v42 = vld [vmem:[%s11458_s0] sm:$0xff]   ;;  %v9568_v44 = vld [vmem:[%s11458_s0 + $0x8] sm:$0xff]   ;;  %v9569_v45 = vld [vmem:[%s11458_s0 + $0x1b8] sm:$0xff]  }
   0xf   :  { %8705 = vmatmul.mubr.msk.bf16.gmra.mrb[4].mxu1 %vm164_vm1, %v9541_v15  ;;  %8402 = vmatprep.mubr.msk.bf16.mxu0 %vm164_vm1, %v9542_v16  ;;  %v9570_v47 = vld [vmem:[%s11458_s0 + $0x10] sm:$0xff]   ;;  %v9571_v49 = vld [vmem:[%s11458_s0 + $0x1c0] sm:$0xff]   ;;  %v9572_v52 = vld [vmem:[%s11458_s0 + $0x18] sm:$0xff]  }
  0x10   :  { %8708 = vmatprep.mubr.msk.bf16.mxu1 %vm164_vm1, %v9543_v17  ;;  %v10024_v50 = vld [vmem:[%s11457_s1 + $0x6] sm:$0x3]  ;;  %v9573_v53 = vld [vmem:[%s11458_s0 + $0x1c8] sm:$0xff]   ;;  %v9575_v55 = vld [vmem:[%s11458_s0 + $0x1d0] sm:$0xff]  }
  0x11   :  { %v10030_v51 = vld [vmem:[%s11457_s1 + $0x6] sm:$0x3]  ;;  %v9576_v56 = vld [vmem:[%s11458_s0 + $0x28] sm:$0xff]   ;;  %v9577_v57 = vld [vmem:[%s11458_s0 + $0x1d8] sm:$0xff]  }
  0x12   :  { %v9574_v54 = vld [vmem:[%s11458_s0 + $0x20] sm:$0xff]   ;;  %v9578_v58 = vld [vmem:[%s11458_s0 + $0x30] sm:$0xff]   ;;  %v9580_v60 = vld [vmem:[%s11458_s0 + $0x38] sm:$0xff]  }
  0x13   :  { %v9579_v59 = vld [vmem:[%s11458_s0 + $0x1e0] sm:$0xff]   ;;  %v9581_v61 = vld [vmem:[%s11458_s0 + $0x1e8] sm:$0xff]   ;;  %v9583_v63 = vld [vmem:[%s11458_s0 + $0x1f0] sm:$0xff]  }
  0x14   :  { %v9582_v62 = vld [vmem:[%s11458_s0 + $0x40] sm:$0xff]   ;;  %v9584_v0 = vld [vmem:[%s11458_s0 + $0x48] sm:$0xff]   ;;  %v9585_v1 = vld [vmem:[%s11458_s0 + $0x1f8] sm:$0xff]  }
  0x15   :  { %v9586_v2 = vld [vmem:[%s11458_s0 + $0x50] sm:$0xff]   ;;  %v9587_v3 = vld [vmem:[%s11458_s0 + $0x200] sm:$0xff]   ;;  %v9588_v4 = vld [vmem:[%s11458_s0 + $0x58] sm:$0xff]  }
  0x16   :  { %8403 = vmatmul.mubr.msk.bf16.gmra.mrb[8].mxu0 %vm164_vm1, %v9544_v18  ;;  %v9589_v5 = vld [vmem:[%s11458_s0 + $0x208] sm:$0xff]   ;;  %v9590_v6 = vld [vmem:[%s11458_s0 + $0x60] sm:$0xff]   ;;  %v9591_v7 = vld [vmem:[%s11458_s0 + $0x210] sm:$0xff]   ;;  %v1192_v18 = vsel %vm213_vm0, %v10024_v50, 0 }
  0x17   :  { %8709 = vmatmul.mubr.msk.bf16.gmra.mrb[8].mxu1 %vm164_vm1, %v9545_v19  ;;  %8406 = vmatprep.mubr.msk.bf16.mxu0 %vm164_vm1, %v9546_v20  ;;  %v9592_v8 = vld [vmem:[%s11458_s0 + $0x68] sm:$0xff]   ;;  %v9593_v9 = vld [vmem:[%s11458_s0 + $0x218] sm:$0xff]   ;;  %v9594_v10 = vld [vmem:[%s11458_s0 + $0x70] sm:$0xff]   ;;  %v4612_v20 = vsel %vm213_vm0, %v10030_v51, 0 }
  0x18   :  { %8712 = vmatprep.mubr.msk.bf16.mxu1 %vm164_vm1, %v9547_v21  ;;  %v9595_v11 = vld [vmem:[%s11458_s0 + $0x220] sm:$0xff]   ;;  %v9596_v12 = vld [vmem:[%s11458_s0 + $0x78] sm:$0xff]   ;;  %v9597_v13 = vld [vmem:[%s11458_s0 + $0x228] sm:$0xff]  }
  0x19   :  { %v9598_v14 = vld [vmem:[%s11458_s0 + $0x120] sm:$0xff]   ;;  %v9599_v15 = vld [vmem:[%s11458_s0 + $0x2d0] sm:$0xff]   ;;  %v9600_v16 = vld [vmem:[%s11458_s0 + $0x128] sm:$0xff]  }
  0x1a   :  { %v9601_v17 = vld [vmem:[%s11458_s0 + $0x2d8] sm:$0xff]   ;;  %v9602_v19 = vld [vmem:[%s11458_s0 + $0x130] sm:$0xff]   ;;  %v9603_v21 = vld [vmem:[%s11458_s0 + $0x2e0] sm:$0xff]  }
  0x1b   :  { %v9610_v30 = vld [vmem:[%s11458_s0 + $0x150] sm:$0xff]   ;;  %v9611_v31 = vld [vmem:[%s11458_s0 + $0x300] sm:$0xff]  }
  0x1e   :  { %8407 = vmatmul.mubr.msk.bf16.gmra.mrb[12].mxu0 %vm164_vm1, %v9548_v22  ;;  %v10170_v22 = vld [vmem:[%s11457_s1 + $0x8] sm:$0x3] }
  0x1f   :  { %8713 = vmatmul.mubr.msk.bf16.gmra.mrb[12].mxu1 %vm164_vm1, %v9549_v23  ;;  %8410 = vmatprep.mubr.msk.bf16.mxu0 %vm164_vm1, %v9550_v24  ;;  %v10176_v23 = vld [vmem:[%s11457_s1 + $0x8] sm:$0x3]  ;;  %v9604_v24 = vld [vmem:[%s11458_s0 + $0x138] sm:$0xff]  }
  0x20   :  { %8716 = vmatprep.mubr.msk.bf16.mxu1 %vm164_vm1, %v9551_v25  ;;  %v9605_v25 = vld [vmem:[%s11458_s0 + $0x2e8] sm:$0xff]  }
  0x26   :  { %8411 = vmatmul.mubr.msk.bf16.gmra.mrb[16].mxu0 %vm164_vm1, %v9552_v26  ;;  %v9606_v26 = vld [vmem:[%s11458_s0 + $0x140] sm:$0xff]  }
  0x27   :  { %8717 = vmatmul.mubr.msk.bf16.gmra.mrb[16].mxu1 %vm164_vm1, %v9553_v27  ;;  %8414 = vmatprep.mubr.msk.bf16.mxu0 %vm164_vm1, %v9554_v28  ;;  %v9607_v27 = vld [vmem:[%s11458_s0 + $0x2f0] sm:$0xff]   ;;  %v9608_v28 = vld [vmem:[%s11458_s0 + $0x148] sm:$0xff]  }
  0x28   :  { %8720 = vmatprep.mubr.msk.bf16.mxu1 %vm164_vm1, %v9555_v29  ;;  %v9609_v29 = vld [vmem:[%s11458_s0 + $0x2f8] sm:$0xff]  }
  0x2e   :  { %8415 = vmatmul.mubr.msk.bf16.gmra.mrb[20].mxu0 %vm164_vm1, %v9556_v32  ;;  %v9612_v32 = vld [vmem:[%s11458_s0 + $0x158] sm:$0xff]  }
  0x2f   :  { %8721 = vmatmul.mubr.msk.bf16.gmra.mrb[20].mxu1 %vm164_vm1, %v9557_v33  ;;  %8418 = vmatprep.mubr.msk.bf16.mxu0 %vm164_vm1, %v9558_v34  ;;  %v9613_v33 = vld [vmem:[%s11458_s0 + $0x308] sm:$0xff]   ;;  %v9614_v34 = vld [vmem:[%s11458_s0 + $0x160] sm:$0xff]  }
  0x30   :  { %8724 = vmatprep.mubr.msk.bf16.mxu1 %vm164_vm1, %v9559_v35  ;;  %v9615_v35 = vld [vmem:[%s11458_s0 + $0x310] sm:$0xff]  }
  0x36   :  { %8419 = vmatmul.mubr.msk.bf16.gmra.mrb[24].mxu0 %vm164_vm1, %v9560_v36  ;;  %v9616_v36 = vld [vmem:[%s11458_s0 + $0x168] sm:$0xff]  }
  0x37   :  { %8725 = vmatmul.mubr.msk.bf16.gmra.mrb[24].mxu1 %vm164_vm1, %v9561_v37  ;;  %8422 = vmatprep.mubr.msk.bf16.mxu0 %vm164_vm1, %v9562_v38  ;;  %v9617_v37 = vld [vmem:[%s11458_s0 + $0x318] sm:$0xff]   ;;  %v9618_v38 = vld [vmem:[%s11458_s0 + $0x170] sm:$0xff]  }
  0x38   :  { %8728 = vmatprep.mubr.msk.bf16.mxu1 %vm164_vm1, %v9563_v39  ;;  %v9619_v39 = vld [vmem:[%s11458_s0 + $0x320] sm:$0xff]  }
  0x3e   :  { %8423 = vmatmul.mubr.msk.bf16.gmra.mrb[28].mxu0 %vm164_vm1, %v9564_v40  ;;  %v9620_v40 = vld [vmem:[%s11458_s0 + $0x178] sm:$0xff]  }
  0x3f   :  { %8729 = vmatmul.mubr.msk.bf16.gmra.mrb[28].mxu1 %vm164_vm1, %v9565_v41  ;;  %8428 = vmatprep.mubr.msk.bf16.mxu0 %vm164_vm1, %v9566_v42  ;;  %v9621_v41 = vld [vmem:[%s11458_s0 + $0x328] sm:$0xff]   ;;  %v9622_v42 = vld [vmem:[%s11458_s0 + $0x180] sm:$0xff]  }
  0x40   :  { %8734 = vmatprep.mubr.msk.bf16.mxu1 %vm164_vm1, %v9567_v43  ;;  %v9623_v43 = vld [vmem:[%s11458_s0 + $0x330] sm:$0xff]  }
  0x46   :  { %8429 = vmatmul.mubr.msk.bf16.vlgmr.msra.gmra.mrb[0].mxu0 %vm164_vm1, %v9568_v44  ;;  %v9624_v44 = vld [vmem:[%s11458_s0 + $0x188] sm:$0xff]  }
  0x47   :  { %8735 = vmatmul.mubr.msk.bf16.vlgmr.msra.gmra.mrb[0].mxu1 %vm164_vm1, %v9569_v45  ;;  %8461 = vmatpush3.bf16.msra.mxu0 %v834_v46  ;;  %v9625_v45 = vld [vmem:[%s11458_s0 + $0x338] sm:$0xff]   ;;  %v9626_v46 = vld [vmem:[%s11458_s0 + $0x190] sm:$0xff]  }
  0x48   :  { %8767 = vmatpush3.bf16.msra.mxu1 %v4255_v48  ;;  %8432 = vmatprep.mubr.msk.bf16.mxu0 %vm164_vm1, %v9570_v47  ;;  %v9627_v47 = vld [vmem:[%s11458_s0 + $0x340] sm:$0xff]   ;;  %v9628_v48 = vld [vmem:[%s11458_s0 + $0x198] sm:$0xff]  }
  0x49   :  { %8738 = vmatprep.mubr.msk.bf16.mxu1 %vm164_vm1, %v9571_v49  ;;  %9519 = vmatprep.subr.msk.bf16.mxu0 %vm213_vm0, %v10024_v50  ;;  %v9629_v49 = vld [vmem:[%s11458_s0 + $0x348] sm:$0xff]  }
  0x4a   :  { %9528 = vmatprep.subr.msk.bf16.mxu1 %vm213_vm0, %v10030_v51  ;;  %v9630_v50 = vld [vmem:[%s11458_s0 + $0x8] sm:$0xff]   ;;  %v9631_v51 = vld [vmem:[%s11458_s0 + $0x1b8] sm:$0xff]  }
  0x4e   :  { %8433 = vmatmul.mubr.msk.bf16.gmra.mrb[4].mxu0 %vm164_vm1, %v9572_v52  ;;  %v9632_v52 = vld [vmem:[%s11458_s0 + $0x10] sm:$0xff]  }
  0x4f   :  { %8739 = vmatmul.mubr.msk.bf16.gmra.mrb[4].mxu1 %vm164_vm1, %v9573_v53  ;;  %8436 = vmatprep.mubr.msk.bf16.mxu0 %vm164_vm1, %v9574_v54  ;;  %v1550_v53 = vsel %vm213_vm0, %v10170_v22, 0  ;;  %v9633_v54 = vld [vmem:[%s11458_s0 + $0x1c0] sm:$0xff]  }
  0x50   :  { %8742 = vmatprep.mubr.msk.bf16.mxu1 %vm164_vm1, %v9575_v55  ;;  %v9634_v55 = vld [vmem:[%s11458_s0 + $0x18] sm:$0xff]  }
  0x56   :  { %8437 = vmatmul.mubr.msk.bf16.gmra.mrb[8].mxu0 %vm164_vm1, %v9576_v56  ;;  %v4969_v56 = vsel %vm213_vm0, %v10176_v23, 0 }
  0x57   :  { %8743 = vmatmul.mubr.msk.bf16.gmra.mrb[8].mxu1 %vm164_vm1, %v9577_v57  ;;  %8440 = vmatprep.mubr.msk.bf16.mxu0 %vm164_vm1, %v9578_v58  ;;  %v9635_v57 = vld [vmem:[%s11458_s0 + $0x1c8] sm:$0xff]  }
  0x58   :  { %8746 = vmatprep.mubr.msk.bf16.mxu1 %vm164_vm1, %v9579_v59  ;;  %v10316_v58 = vld [vmem:[%s11457_s1 + $0xa] sm:$0x3] }
  0x59   :  { %v10322_v59 = vld [vmem:[%s11457_s1 + $0xa] sm:$0x3] }
  0x5e   :  { %8441 = vmatmul.mubr.msk.bf16.gmra.mrb[12].mxu0 %vm164_vm1, %v9580_v60  ;;  %v9636_v60 = vld [vmem:[%s11458_s0 + $0x20] sm:$0xff]  }
  0x5f   :  { %8747 = vmatmul.mubr.msk.bf16.gmra.mrb[12].mxu1 %vm164_vm1, %v9581_v61  ;;  %8444 = vmatprep.mubr.msk.bf16.mxu0 %vm164_vm1, %v9582_v62  ;;  %v9637_v61 = vld [vmem:[%s11458_s0 + $0x1d0] sm:$0xff]   ;;  %v9638_v62 = vld [vmem:[%s11458_s0 + $0x28] sm:$0xff]  }
  0x60   :  { %8750 = vmatprep.mubr.msk.bf16.mxu1 %vm164_vm1, %v9583_v63  ;;  %v9639_v63 = vld [vmem:[%s11458_s0 + $0x1d8] sm:$0xff]  }
  0x66   :  { %8445 = vmatmul.mubr.msk.bf16.gmra.mrb[16].mxu0 %vm164_vm1, %v9584_v0  ;;  %v9640_v0 = vld [vmem:[%s11458_s0 + $0x30] sm:$0xff]  }
  0x67   :  { %8751 = vmatmul.mubr.msk.bf16.gmra.mrb[16].mxu1 %vm164_vm1, %v9585_v1  ;;  %8448 = vmatprep.mubr.msk.bf16.mxu0 %vm164_vm1, %v9586_v2  ;;  %v9641_v1 = vld [vmem:[%s11458_s0 + $0x1e0] sm:$0xff]   ;;  %v9642_v2 = vld [vmem:[%s11458_s0 + $0x38] sm:$0xff]  }
  0x68   :  { %8754 = vmatprep.mubr.msk.bf16.mxu1 %vm164_vm1, %v9587_v3  ;;  %v9643_v3 = vld [vmem:[%s11458_s0 + $0x1e8] sm:$0xff]  }
  0x6e   :  { %8449 = vmatmul.mubr.msk.bf16.gmra.mrb[20].mxu0 %vm164_vm1, %v9588_v4  ;;  %v9644_v4 = vld [vmem:[%s11458_s0 + $0x40] sm:$0xff]  }
  0x6f   :  { %8755 = vmatmul.mubr.msk.bf16.gmra.mrb[20].mxu1 %vm164_vm1, %v9589_v5  ;;  %8452 = vmatprep.mubr.msk.bf16.mxu0 %vm164_vm1, %v9590_v6  ;;  %v9645_v5 = vld [vmem:[%s11458_s0 + $0x1f0] sm:$0xff]   ;;  %v9646_v6 = vld [vmem:[%s11458_s0 + $0x48] sm:$0xff]  }
  0x70   :  { %8758 = vmatprep.mubr.msk.bf16.mxu1 %vm164_vm1, %v9591_v7  ;;  %v9647_v7 = vld [vmem:[%s11458_s0 + $0x1f8] sm:$0xff]  }
  0x76   :  { %8453 = vmatmul.mubr.msk.bf16.gmra.mrb[24].mxu0 %vm164_vm1, %v9592_v8  ;;  %v9648_v8 = vld [vmem:[%s11458_s0 + $0x50] sm:$0xff]  }
  0x77   :  { %8759 = vmatmul.mubr.msk.bf16.gmra.mrb[24].mxu1 %vm164_vm1, %v9593_v9  ;;  %8456 = vmatprep.mubr.msk.bf16.mxu0 %vm164_vm1, %v9594_v10  ;;  %v9649_v9 = vld [vmem:[%s11458_s0 + $0x200] sm:$0xff]   ;;  %v9650_v10 = vld [vmem:[%s11458_s0 + $0x58] sm:$0xff]  }
  0x78   :  { %8762 = vmatprep.mubr.msk.bf16.mxu1 %vm164_vm1, %v9595_v11  ;;  %v9651_v11 = vld [vmem:[%s11458_s0 + $0x208] sm:$0xff]  }
  0x7e   :  { %8457 = vmatmul.mubr.msk.bf16.gmra.mrb[28].mxu0 %vm164_vm1, %v9596_v12  ;;  %v9652_v12 = vld [vmem:[%s11458_s0 + $0x60] sm:$0xff]  }
  0x7f   :  { %8763 = vmatmul.mubr.msk.bf16.gmra.mrb[28].mxu1 %vm164_vm1, %v9597_v13  ;;  %8462 = vmatprep.mubr.msk.bf16.mxu0 %vm164_vm1, %v9598_v14  ;;  %v9653_v13 = vld [vmem:[%s11458_s0 + $0x210] sm:$0xff]   ;;  %v9654_v14 = vld [vmem:[%s11458_s0 + $0x68] sm:$0xff]  }
  0x80   :  { %8768 = vmatprep.mubr.msk.bf16.mxu1 %vm164_vm1, %v9599_v15  ;;  %v9655_v15 = vld [vmem:[%s11458_s0 + $0x218] sm:$0xff]  }
  0x86   :  { %8463 = vmatmul.mubr.msk.bf16.vlgmr.msra.gmra.mrb[0].mxu0 %vm164_vm1, %v9600_v16  ;;  %v9656_v16 = vld [vmem:[%s11458_s0 + $0x70] sm:$0xff]  }
  0x87   :  { %8769 = vmatmul.mubr.msk.bf16.vlgmr.msra.gmra.mrb[0].mxu1 %vm164_vm1, %v9601_v17  ;;  %8495 = vmatpush3.bf16.msra.mxu0 %v1192_v18  ;;  %v9657_v17 = vld [vmem:[%s11458_s0 + $0x220] sm:$0xff]   ;;  %v9658_v18 = vld [vmem:[%s11458_s0 + $0x78] sm:$0xff]  }
  0x88   :  { %8801 = vmatpush3.bf16.msra.mxu1 %v4612_v20  ;;  %8466 = vmatprep.mubr.msk.bf16.mxu0 %vm164_vm1, %v9602_v19  ;;  %v9659_v19 = vld [vmem:[%s11458_s0 + $0x228] sm:$0xff]   ;;  %v9660_v20 = vld [vmem:[%s11458_s0 + $0x80] sm:$0xff]  }
  0x89   :  { %8772 = vmatprep.mubr.msk.bf16.mxu1 %vm164_vm1, %v9603_v21  ;;  %9520 = vmatprep.subr.msk.bf16.mxu0 %vm213_vm0, %v10170_v22  ;;  %v9661_v21 = vld [vmem:[%s11458_s0 + $0x230] sm:$0xff]   ;;  %v9662_v22 = vld [vmem:[%s11458_s0 + $0x98] sm:$0xff]  }
  0x8a   :  { %9529 = vmatprep.subr.msk.bf16.mxu1 %vm213_vm0, %v10176_v23  ;;  %v9663_v23 = vld [vmem:[%s11458_s0 + $0x248] sm:$0xff]  }
  0x8e   :  { %8467 = vmatmul.mubr.msk.bf16.gmra.mrb[4].mxu0 %vm164_vm1, %v9604_v24  ;;  %v9664_v24 = vld [vmem:[%s11458_s0 + $0xa0] sm:$0xff]  }
  0x8f   :  { %8773 = vmatmul.mubr.msk.bf16.gmra.mrb[4].mxu1 %vm164_vm1, %v9605_v25  ;;  %8470 = vmatprep.mubr.msk.bf16.mxu0 %vm164_vm1, %v9606_v26  ;;  %v1908_v25 = vsel %vm213_vm0, %v10316_v58, 0  ;;  %v9665_v26 = vld [vmem:[%s11458_s0 + $0x250] sm:$0xff]  }
  0x90   :  { %8776 = vmatprep.mubr.msk.bf16.mxu1 %vm164_vm1, %v9607_v27  ;;  %v9666_v27 = vld [vmem:[%s11458_s0 + $0xa8] sm:$0xff]  }
  0x96   :  { %8471 = vmatmul.mubr.msk.bf16.gmra.mrb[8].mxu0 %vm164_vm1, %v9608_v28  ;;  %v5326_v28 = vsel %vm213_vm0, %v10322_v59, 0 }
  0x97   :  { %8777 = vmatmul.mubr.msk.bf16.gmra.mrb[8].mxu1 %vm164_vm1, %v9609_v29  ;;  %8474 = vmatprep.mubr.msk.bf16.mxu0 %vm164_vm1, %v9610_v30  ;;  %v9667_v29 = vld [vmem:[%s11458_s0 + $0x258] sm:$0xff]   ;;  %v10462_v30 = vld [vmem:[%s11457_s1 + $0xc] sm:$0x3] }
  0x98   :  { %8780 = vmatprep.mubr.msk.bf16.mxu1 %vm164_vm1, %v9611_v31  ;;  %v10468_v31 = vld [vmem:[%s11457_s1 + $0xc] sm:$0x3] }
  0x9e   :  { %8475 = vmatmul.mubr.msk.bf16.gmra.mrb[12].mxu0 %vm164_vm1, %v9612_v32  ;;  %v9668_v32 = vld [vmem:[%s11458_s0 + $0xb0] sm:$0xff]  }
  0x9f   :  { %8781 = vmatmul.mubr.msk.bf16.gmra.mrb[12].mxu1 %vm164_vm1, %v9613_v33  ;;  %8478 = vmatprep.mubr.msk.bf16.mxu0 %vm164_vm1, %v9614_v34  ;;  %v9669_v33 = vld [vmem:[%s11458_s0 + $0x260] sm:$0xff]   ;;  %v9670_v34 = vld [vmem:[%s11458_s0 + $0xb8] sm:$0xff]  }
  0xa0   :  { %8784 = vmatprep.mubr.msk.bf16.mxu1 %vm164_vm1, %v9615_v35  ;;  %v9671_v35 = vld [vmem:[%s11458_s0 + $0x268] sm:$0xff]  }
  0xa6   :  { %8479 = vmatmul.mubr.msk.bf16.gmra.mrb[16].mxu0 %vm164_vm1, %v9616_v36  ;;  %v9672_v36 = vld [vmem:[%s11458_s0 + $0xc0] sm:$0xff]  }
  0xa7   :  { %8785 = vmatmul.mubr.msk.bf16.gmra.mrb[16].mxu1 %vm164_vm1, %v9617_v37  ;;  %8482 = vmatprep.mubr.msk.bf16.mxu0 %vm164_vm1, %v9618_v38  ;;  %v9673_v37 = vld [vmem:[%s11458_s0 + $0x270] sm:$0xff]   ;;  %v9674_v38 = vld [vmem:[%s11458_s0 + $0xc8] sm:$0xff]  }
  0xa8   :  { %8788 = vmatprep.mubr.msk.bf16.mxu1 %vm164_vm1, %v9619_v39  ;;  %v9675_v39 = vld [vmem:[%s11458_s0 + $0x278] sm:$0xff]  }
  0xae   :  { %8483 = vmatmul.mubr.msk.bf16.gmra.mrb[20].mxu0 %vm164_vm1, %v9620_v40  ;;  %v9676_v40 = vld [vmem:[%s11458_s0 + $0xd0] sm:$0xff]  }
  0xaf   :  { %8789 = vmatmul.mubr.msk.bf16.gmra.mrb[20].mxu1 %vm164_vm1, %v9621_v41  ;;  %8486 = vmatprep.mubr.msk.bf16.mxu0 %vm164_vm1, %v9622_v42  ;;  %v9677_v41 = vld [vmem:[%s11458_s0 + $0x280] sm:$0xff]   ;;  %v9678_v42 = vld [vmem:[%s11458_s0 + $0xd8] sm:$0xff]  }
  0xb0   :  { %8792 = vmatprep.mubr.msk.bf16.mxu1 %vm164_vm1, %v9623_v43  ;;  %v9679_v43 = vld [vmem:[%s11458_s0 + $0x288] sm:$0xff]  }
  0xb6   :  { %8487 = vmatmul.mubr.msk.bf16.gmra.mrb[24].mxu0 %vm164_vm1, %v9624_v44  ;;  %v9680_v44 = vld [vmem:[%s11458_s0 + $0xe0] sm:$0xff]  }
  0xb7   :  { %8793 = vmatmul.mubr.msk.bf16.gmra.mrb[24].mxu1 %vm164_vm1, %v9625_v45  ;;  %8490 = vmatprep.mubr.msk.bf16.mxu0 %vm164_vm1, %v9626_v46  ;;  %v9681_v45 = vld [vmem:[%s11458_s0 + $0x290] sm:$0xff]   ;;  %v9682_v46 = vld [vmem:[%s11458_s0 + $0xe8] sm:$0xff]  }
  0xb8   :  { %8796 = vmatprep.mubr.msk.bf16.mxu1 %vm164_vm1, %v9627_v47  ;;  %v9683_v47 = vld [vmem:[%s11458_s0 + $0x298] sm:$0xff]  }
  0xbe   :  { %8491 = vmatmul.mubr.msk.bf16.gmra.mrb[28].mxu0 %vm164_vm1, %v9628_v48  ;;  %v9684_v48 = vld [vmem:[%s11458_s0 + $0xf0] sm:$0xff]  }
  0xbf   :  { %8797 = vmatmul.mubr.msk.bf16.gmra.mrb[28].mxu1 %vm164_vm1, %v9629_v49  ;;  %8496 = vmatprep.mubr.msk.bf16.mxu0 %vm164_vm1, %v9630_v50  ;;  %v9685_v49 = vld [vmem:[%s11458_s0 + $0x2a0] sm:$0xff]   ;;  %v9686_v50 = vld [vmem:[%s11458_s0 + $0xf8] sm:$0xff]  }
  0xc0   :  { %8802 = vmatprep.mubr.msk.bf16.mxu1 %vm164_vm1, %v9631_v51  ;;  %v9687_v51 = vld [vmem:[%s11458_s0 + $0x2a8] sm:$0xff]  }
  0xc6   :  { %8497 = vmatmul.mubr.msk.bf16.vlgmr.msra.gmra.mrb[0].mxu0 %vm164_vm1, %v9632_v52  ;;  %v9688_v52 = vld [vmem:[%s11458_s0 + $0x100] sm:$0xff]  }
  0xc7   :  { %8803 = vmatmul.mubr.msk.bf16.vlgmr.msra.gmra.mrb[0].mxu1 %vm164_vm1, %v9633_v54  ;;  %8529 = vmatpush3.bf16.msra.mxu0 %v1550_v53  ;;  %v9689_v53 = vld [vmem:[%s11458_s0 + $0x2b0] sm:$0xff]   ;;  %v9690_v54 = vld [vmem:[%s11458_s0 + $0x108] sm:$0xff]  }
  0xc8   :  { %8835 = vmatpush3.bf16.msra.mxu1 %v4969_v56  ;;  %8500 = vmatprep.mubr.msk.bf16.mxu0 %vm164_vm1, %v9634_v55  ;;  %v9691_v55 = vld [vmem:[%s11458_s0 + $0x2b8] sm:$0xff]   ;;  %v9692_v56 = vld [vmem:[%s11458_s0 + $0x110] sm:$0xff]  }
  0xc9   :  { %8806 = vmatprep.mubr.msk.bf16.mxu1 %vm164_vm1, %v9635_v57  ;;  %9521 = vmatprep.subr.msk.bf16.mxu0 %vm213_vm0, %v10316_v58  ;;  %v9693_v57 = vld [vmem:[%s11458_s0 + $0x2c0] sm:$0xff]   ;;  %v9694_v58 = vld [vmem:[%s11458_s0 + $0x128] sm:$0xff]  }
  0xca   :  { %9530 = vmatprep.subr.msk.bf16.mxu1 %vm213_vm0, %v10322_v59  ;;  %v9695_v59 = vld [vmem:[%s11458_s0 + $0x2d8] sm:$0xff]  }
  0xce   :  { %8501 = vmatmul.mubr.msk.bf16.gmra.mrb[4].mxu0 %vm164_vm1, %v9636_v60  ;;  %v9696_v60 = vld [vmem:[%s11458_s0 + $0x130] sm:$0xff]  }
  0xcf   :  { %8807 = vmatmul.mubr.msk.bf16.gmra.mrb[4].mxu1 %vm164_vm1, %v9637_v61  ;;  %8504 = vmatprep.mubr.msk.bf16.mxu0 %vm164_vm1, %v9638_v62  ;;  %v9697_v61 = vld [vmem:[%s11458_s0 + $0x2e0] sm:$0xff]   ;;  %v2266_v62 = vsel %vm213_vm0, %v10462_v30, 0 }
  0xd0   :  { %8810 = vmatprep.mubr.msk.bf16.mxu1 %vm164_vm1, %v9639_v63  ;;  %v9698_v63 = vld [vmem:[%s11458_s0 + $0x138] sm:$0xff]  }
  0xd6   :  { %8505 = vmatmul.mubr.msk.bf16.gmra.mrb[8].mxu0 %vm164_vm1, %v9640_v0  ;;  %v5683_v0 = vsel %vm213_vm0, %v10468_v31, 0 }
  0xd7   :  { %8811 = vmatmul.mubr.msk.bf16.gmra.mrb[8].mxu1 %vm164_vm1, %v9641_v1  ;;  %8508 = vmatprep.mubr.msk.bf16.mxu0 %vm164_vm1, %v9642_v2  ;;  %v9699_v1 = vld [vmem:[%s11458_s0 + $0x2e8] sm:$0xff]  }
  0xd8   :  { %8814 = vmatprep.mubr.msk.bf16.mxu1 %vm164_vm1, %v9643_v3  ;;  %v10608_v2 = vld [vmem:[%s11457_s1 + $0xe] sm:$0x3] }
  0xd9   :  { %v10614_v3 = vld [vmem:[%s11457_s1 + $0xe] sm:$0x3] }
  0xde   :  { %8509 = vmatmul.mubr.msk.bf16.gmra.mrb[12].mxu0 %vm164_vm1, %v9644_v4  ;;  %v9700_v4 = vld [vmem:[%s11458_s0 + $0x140] sm:$0xff]  }
  0xdf   :  { %8815 = vmatmul.mubr.msk.bf16.gmra.mrb[12].mxu1 %vm164_vm1, %v9645_v5  ;;  %8512 = vmatprep.mubr.msk.bf16.mxu0 %vm164_vm1, %v9646_v6  ;;  %v9701_v5 = vld [vmem:[%s11458_s0 + $0x2f0] sm:$0xff]   ;;  %v9702_v6 = vld [vmem:[%s11458_s0 + $0x148] sm:$0xff]  }
  0xe0   :  { %8818 = vmatprep.mubr.msk.bf16.mxu1 %vm164_vm1, %v9647_v7  ;;  %v9703_v7 = vld [vmem:[%s11458_s0 + $0x2f8] sm:$0xff]  }
  0xe6   :  { %8513 = vmatmul.mubr.msk.bf16.gmra.mrb[16].mxu0 %vm164_vm1, %v9648_v8  ;;  %v9704_v8 = vld [vmem:[%s11458_s0 + $0x150] sm:$0xff]  }
  0xe7   :  { %8819 = vmatmul.mubr.msk.bf16.gmra.mrb[16].mxu1 %vm164_vm1, %v9649_v9  ;;  %8516 = vmatprep.mubr.msk.bf16.mxu0 %vm164_vm1, %v9650_v10  ;;  %v9705_v9 = vld [vmem:[%s11458_s0 + $0x300] sm:$0xff]   ;;  %v9706_v10 = vld [vmem:[%s11458_s0 + $0x158] sm:$0xff]  }
  0xe8   :  { %8822 = vmatprep.mubr.msk.bf16.mxu1 %vm164_vm1, %v9651_v11  ;;  %v9707_v11 = vld [vmem:[%s11458_s0 + $0x308] sm:$0xff]  }
  0xee   :  { %8517 = vmatmul.mubr.msk.bf16.gmra.mrb[20].mxu0 %vm164_vm1, %v9652_v12  ;;  %v9708_v12 = vld [vmem:[%s11458_s0 + $0x160] sm:$0xff]  }
  0xef   :  { %8823 = vmatmul.mubr.msk.bf16.gmra.mrb[20].mxu1 %vm164_vm1, %v9653_v13  ;;  %8520 = vmatprep.mubr.msk.bf16.mxu0 %vm164_vm1, %v9654_v14  ;;  %v9709_v13 = vld [vmem:[%s11458_s0 + $0x310] sm:$0xff]   ;;  %v9710_v14 = vld [vmem:[%s11458_s0 + $0x168] sm:$0xff]  }
  0xf0   :  { %8826 = vmatprep.mubr.msk.bf16.mxu1 %vm164_vm1, %v9655_v15  ;;  %v9711_v15 = vld [vmem:[%s11458_s0 + $0x318] sm:$0xff]  }
  0xf6   :  { %8521 = vmatmul.mubr.msk.bf16.gmra.mrb[24].mxu0 %vm164_vm1, %v9656_v16  ;;  %v9712_v16 = vld [vmem:[%s11458_s0 + $0x170] sm:$0xff]  }
  0xf7   :  { %8827 = vmatmul.mubr.msk.bf16.gmra.mrb[24].mxu1 %vm164_vm1, %v9657_v17  ;;  %8524 = vmatprep.mubr.msk.bf16.mxu0 %vm164_vm1, %v9658_v18  ;;  %v9713_v17 = vld [vmem:[%s11458_s0 + $0x320] sm:$0xff]   ;;  %v9714_v18 = vld [vmem:[%s11458_s0 + $0x178] sm:$0xff]  }
  0xf8   :  { %8830 = vmatprep.mubr.msk.bf16.mxu1 %vm164_vm1, %v9659_v19  ;;  %v9715_v19 = vld [vmem:[%s11458_s0 + $0x328] sm:$0xff]  }
  0xfe   :  { %8525 = vmatmul.mubr.msk.bf16.gmra.mrb[28].mxu0 %vm164_vm1, %v9660_v20  ;;  %v9716_v20 = vld [vmem:[%s11458_s0 + $0x180] sm:$0xff]  }
  0xff   :  { %8831 = vmatmul.mubr.msk.bf16.gmra.mrb[28].mxu1 %vm164_vm1, %v9661_v21  ;;  %8530 = vmatprep.mubr.msk.bf16.mxu0 %vm164_vm1, %v9662_v22  ;;  %v9717_v21 = vld [vmem:[%s11458_s0 + $0x330] sm:$0xff]   ;;  %v9718_v22 = vld [vmem:[%s11458_s0 + $0x188] sm:$0xff]  }
 0x100   :  { %8836 = vmatprep.mubr.msk.bf16.mxu1 %vm164_vm1, %v9663_v23  ;;  %v9719_v23 = vld [vmem:[%s11458_s0 + $0x338] sm:$0xff]  }
 0x106   :  { %8531 = vmatmul.mubr.msk.bf16.vlgmr.msra.gmra.mrb[0].mxu0 %vm164_vm1, %v9664_v24  ;;  %v9720_v24 = vld [vmem:[%s11458_s0 + $0x190] sm:$0xff]  }
 0x107   :  { %8837 = vmatmul.mubr.msk.bf16.vlgmr.msra.gmra.mrb[0].mxu1 %vm164_vm1, %v9665_v26  ;;  %8563 = vmatpush3.bf16.msra.mxu0 %v1908_v25  ;;  %v9721_v25 = vld [vmem:[%s11458_s0 + $0x340] sm:$0xff]   ;;  %v9722_v26 = vld [vmem:[%s11458_s0 + $0x198] sm:$0xff]  }
 0x108   :  { %8869 = vmatpush3.bf16.msra.mxu1 %v5326_v28  ;;  %8534 = vmatprep.mubr.msk.bf16.mxu0 %vm164_vm1, %v9666_v27  ;;  %v9723_v27 = vld [vmem:[%s11458_s0 + $0x348] sm:$0xff]   ;;  %v9724_v28 = vld [vmem:[%s11458_s0 + $0x1a0] sm:$0xff]  }
 0x109   :  { %8840 = vmatprep.mubr.msk.bf16.mxu1 %vm164_vm1, %v9667_v29  ;;  %9522 = vmatprep.subr.msk.bf16.mxu0 %vm213_vm0, %v10462_v30  ;;  %v9725_v29 = vld [vmem:[%s11458_s0 + $0x350] sm:$0xff]  }
 0x10a   :  { %9531 = vmatprep.subr.msk.bf16.mxu1 %vm213_vm0, %v10468_v31  ;;  %v9726_v30 = vld [vmem:[%s11458_s0 + $0x10] sm:$0xff]   ;;  %v9727_v31 = vld [vmem:[%s11458_s0 + $0x1c0] sm:$0xff]  }
 0x10e   :  { %8535 = vmatmul.mubr.msk.bf16.gmra.mrb[4].mxu0 %vm164_vm1, %v9668_v32  ;;  %v9728_v32 = vld [vmem:[%s11458_s0 + $0x18] sm:$0xff]  }
 0x10f   :  { %8841 = vmatmul.mubr.msk.bf16.gmra.mrb[4].mxu1 %vm164_vm1, %v9669_v33  ;;  %8538 = vmatprep.mubr.msk.bf16.mxu0 %vm164_vm1, %v9670_v34  ;;  %v9729_v33 = vld [vmem:[%s11458_s0 + $0x1c8] sm:$0xff]   ;;  %v2624_v34 = vsel %vm213_vm0, %v10608_v2, 0 }
 0x110   :  { %8844 = vmatprep.mubr.msk.bf16.mxu1 %vm164_vm1, %v9671_v35  ;;  %v9730_v35 = vld [vmem:[%s11458_s0 + $0x20] sm:$0xff]  }
 0x116   :  { %8539 = vmatmul.mubr.msk.bf16.gmra.mrb[8].mxu0 %vm164_vm1, %v9672_v36  ;;  %v6040_v36 = vsel %vm213_vm0, %v10614_v3, 0 }
 0x117   :  { %8845 = vmatmul.mubr.msk.bf16.gmra.mrb[8].mxu1 %vm164_vm1, %v9673_v37  ;;  %8542 = vmatprep.mubr.msk.bf16.mxu0 %vm164_vm1, %v9674_v38  ;;  %v9731_v37 = vld [vmem:[%s11458_s0 + $0x1d0] sm:$0xff]  }
 0x118   :  { %8848 = vmatprep.mubr.msk.bf16.mxu1 %vm164_vm1, %v9675_v39  ;;  %v10754_v38 = vld [vmem:[%s11457_s1 + $0x10] sm:$0x3] }
 0x119   :  { %v10760_v39 = vld [vmem:[%s11457_s1 + $0x10] sm:$0x3] }
 0x11e   :  { %8543 = vmatmul.mubr.msk.bf16.gmra.mrb[12].mxu0 %vm164_vm1, %v9676_v40  ;;  %v9732_v40 = vld [vmem:[%s11458_s0 + $0x28] sm:$0xff]  }
 0x11f   :  { %8849 = vmatmul.mubr.msk.bf16.gmra.mrb[12].mxu1 %vm164_vm1, %v9677_v41  ;;  %8546 = vmatprep.mubr.msk.bf16.mxu0 %vm164_vm1, %v9678_v42  ;;  %v9733_v41 = vld [vmem:[%s11458_s0 + $0x1d8] sm:$0xff]   ;;  %v9734_v42 = vld [vmem:[%s11458_s0 + $0x30] sm:$0xff]  }
 0x120   :  { %8852 = vmatprep.mubr.msk.bf16.mxu1 %vm164_vm1, %v9679_v43  ;;  %v9735_v43 = vld [vmem:[%s11458_s0 + $0x1e0] sm:$0xff]  }
 0x126   :  { %8547 = vmatmul.mubr.msk.bf16.gmra.mrb[16].mxu0 %vm164_vm1, %v9680_v44  ;;  %v9736_v44 = vld [vmem:[%s11458_s0 + $0x38] sm:$0xff]  }
 0x127   :  { %8853 = vmatmul.mubr.msk.bf16.gmra.mrb[16].mxu1 %vm164_vm1, %v9681_v45  ;;  %8550 = vmatprep.mubr.msk.bf16.mxu0 %vm164_vm1, %v9682_v46  ;;  %v9737_v45 = vld [vmem:[%s11458_s0 + $0x1e8] sm:$0xff]   ;;  %v9738_v46 = vld [vmem:[%s11458_s0 + $0x40] sm:$0xff]  }
 0x128   :  { %8856 = vmatprep.mubr.msk.bf16.mxu1 %vm164_vm1, %v9683_v47  ;;  %v9739_v47 = vld [vmem:[%s11458_s0 + $0x1f0] sm:$0xff]  }
 0x12e   :  { %8551 = vmatmul.mubr.msk.bf16.gmra.mrb[20].mxu0 %vm164_vm1, %v9684_v48  ;;  %v9740_v48 = vld [vmem:[%s11458_s0 + $0x48] sm:$0xff]  }
 0x12f   :  { %8857 = vmatmul.mubr.msk.bf16.gmra.mrb[20].mxu1 %vm164_vm1, %v9685_v49  ;;  %8554 = vmatprep.mubr.msk.bf16.mxu0 %vm164_vm1, %v9686_v50  ;;  %v9741_v49 = vld [vmem:[%s11458_s0 + $0x1f8] sm:$0xff]   ;;  %v9742_v50 = vld [vmem:[%s11458_s0 + $0x50] sm:$0xff]  }
 0x130   :  { %8860 = vmatprep.mubr.msk.bf16.mxu1 %vm164_vm1, %v9687_v51  ;;  %v9743_v51 = vld [vmem:[%s11458_s0 + $0x200] sm:$0xff]  }
 0x136   :  { %8555 = vmatmul.mubr.msk.bf16.gmra.mrb[24].mxu0 %vm164_vm1, %v9688_v52  ;;  %v9744_v52 = vld [vmem:[%s11458_s0 + $0x58] sm:$0xff]  }
 0x137   :  { %8861 = vmatmul.mubr.msk.bf16.gmra.mrb[24].mxu1 %vm164_vm1, %v9689_v53  ;;  %8558 = vmatprep.mubr.msk.bf16.mxu0 %vm164_vm1, %v9690_v54  ;;  %v9745_v53 = vld [vmem:[%s11458_s0 + $0x208] sm:$0xff]   ;;  %v9746_v54 = vld [vmem:[%s11458_s0 + $0x60] sm:$0xff]  }
 0x138   :  { %8864 = vmatprep.mubr.msk.bf16.mxu1 %vm164_vm1, %v9691_v55  ;;  %v9747_v55 = vld [vmem:[%s11458_s0 + $0x210] sm:$0xff]  }
 0x13e   :  { %8559 = vmatmul.mubr.msk.bf16.gmra.mrb[28].mxu0 %vm164_vm1, %v9692_v56  ;;  %v9748_v56 = vld [vmem:[%s11458_s0 + $0x68] sm:$0xff]  }
 0x13f   :  { %8865 = vmatmul.mubr.msk.bf16.gmra.mrb[28].mxu1 %vm164_vm1, %v9693_v57  ;;  %8564 = vmatprep.mubr.msk.bf16.mxu0 %vm164_vm1, %v9694_v58  ;;  %v9749_v57 = vld [vmem:[%s11458_s0 + $0x218] sm:$0xff]   ;;  %v9750_v58 = vld [vmem:[%s11458_s0 + $0x70] sm:$0xff]  }
 0x140   :  { %8870 = vmatprep.mubr.msk.bf16.mxu1 %vm164_vm1, %v9695_v59  ;;  %v9751_v59 = vld [vmem:[%s11458_s0 + $0x220] sm:$0xff]  }
 0x146   :  { %8565 = vmatmul.mubr.msk.bf16.vlgmr.msra.gmra.mrb[0].mxu0 %vm164_vm1, %v9696_v60  ;;  %v9752_v60 = vld [vmem:[%s11458_s0 + $0x78] sm:$0xff]  }
 0x147   :  { %8871 = vmatmul.mubr.msk.bf16.vlgmr.msra.gmra.mrb[0].mxu1 %vm164_vm1, %v9697_v61  ;;  %8597 = vmatpush3.bf16.msra.mxu0 %v2266_v62  ;;  %v9753_v61 = vld [vmem:[%s11458_s0 + $0x228] sm:$0xff]   ;;  %v9754_v62 = vld [vmem:[%s11458_s0 + $0x80] sm:$0xff]  }
 0x148   :  { %8903 = vmatpush3.bf16.msra.mxu1 %v5683_v0  ;;  %8568 = vmatprep.mubr.msk.bf16.mxu0 %vm164_vm1, %v9698_v63  ;;  %v9755_v63 = vld [vmem:[%s11458_s0 + $0x230] sm:$0xff]   ;;  %v9756_v0 = vld [vmem:[%s11458_s0 + $0x88] sm:$0xff]  }
 0x149   :  { %8874 = vmatprep.mubr.msk.bf16.mxu1 %vm164_vm1, %v9699_v1  ;;  %9523 = vmatprep.subr.msk.bf16.mxu0 %vm213_vm0, %v10608_v2  ;;  %v9757_v1 = vld [vmem:[%s11458_s0 + $0x238] sm:$0xff]   ;;  %v9758_v2 = vld [vmem:[%s11458_s0 + $0xa0] sm:$0xff]  }
 0x14a   :  { %9532 = vmatprep.subr.msk.bf16.mxu1 %vm213_vm0, %v10614_v3  ;;  %v9759_v3 = vld [vmem:[%s11458_s0 + $0x250] sm:$0xff]  }
 0x14e   :  { %8569 = vmatmul.mubr.msk.bf16.gmra.mrb[4].mxu0 %vm164_vm1, %v9700_v4  ;;  %v9760_v4 = vld [vmem:[%s11458_s0 + $0xa8] sm:$0xff]  }
 0x14f   :  { %8875 = vmatmul.mubr.msk.bf16.gmra.mrb[4].mxu1 %vm164_vm1, %v9701_v5  ;;  %8572 = vmatprep.mubr.msk.bf16.mxu0 %vm164_vm1, %v9702_v6  ;;  %v9761_v5 = vld [vmem:[%s11458_s0 + $0x258] sm:$0xff]   ;;  %v2982_v6 = vsel %vm213_vm0, %v10754_v38, 0 }
 0x150   :  { %8878 = vmatprep.mubr.msk.bf16.mxu1 %vm164_vm1, %v9703_v7  ;;  %v9762_v7 = vld [vmem:[%s11458_s0 + $0xb0] sm:$0xff]  }
 0x156   :  { %8573 = vmatmul.mubr.msk.bf16.gmra.mrb[8].mxu0 %vm164_vm1, %v9704_v8  ;;  %v6397_v8 = vsel %vm213_vm0, %v10760_v39, 0 }
 0x157   :  { %8879 = vmatmul.mubr.msk.bf16.gmra.mrb[8].mxu1 %vm164_vm1, %v9705_v9  ;;  %8576 = vmatprep.mubr.msk.bf16.mxu0 %vm164_vm1, %v9706_v10  ;;  %v9763_v9 = vld [vmem:[%s11458_s0 + $0x260] sm:$0xff]   ;;  %v9764_v10 = vld [vmem:[%s11458_s0 + $0xb8] sm:$0xff]  }
 0x158   :  { %8882 = vmatprep.mubr.msk.bf16.mxu1 %vm164_vm1, %v9707_v11  ;;  %v9765_v11 = vld [vmem:[%s11458_s0 + $0x268] sm:$0xff]  }
 0x15e   :  { %8577 = vmatmul.mubr.msk.bf16.gmra.mrb[12].mxu0 %vm164_vm1, %v9708_v12  ;;  %v9766_v12 = vld [vmem:[%s11458_s0 + $0xc0] sm:$0xff]  }
 0x15f   :  { %8883 = vmatmul.mubr.msk.bf16.gmra.mrb[12].mxu1 %vm164_vm1, %v9709_v13  ;;  %8580 = vmatprep.mubr.msk.bf16.mxu0 %vm164_vm1, %v9710_v14  ;;  %v9767_v13 = vld [vmem:[%s11458_s0 + $0x270] sm:$0xff]   ;;  %v9768_v14 = vld [vmem:[%s11458_s0 + $0xc8] sm:$0xff]  }
 0x160   :  { %8886 = vmatprep.mubr.msk.bf16.mxu1 %vm164_vm1, %v9711_v15  ;;  %v9769_v15 = vld [vmem:[%s11458_s0 + $0x278] sm:$0xff]  }
 0x166   :  { %8581 = vmatmul.mubr.msk.bf16.gmra.mrb[16].mxu0 %vm164_vm1, %v9712_v16  ;;  %v9770_v16 = vld [vmem:[%s11458_s0 + $0xd0] sm:$0xff]  }
 0x167   :  { %8887 = vmatmul.mubr.msk.bf16.gmra.mrb[16].mxu1 %vm164_vm1, %v9713_v17  ;;  %8584 = vmatprep.mubr.msk.bf16.mxu0 %vm164_vm1, %v9714_v18  ;;  %v9771_v17 = vld [vmem:[%s11458_s0 + $0x280] sm:$0xff]   ;;  %v9772_v18 = vld [vmem:[%s11458_s0 + $0xd8] sm:$0xff]  }
 0x168   :  { %8890 = vmatprep.mubr.msk.bf16.mxu1 %vm164_vm1, %v9715_v19  ;;  %v9773_v19 = vld [vmem:[%s11458_s0 + $0x288] sm:$0xff]  }
 0x16e   :  { %8585 = vmatmul.mubr.msk.bf16.gmra.mrb[20].mxu0 %vm164_vm1, %v9716_v20  ;;  %v9774_v20 = vld [vmem:[%s11458_s0 + $0xe0] sm:$0xff]  }
 0x16f   :  { %8891 = vmatmul.mubr.msk.bf16.gmra.mrb[20].mxu1 %vm164_vm1, %v9717_v21  ;;  %8588 = vmatprep.mubr.msk.bf16.mxu0 %vm164_vm1, %v9718_v22  ;;  %v9775_v21 = vld [vmem:[%s11458_s0 + $0x290] sm:$0xff]   ;;  %v9776_v22 = vld [vmem:[%s11458_s0 + $0xe8] sm:$0xff]  }
 0x170   :  { %8894 = vmatprep.mubr.msk.bf16.mxu1 %vm164_vm1, %v9719_v23  ;;  %v9777_v23 = vld [vmem:[%s11458_s0 + $0x298] sm:$0xff]  }
 0x176   :  { %8589 = vmatmul.mubr.msk.bf16.gmra.mrb[24].mxu0 %vm164_vm1, %v9720_v24  ;;  %v9778_v24 = vld [vmem:[%s11458_s0 + $0xf0] sm:$0xff]  }
 0x177   :  { %8895 = vmatmul.mubr.msk.bf16.gmra.mrb[24].mxu1 %vm164_vm1, %v9721_v25  ;;  %8592 = vmatprep.mubr.msk.bf16.mxu0 %vm164_vm1, %v9722_v26  ;;  %v9779_v25 = vld [vmem:[%s11458_s0 + $0x2a0] sm:$0xff]   ;;  %v9780_v26 = vld [vmem:[%s11458_s0 + $0xf8] sm:$0xff]  }
 0x178   :  { %8898 = vmatprep.mubr.msk.bf16.mxu1 %vm164_vm1, %v9723_v27  ;;  %v9781_v27 = vld [vmem:[%s11458_s0 + $0x2a8] sm:$0xff]  }
 0x17e   :  { %8593 = vmatmul.mubr.msk.bf16.gmra.mrb[28].mxu0 %vm164_vm1, %v9724_v28  ;;  %v9782_v28 = vld [vmem:[%s11458_s0 + $0x100] sm:$0xff]  }
 0x17f   :  { %8899 = vmatmul.mubr.msk.bf16.gmra.mrb[28].mxu1 %vm164_vm1, %v9725_v29  ;;  %8598 = vmatprep.mubr.msk.bf16.mxu0 %vm164_vm1, %v9726_v30  ;;  %v9783_v29 = vld [vmem:[%s11458_s0 + $0x2b0] sm:$0xff]   ;;  %v9784_v30 = vld [vmem:[%s11458_s0 + $0x108] sm:$0xff]  }
 0x180   :  { %8904 = vmatprep.mubr.msk.bf16.mxu1 %vm164_vm1, %v9727_v31  ;;  %v9785_v31 = vld [vmem:[%s11458_s0 + $0x2b8] sm:$0xff]  }
 0x186   :  { %8599 = vmatmul.mubr.msk.bf16.vlgmr.msra.gmra.mrb[0].mxu0 %vm164_vm1, %v9728_v32  ;;  %v9786_v32 = vld [vmem:[%s11458_s0 + $0x110] sm:$0xff]  }
 0x187   :  { %8905 = vmatmul.mubr.msk.bf16.vlgmr.msra.gmra.mrb[0].mxu1 %vm164_vm1, %v9729_v33  ;;  %8631 = vmatpush3.bf16.msra.mxu0 %v2624_v34  ;;  %v9787_v33 = vld [vmem:[%s11458_s0 + $0x2c0] sm:$0xff]   ;;  %v9788_v34 = vld [vmem:[%s11458_s0 + $0x118] sm:$0xff]  }
 0x188   :  { %8937 = vmatpush3.bf16.msra.mxu1 %v6040_v36  ;;  %8602 = vmatprep.mubr.msk.bf16.mxu0 %vm164_vm1, %v9730_v35  ;;  %v9789_v35 = vld [vmem:[%s11458_s0 + $0x2c8] sm:$0xff]   ;;  %v9790_v36 = vld [vmem:[%s11458_s0 + $0x130] sm:$0xff]  }
 0x189   :  { %8908 = vmatprep.mubr.msk.bf16.mxu1 %vm164_vm1, %v9731_v37  ;;  %9524 = vmatprep.subr.msk.bf16.mxu0 %vm213_vm0, %v10754_v38  ;;  %v9791_v37 = vld [vmem:[%s11458_s0 + $0x2e0] sm:$0xff]   ;;  %v9792_v38 = vld [vmem:[%s11458_s0 + $0x138] sm:$0xff]  }
 0x18a   :  { %9533 = vmatprep.subr.msk.bf16.mxu1 %vm213_vm0, %v10760_v39  ;;  %v9793_v39 = vld [vmem:[%s11458_s0 + $0x2e8] sm:$0xff]  }
 0x18e   :  { %8603 = vmatmul.mubr.msk.bf16.gmra.mrb[4].mxu0 %vm164_vm1, %v9732_v40  ;;  %v9794_v40 = vld [vmem:[%s11458_s0 + $0x140] sm:$0xff]  }
 0x18f   :  { %8909 = vmatmul.mubr.msk.bf16.gmra.mrb[4].mxu1 %vm164_vm1, %v9733_v41  ;;  %8606 = vmatprep.mubr.msk.bf16.mxu0 %vm164_vm1, %v9734_v42  ;;  %v9795_v41 = vld [vmem:[%s11458_s0 + $0x2f0] sm:$0xff]   ;;  %v9796_v42 = vld [vmem:[%s11458_s0 + $0x148] sm:$0xff]  }
 0x190   :  { %8912 = vmatprep.mubr.msk.bf16.mxu1 %vm164_vm1, %v9735_v43  ;;  %v9797_v43 = vld [vmem:[%s11458_s0 + $0x2f8] sm:$0xff]  }
 0x196   :  { %8607 = vmatmul.mubr.msk.bf16.gmra.mrb[8].mxu0 %vm164_vm1, %v9736_v44  ;;  %v9798_v44 = vld [vmem:[%s11458_s0 + $0x150] sm:$0xff]  }
 0x197   :  { %8913 = vmatmul.mubr.msk.bf16.gmra.mrb[8].mxu1 %vm164_vm1, %v9737_v45  ;;  %8610 = vmatprep.mubr.msk.bf16.mxu0 %vm164_vm1, %v9738_v46  ;;  %v9799_v45 = vld [vmem:[%s11458_s0 + $0x300] sm:$0xff]   ;;  %v9800_v46 = vld [vmem:[%s11458_s0 + $0x158] sm:$0xff]  }
 0x198   :  { %8916 = vmatprep.mubr.msk.bf16.mxu1 %vm164_vm1, %v9739_v47  ;;  %v9801_v47 = vld [vmem:[%s11458_s0 + $0x308] sm:$0xff]  }
 0x19e   :  { %8611 = vmatmul.mubr.msk.bf16.gmra.mrb[12].mxu0 %vm164_vm1, %v9740_v48  ;;  %v9802_v48 = vld [vmem:[%s11458_s0 + $0x160] sm:$0xff]  }
 0x19f   :  { %8917 = vmatmul.mubr.msk.bf16.gmra.mrb[12].mxu1 %vm164_vm1, %v9741_v49  ;;  %8614 = vmatprep.mubr.msk.bf16.mxu0 %vm164_vm1, %v9742_v50  ;;  %v9803_v49 = vld [vmem:[%s11458_s0 + $0x310] sm:$0xff]   ;;  %v9804_v50 = vld [vmem:[%s11458_s0 + $0x168] sm:$0xff]  }
 0x1a0   :  { %8920 = vmatprep.mubr.msk.bf16.mxu1 %vm164_vm1, %v9743_v51  ;;  %v9805_v51 = vld [vmem:[%s11458_s0 + $0x318] sm:$0xff]  }
 0x1a6   :  { %8615 = vmatmul.mubr.msk.bf16.gmra.mrb[16].mxu0 %vm164_vm1, %v9744_v52  ;;  %v9806_v52 = vld [vmem:[%s11458_s0 + $0x170] sm:$0xff]  }
 0x1a7   :  { %8921 = vmatmul.mubr.msk.bf16.gmra.mrb[16].mxu1 %vm164_vm1, %v9745_v53  ;;  %8618 = vmatprep.mubr.msk.bf16.mxu0 %vm164_vm1, %v9746_v54  ;;  %v9807_v53 = vld [vmem:[%s11458_s0 + $0x320] sm:$0xff]   ;;  %v9808_v54 = vld [vmem:[%s11458_s0 + $0x178] sm:$0xff]  }
 0x1a8   :  { %8924 = vmatprep.mubr.msk.bf16.mxu1 %vm164_vm1, %v9747_v55  ;;  %v9809_v55 = vld [vmem:[%s11458_s0 + $0x328] sm:$0xff]  }
 0x1ae   :  { %8619 = vmatmul.mubr.msk.bf16.gmra.mrb[20].mxu0 %vm164_vm1, %v9748_v56  ;;  %v9810_v56 = vld [vmem:[%s11458_s0 + $0x180] sm:$0xff]  }
 0x1af   :  { %8925 = vmatmul.mubr.msk.bf16.gmra.mrb[20].mxu1 %vm164_vm1, %v9749_v57  ;;  %8622 = vmatprep.mubr.msk.bf16.mxu0 %vm164_vm1, %v9750_v58  ;;  %v9811_v57 = vld [vmem:[%s11458_s0 + $0x330] sm:$0xff]   ;;  %v9812_v58 = vld [vmem:[%s11458_s0 + $0x188] sm:$0xff]  }
 0x1b0   :  { %8928 = vmatprep.mubr.msk.bf16.mxu1 %vm164_vm1, %v9751_v59  ;;  %v9813_v59 = vld [vmem:[%s11458_s0 + $0x338] sm:$0xff]  }
 0x1b6   :  { %8623 = vmatmul.mubr.msk.bf16.gmra.mrb[24].mxu0 %vm164_vm1, %v9752_v60  ;;  %v9814_v60 = vld [vmem:[%s11458_s0 + $0x190] sm:$0xff]  }
 0x1b7   :  { %8929 = vmatmul.mubr.msk.bf16.gmra.mrb[24].mxu1 %vm164_vm1, %v9753_v61  ;;  %8626 = vmatprep.mubr.msk.bf16.mxu0 %vm164_vm1, %v9754_v62  ;;  %v9815_v61 = vld [vmem:[%s11458_s0 + $0x340] sm:$0xff]   ;;  %v9816_v62 = vld [vmem:[%s11458_s0 + $0x198] sm:$0xff]  }
 0x1b8   :  { %8932 = vmatprep.mubr.msk.bf16.mxu1 %vm164_vm1, %v9755_v63  ;;  %v9817_v63 = vld [vmem:[%s11458_s0 + $0x348] sm:$0xff]  }
 0x1be   :  { %8627 = vmatmul.mubr.msk.bf16.gmra.mrb[28].mxu0 %vm164_vm1, %v9756_v0  ;;  %v9818_v0 = vld [vmem:[%s11458_s0 + $0x1a0] sm:$0xff]  }
 0x1bf   :  { %8933 = vmatmul.mubr.msk.bf16.gmra.mrb[28].mxu1 %vm164_vm1, %v9757_v1  ;;  %8632 = vmatprep.mubr.msk.bf16.mxu0 %vm164_vm1, %v9758_v2  ;;  %v9819_v1 = vld [vmem:[%s11458_s0 + $0x350] sm:$0xff]   ;;  %v9820_v2 = vld [vmem:[%s11458_s0 + $0x1a8] sm:$0xff]  }
 0x1c0   :  { %8938 = vmatprep.mubr.msk.bf16.mxu1 %vm164_vm1, %v9759_v3  ;;  %v9821_v3 = vld [vmem:[%s11458_s0 + $0x358] sm:$0xff]  }
 0x1c6   :  { %8633 = vmatmul.mubr.msk.bf16.vlgmr.msra.gmra.mrb[0].mxu0 %vm164_vm1, %v9760_v4  ;;  %v11135_v4 = vld [vmem:[%s11459_s2] ss:$0 sm:$0xff] }
 0x1c7   :  { %8939 = vmatmul.mubr.msk.bf16.vlgmr.msra.gmra.mrb[0].mxu1 %vm164_vm1, %v9761_v5  ;;  %8665 = vmatpush3.bf16.msra.mxu0 %v2982_v6 }
 0x1c8   :  { %8971 = vmatpush3.bf16.msra.mxu1 %v6397_v8  ;;  %8636 = vmatprep.mubr.msk.bf16.mxu0 %vm164_vm1, %v9762_v7 }
 0x1c9   :  { %8942 = vmatprep.mubr.msk.bf16.mxu1 %vm164_vm1, %v9763_v9 }
 0x1ce   :  { %8637 = vmatmul.mubr.msk.bf16.gmra.mrb[4].mxu0 %vm164_vm1, %v9764_v10 }
 0x1cf   :  { %8943 = vmatmul.mubr.msk.bf16.gmra.mrb[4].mxu1 %vm164_vm1, %v9765_v11  ;;  %8640 = vmatprep.mubr.msk.bf16.mxu0 %vm164_vm1, %v9766_v12 }
 0x1d0   :  { %8946 = vmatprep.mubr.msk.bf16.mxu1 %vm164_vm1, %v9767_v13 }
 0x1d6   :  { %8641 = vmatmul.mubr.msk.bf16.gmra.mrb[8].mxu0 %vm164_vm1, %v9768_v14 }
 0x1d7   :  { %8947 = vmatmul.mubr.msk.bf16.gmra.mrb[8].mxu1 %vm164_vm1, %v9769_v15  ;;  %8644 = vmatprep.mubr.msk.bf16.mxu0 %vm164_vm1, %v9770_v16 }
 0x1d8   :  { %8950 = vmatprep.mubr.msk.bf16.mxu1 %vm164_vm1, %v9771_v17 }
 0x1de   :  { %8645 = vmatmul.mubr.msk.bf16.gmra.mrb[12].mxu0 %vm164_vm1, %v9772_v18 }
 0x1df   :  { %8951 = vmatmul.mubr.msk.bf16.gmra.mrb[12].mxu1 %vm164_vm1, %v9773_v19  ;;  %8648 = vmatprep.mubr.msk.bf16.mxu0 %vm164_vm1, %v9774_v20 }
 0x1e0   :  { %8954 = vmatprep.mubr.msk.bf16.mxu1 %vm164_vm1, %v9775_v21 }
 0x1e6   :  { %8649 = vmatmul.mubr.msk.bf16.gmra.mrb[16].mxu0 %vm164_vm1, %v9776_v22 }
 0x1e7   :  { %8955 = vmatmul.mubr.msk.bf16.gmra.mrb[16].mxu1 %vm164_vm1, %v9777_v23  ;;  %8652 = vmatprep.mubr.msk.bf16.mxu0 %vm164_vm1, %v9778_v24 }
 0x1e8   :  { %8958 = vmatprep.mubr.msk.bf16.mxu1 %vm164_vm1, %v9779_v25 }
 0x1ee   :  { %8653 = vmatmul.mubr.msk.bf16.gmra.mrb[20].mxu0 %vm164_vm1, %v9780_v26 }
 0x1ef   :  { %8959 = vmatmul.mubr.msk.bf16.gmra.mrb[20].mxu1 %vm164_vm1, %v9781_v27  ;;  %8656 = vmatprep.mubr.msk.bf16.mxu0 %vm164_vm1, %v9782_v28 }
 0x1f0   :  { %8962 = vmatprep.mubr.msk.bf16.mxu1 %vm164_vm1, %v9783_v29 }
 0x1f6   :  { %8657 = vmatmul.mubr.msk.bf16.gmra.mrb[24].mxu0 %vm164_vm1, %v9784_v30 }
 0x1f7   :  { %8963 = vmatmul.mubr.msk.bf16.gmra.mrb[24].mxu1 %vm164_vm1, %v9785_v31  ;;  %8660 = vmatprep.mubr.msk.bf16.mxu0 %vm164_vm1, %v9786_v32 }
 0x1f8   :  { %8966 = vmatprep.mubr.msk.bf16.mxu1 %vm164_vm1, %v9787_v33 }
 0x1fe   :  { %8661 = vmatmul.mubr.msk.bf16.gmra.mrb[28].mxu0 %vm164_vm1, %v9788_v34 }
 0x1ff   :  { %8967 = vmatmul.mubr.msk.bf16.gmra.mrb[28].mxu1 %vm164_vm1, %v9789_v35  ;;  %8666 = vmatprep.mubr.msk.bf16.mxu0 %vm164_vm1, %v9790_v36 }
 0x200   :  { %8972 = vmatprep.mubr.msk.bf16.mxu1 %vm164_vm1, %v9791_v37 }
 0x206   :  { %8667 = vmatmul.mubr.msk.bf16.vlgmr.msra.gmra.mrb[0].mxu0 %vm164_vm1, %v9792_v38 }
 0x207   :  { %8973 = vmatmul.mubr.msk.bf16.vlgmr.msra.gmra.mrb[0].mxu1 %vm164_vm1, %v9793_v39  ;;  %8670 = vmatprep.mubr.msk.bf16.mxu0 %vm164_vm1, %v9794_v40 }
 0x208   :  { %8976 = vmatprep.mubr.msk.bf16.mxu1 %vm164_vm1, %v9795_v41 }
 0x20e   :  { %8671 = vmatmul.mubr.msk.bf16.gmra.mrb[4].mxu0 %vm164_vm1, %v9796_v42 }
 0x20f   :  { %8977 = vmatmul.mubr.msk.bf16.gmra.mrb[4].mxu1 %vm164_vm1, %v9797_v43  ;;  %8674 = vmatprep.mubr.msk.bf16.mxu0 %vm164_vm1, %v9798_v44 }
 0x210   :  { %8980 = vmatprep.mubr.msk.bf16.mxu1 %vm164_vm1, %v9799_v45 }
 0x216   :  { %8675 = vmatmul.mubr.msk.bf16.gmra.mrb[8].mxu0 %vm164_vm1, %v9800_v46 }
 0x217   :  { %8981 = vmatmul.mubr.msk.bf16.gmra.mrb[8].mxu1 %vm164_vm1, %v9801_v47  ;;  %8678 = vmatprep.mubr.msk.bf16.mxu0 %vm164_vm1, %v9802_v48 }
 0x218   :  { %8984 = vmatprep.mubr.msk.bf16.mxu1 %vm164_vm1, %v9803_v49 }
 0x21e   :  { %8679 = vmatmul.mubr.msk.bf16.gmra.mrb[12].mxu0 %vm164_vm1, %v9804_v50 }
 0x21f   :  { %8985 = vmatmul.mubr.msk.bf16.gmra.mrb[12].mxu1 %vm164_vm1, %v9805_v51  ;;  %8682 = vmatprep.mubr.msk.bf16.mxu0 %vm164_vm1, %v9806_v52 }
 0x220   :  { %8988 = vmatprep.mubr.msk.bf16.mxu1 %vm164_vm1, %v9807_v53 }
 0x226   :  { %8683 = vmatmul.mubr.msk.bf16.gmra.mrb[16].mxu0 %vm164_vm1, %v9808_v54 }
 0x227   :  { %8989 = vmatmul.mubr.msk.bf16.gmra.mrb[16].mxu1 %vm164_vm1, %v9809_v55  ;;  %8686 = vmatprep.mubr.msk.bf16.mxu0 %vm164_vm1, %v9810_v56 }
 0x228   :  { %8992 = vmatprep.mubr.msk.bf16.mxu1 %vm164_vm1, %v9811_v57 }
 0x22e   :  { %8687 = vmatmul.mubr.msk.bf16.gmra.mrb[20].mxu0 %vm164_vm1, %v9812_v58 }
 0x22f   :  { %8993 = vmatmul.mubr.msk.bf16.gmra.mrb[20].mxu1 %vm164_vm1, %v9813_v59  ;;  %8690 = vmatprep.mubr.msk.bf16.mxu0 %vm164_vm1, %v9814_v60 }
 0x230   :  { %8996 = vmatprep.mubr.msk.bf16.mxu1 %vm164_vm1, %v9815_v61 }
 0x236   :  { %8691 = vmatmul.mubr.msk.bf16.gmra.mrb[24].mxu0 %vm164_vm1, %v9816_v62 }
 0x237   :  { %8997 = vmatmul.mubr.msk.bf16.gmra.mrb[24].mxu1 %vm164_vm1, %v9817_v63  ;;  %8694 = vmatprep.mubr.msk.bf16.mxu0 %vm164_vm1, %v9818_v0 }
 0x238   :  { %9000 = vmatprep.mubr.msk.bf16.mxu1 %vm164_vm1, %v9819_v1 }
 0x23e   :  { %8695 = vmatmul.mubr.msk.bf16.gmra.mrb[28].mxu0 %vm164_vm1, %v9820_v2 }
 0x23f   :  { %9001 = vmatmul.mubr.msk.bf16.gmra.mrb[28].mxu1 %vm164_vm1, %v9821_v3 }
 0x2d9   :  { %v8668_v5 = vpop.f32.mrb[0].mxu0 }
 0x2da   :  { %v3185_v6 = vadd.f32 %v8668_v5, %v11135_v4  ;;  %v8974_v7 = vpop.f32.mrb[0].mxu1  ;;  %v3018_v8 = vpop.f32.mrb[1].mxu0 }
 0x2db   :  { %v6594_v9 = vadd.f32 %v8974_v7, %v11135_v4  ;;  %v3183_v10 = vadd.f32 %v11135_v4, %v3018_v8  ;;  %v6433_v11 = vpop.f32.mrb[1].mxu1  ;;  %v8669_v12 = vpop.f32.mrb[2].mxu0 }
 0x2dc   :  { %v3217_v13 = vmul.f32 0.2, %v3185_v6  ;;  %v6592_v14 = vadd.f32 %v11135_v4, %v6433_v11  ;;  %v3186_v15 = vadd.f32 %v8669_v12, %v11135_v4  ;;  %v8975_v16 = vpop.f32.mrb[2].mxu1  ;;  %v3021_v17 = vpop.f32.mrb[3].mxu0 }
 0x2dd   :  { %v6626_v18 = vmul.f32 0.2, %v6594_v9  ;;  %v3215_v19 = vmul.f32 0.2, %v3183_v10  ;;  %v6595_v20 = vadd.f32 %v8975_v16, %v11135_v4  ;;  %v3184_v21 = vadd.f32 %v11135_v4, %v3021_v17  ;;  %v6436_v22 = vpop.f32.mrb[3].mxu1 }
 0x2de   :  { %v3249_v23 = vmax.f32 %v3185_v6, %v3217_v13  ;;  %v6624_v24 = vmul.f32 0.2, %v6592_v14  ;;  %v3218_v25 = vmul.f32 0.2, %v3186_v15  ;;  %v6593_v26 = vadd.f32 %v11135_v4, %v6436_v22 }
 0x2df   :  { %v6658_v27 = vmax.f32 %v6594_v9, %v6626_v18  ;;  %v3247_v28 = vmax.f32 %v3183_v10, %v3215_v19  ;;  %v6627_v29 = vmul.f32 0.2, %v6595_v20  ;;  %v3216_v30 = vmul.f32 0.2, %v3184_v21 }
 0x2e0   :  { %v8024_v31 = vpack.c.bf16 %v3249_v23, %v3249_v23  ;;  %v6656_v32 = vmax.f32 %v6592_v14, %v6624_v24  ;;  %v3250_v33 = vmax.f32 %v3186_v15, %v3218_v25  ;;  %v6625_v34 = vmul.f32 0.2, %v6593_v26 }
 0x2e1   :  { %v8056_v35 = vpack.c.bf16 %v6658_v27, %v6658_v27  ;;  %v8022_v36 = vpack.c.bf16 %v3247_v28, %v3247_v28  ;;  %v6659_v37 = vmax.f32 %v6595_v20, %v6627_v29  ;;  %v3248_v38 = vmax.f32 %v3184_v21, %v3216_v30  ;;  %v8672_v39 = vpop.f32.mrb[4].mxu0 }
 0x2e2   :  { %3410 = vst.msk [vmem:[%s11460_s3 + $0x8] sm:$0xf] %vm3407_vm2, %v8024_v31  ;;  %v8054_v40 = vpack.c.bf16 %v6656_v32, %v6656_v32  ;;  %v8025_v41 = vpack.c.bf16 %v3250_v33, %v3250_v33  ;;  %v6657_v42 = vmax.f32 %v6593_v26, %v6625_v34  ;;  %v3189_v43 = vadd.f32 %v8672_v39, %v11135_v4  ;;  %v8978_v44 = vpop.f32.mrb[4].mxu1  ;;  %v3034_v45 = vpop.f32.mrb[5].mxu0 }
 0x2e3   :  { %7992 = vst.msk [vmem:[%s11460_s3 + $0x88] sm:$0xf] %vm3407_vm2, %v8056_v35  ;;  %3408 = vst.msk [vmem:[%s11460_s3] sm:$0xf] %vm3407_vm2, %v8022_v36  ;;  %v8057_v46 = vpack.c.bf16 %v6659_v37, %v6659_v37  ;;  %v8023_v47 = vpack.c.bf16 %v3248_v38, %v3248_v38  ;;  %v6598_v48 = vadd.f32 %v8978_v44, %v11135_v4  ;;  %v6449_v50 = vpop.f32.mrb[5].mxu1  ;;  %v8673_v51 = vpop.f32.mrb[6].mxu0 }
 0x2e4   :  { %v3187_v49 = vadd.f32 %v11135_v4, %v3034_v45  ;;  %7990 = vst.msk [vmem:[%s11460_s3 + $0x80] sm:$0xf] %vm3407_vm2, %v8054_v40  ;;  %3411 = vst.msk [vmem:[%s11460_s3 + $0xc] sm:$0xf] %vm3407_vm2, %v8025_v41  ;;  %v8055_v52 = vpack.c.bf16 %v6657_v42, %v6657_v42  ;;  %v3221_v53 = vmul.f32 0.2, %v3189_v43  ;;  %v6596_v54 = vadd.f32 %v11135_v4, %v6449_v50 }
 0x2e5   :  { %v3190_v55 = vadd.f32 %v8673_v51, %v11135_v4  ;;  %v8979_v56 = vpop.f32.mrb[6].mxu1  ;;  %v3037_v57 = vpop.f32.mrb[7].mxu0  ;;  %7993 = vst.msk [vmem:[%s11460_s3 + $0x8c] sm:$0xf] %vm3407_vm2, %v8057_v46  ;;  %3409 = vst.msk [vmem:[%s11460_s3 + $0x4] sm:$0xf] %vm3407_vm2, %v8023_v47 }
 0x2e6   :  { %v6630_v58 = vmul.f32 0.2, %v6598_v48  ;;  %v3219_v59 = vmul.f32 0.2, %v3187_v49  ;;  %v6599_v60 = vadd.f32 %v8979_v56, %v11135_v4  ;;  %v3188_v61 = vadd.f32 %v11135_v4, %v3037_v57  ;;  %v6452_v62 = vpop.f32.mrb[7].mxu1 }
 0x2e7   :  { %7991 = vst.msk [vmem:[%s11460_s3 + $0x84] sm:$0xf] %vm3407_vm2, %v8055_v52  ;;  %v3253_v63 = vmax.f32 %v3189_v43, %v3221_v53  ;;  %v6628_v0 = vmul.f32 0.2, %v6596_v54  ;;  %v3222_v1 = vmul.f32 0.2, %v3190_v55  ;;  %v6597_v2 = vadd.f32 %v11135_v4, %v6452_v62 }
 0x2e8   :  { %v6662_v3 = vmax.f32 %v6598_v48, %v6630_v58  ;;  %v3251_v5 = vmax.f32 %v3187_v49, %v3219_v59  ;;  %v6631_v6 = vmul.f32 0.2, %v6599_v60  ;;  %v3220_v7 = vmul.f32 0.2, %v3188_v61 }
 0x2e9   :  { %v8028_v8 = vpack.c.bf16 %v3253_v63, %v3253_v63  ;;  %v6660_v9 = vmax.f32 %v6596_v54, %v6628_v0  ;;  %v3254_v10 = vmax.f32 %v3190_v55, %v3222_v1  ;;  %v6629_v11 = vmul.f32 0.2, %v6597_v2  ;;  %v8676_v16 = vpop.f32.mrb[8].mxu0 }
 0x2ea   :  { %v8060_v12 = vpack.c.bf16 %v6662_v3, %v6662_v3  ;;  %v8026_v13 = vpack.c.bf16 %v3251_v5, %v3251_v5  ;;  %v6663_v14 = vmax.f32 %v6599_v60, %v6631_v6  ;;  %v3252_v15 = vmax.f32 %v3188_v61, %v3220_v7  ;;  %v8982_v21 = vpop.f32.mrb[8].mxu1  ;;  %v3050_v22 = vpop.f32.mrb[9].mxu0 }
 0x2eb   :  { %3414 = vst.msk [vmem:[%s11460_s3 + $0x18] sm:$0xf] %vm3407_vm2, %v8028_v8  ;;  %v8058_v17 = vpack.c.bf16 %v6660_v9, %v6660_v9  ;;  %v8029_v18 = vpack.c.bf16 %v3254_v10, %v3254_v10  ;;  %v6661_v19 = vmax.f32 %v6597_v2, %v6629_v11  ;;  %v3193_v20 = vadd.f32 %v8676_v16, %v11135_v4  ;;  %v6465_v27 = vpop.f32.mrb[9].mxu1  ;;  %v8677_v28 = vpop.f32.mrb[10].mxu0 }
 0x2ec   :  { %7996 = vst.msk [vmem:[%s11460_s3 + $0x98] sm:$0xf] %vm3407_vm2, %v8060_v12  ;;  %3412 = vst.msk [vmem:[%s11460_s3 + $0x10] sm:$0xf] %vm3407_vm2, %v8026_v13  ;;  %v8061_v23 = vpack.c.bf16 %v6663_v14, %v6663_v14  ;;  %v8027_v24 = vpack.c.bf16 %v3252_v15, %v3252_v15  ;;  %v6602_v25 = vadd.f32 %v8982_v21, %v11135_v4  ;;  %v8983_v33 = vpop.f32.mrb[10].mxu1  ;;  %v3053_v34 = vpop.f32.mrb[11].mxu0 }
 0x2ed   :  { %v3191_v26 = vadd.f32 %v11135_v4, %v3050_v22  ;;  %7994 = vst.msk [vmem:[%s11460_s3 + $0x90] sm:$0xf] %vm3407_vm2, %v8058_v17  ;;  %3415 = vst.msk [vmem:[%s11460_s3 + $0x1c] sm:$0xf] %vm3407_vm2, %v8029_v18  ;;  %v8059_v29 = vpack.c.bf16 %v6661_v19, %v6661_v19  ;;  %v3225_v30 = vmul.f32 0.2, %v3193_v20  ;;  %v6600_v31 = vadd.f32 %v11135_v4, %v6465_v27 }
 0x2ee   :  { %v3194_v32 = vadd.f32 %v8677_v28, %v11135_v4  ;;  %7997 = vst.msk [vmem:[%s11460_s3 + $0x9c] sm:$0xf] %vm3407_vm2, %v8061_v23  ;;  %3413 = vst.msk [vmem:[%s11460_s3 + $0x14] sm:$0xf] %vm3407_vm2, %v8027_v24  ;;  %v6634_v35 = vmul.f32 0.2, %v6602_v25  ;;  %v6603_v37 = vadd.f32 %v8983_v33, %v11135_v4  ;;  %v3192_v38 = vadd.f32 %v11135_v4, %v3053_v34 }
 0x2ef   :  { %v3223_v36 = vmul.f32 0.2, %v3191_v26  ;;  %v6468_v39 = vpop.f32.mrb[11].mxu1  ;;  %7995 = vst.msk [vmem:[%s11460_s3 + $0x94] sm:$0xf] %vm3407_vm2, %v8059_v29  ;;  %v3257_v40 = vmax.f32 %v3193_v20, %v3225_v30 }
 0x2f0   :  { %v6632_v41 = vmul.f32 0.2, %v6600_v31  ;;  %v3226_v42 = vmul.f32 0.2, %v3194_v32  ;;  %v6601_v43 = vadd.f32 %v11135_v4, %v6468_v39  ;;  %v6666_v44 = vmax.f32 %v6602_v25, %v6634_v35 }
 0x2f1   :  { %v3255_v45 = vmax.f32 %v3191_v26, %v3223_v36  ;;  %v6635_v46 = vmul.f32 0.2, %v6603_v37  ;;  %v3224_v47 = vmul.f32 0.2, %v3192_v38  ;;  %v8032_v48 = vpack.c.bf16 %v3257_v40, %v3257_v40  ;;  %v8680_v56 = vpop.f32.mrb[12].mxu0 }
 0x2f2   :  { %v6664_v49 = vmax.f32 %v6600_v31, %v6632_v41  ;;  %v3258_v50 = vmax.f32 %v3194_v32, %v3226_v42  ;;  %v6633_v51 = vmul.f32 0.2, %v6601_v43  ;;  %v8064_v52 = vpack.c.bf16 %v6666_v44, %v6666_v44  ;;  %v8986_v61 = vpop.f32.mrb[12].mxu1  ;;  %v3066_v62 = vpop.f32.mrb[13].mxu0 }
 0x2f3   :  { %v8030_v53 = vpack.c.bf16 %v3255_v45, %v3255_v45  ;;  %v6667_v54 = vmax.f32 %v6603_v37, %v6635_v46  ;;  %v3256_v55 = vmax.f32 %v3192_v38, %v3224_v47  ;;  %3418 = vst.msk [vmem:[%s11460_s3 + $0x28] sm:$0xf] %vm3407_vm2, %v8032_v48  ;;  %v3197_v60 = vadd.f32 %v8680_v56, %v11135_v4  ;;  %v6481_v3 = vpop.f32.mrb[13].mxu1  ;;  %v8681_v5 = vpop.f32.mrb[14].mxu0 }
 0x2f4   :  { %v8062_v57 = vpack.c.bf16 %v6664_v49, %v6664_v49  ;;  %v8033_v58 = vpack.c.bf16 %v3258_v50, %v3258_v50  ;;  %v6665_v59 = vmax.f32 %v6601_v43, %v6633_v51  ;;  %8000 = vst.msk [vmem:[%s11460_s3 + $0xa8] sm:$0xf] %vm3407_vm2, %v8064_v52  ;;  %v6606_v1 = vadd.f32 %v8986_v61, %v11135_v4  ;;  %v8987_v10 = vpop.f32.mrb[14].mxu1  ;;  %v3069_v11 = vpop.f32.mrb[15].mxu0 }
 0x2f5   :  { %3416 = vst.msk [vmem:[%s11460_s3 + $0x20] sm:$0xf] %vm3407_vm2, %v8030_v53  ;;  %v8065_v63 = vpack.c.bf16 %v6667_v54, %v6667_v54  ;;  %v8031_v0 = vpack.c.bf16 %v3256_v55, %v3256_v55  ;;  %v3195_v2 = vadd.f32 %v11135_v4, %v3066_v62  ;;  %v3229_v7 = vmul.f32 0.2, %v3197_v60  ;;  %v6484_v16 = vpop.f32.mrb[15].mxu1 }
 0x2f6   :  { %7998 = vst.msk [vmem:[%s11460_s3 + $0xa0] sm:$0xf] %vm3407_vm2, %v8062_v57  ;;  %3419 = vst.msk [vmem:[%s11460_s3 + $0x2c] sm:$0xf] %vm3407_vm2, %v8033_v58  ;;  %v8063_v6 = vpack.c.bf16 %v6665_v59, %v6665_v59  ;;  %v6604_v8 = vadd.f32 %v11135_v4, %v6481_v3  ;;  %v3198_v9 = vadd.f32 %v8681_v5, %v11135_v4  ;;  %v6638_v12 = vmul.f32 0.2, %v6606_v1 }
 0x2f7   :  { %8001 = vst.msk [vmem:[%s11460_s3 + $0xac] sm:$0xf] %vm3407_vm2, %v8065_v63  ;;  %3417 = vst.msk [vmem:[%s11460_s3 + $0x24] sm:$0xf] %vm3407_vm2, %v8031_v0  ;;  %v3227_v13 = vmul.f32 0.2, %v3195_v2  ;;  %v6607_v14 = vadd.f32 %v8987_v10, %v11135_v4  ;;  %v3196_v15 = vadd.f32 %v11135_v4, %v3069_v11  ;;  %v3261_v17 = vmax.f32 %v3197_v60, %v3229_v7 }
 0x2f8   :  { %7999 = vst.msk [vmem:[%s11460_s3 + $0xa4] sm:$0xf] %vm3407_vm2, %v8063_v6  ;;  %v6636_v18 = vmul.f32 0.2, %v6604_v8  ;;  %v3230_v19 = vmul.f32 0.2, %v3198_v9  ;;  %v6605_v20 = vadd.f32 %v11135_v4, %v6484_v16  ;;  %v6670_v21 = vmax.f32 %v6606_v1, %v6638_v12 }
 0x2f9   :  { %v3259_v22 = vmax.f32 %v3195_v2, %v3227_v13  ;;  %v6639_v23 = vmul.f32 0.2, %v6607_v14  ;;  %v3228_v24 = vmul.f32 0.2, %v3196_v15  ;;  %v8036_v25 = vpack.c.bf16 %v3261_v17, %v3261_v17  ;;  %v8684_v33 = vpop.f32.mrb[16].mxu0 }
 0x2fa   :  { %v6668_v26 = vmax.f32 %v6604_v8, %v6636_v18  ;;  %v3262_v27 = vmax.f32 %v3198_v9, %v3230_v19  ;;  %v6637_v28 = vmul.f32 0.2, %v6605_v20  ;;  %v8068_v29 = vpack.c.bf16 %v6670_v21, %v6670_v21  ;;  %v8990_v38 = vpop.f32.mrb[16].mxu1  ;;  %v3082_v39 = vpop.f32.mrb[17].mxu0 }
 0x2fb   :  { %v8034_v30 = vpack.c.bf16 %v3259_v22, %v3259_v22  ;;  %v6671_v31 = vmax.f32 %v6607_v14, %v6639_v23  ;;  %v3260_v32 = vmax.f32 %v3196_v15, %v3228_v24  ;;  %3422 = vst.msk [vmem:[%s11460_s3 + $0x38] sm:$0xf] %vm3407_vm2, %v8036_v25  ;;  %v3201_v37 = vadd.f32 %v8684_v33, %v11135_v4  ;;  %v6497_v44 = vpop.f32.mrb[17].mxu1  ;;  %v8685_v45 = vpop.f32.mrb[18].mxu0 }
 0x2fc   :  { %v8066_v34 = vpack.c.bf16 %v6668_v26, %v6668_v26  ;;  %v8037_v35 = vpack.c.bf16 %v3262_v27, %v3262_v27  ;;  %v6669_v36 = vmax.f32 %v6605_v20, %v6637_v28  ;;  %8004 = vst.msk [vmem:[%s11460_s3 + $0xb8] sm:$0xf] %vm3407_vm2, %v8068_v29  ;;  %v6610_v42 = vadd.f32 %v8990_v38, %v11135_v4  ;;  %v8991_v50 = vpop.f32.mrb[18].mxu1  ;;  %v3085_v51 = vpop.f32.mrb[19].mxu0 }
 0x2fd   :  { %3420 = vst.msk [vmem:[%s11460_s3 + $0x30] sm:$0xf] %vm3407_vm2, %v8034_v30  ;;  %v8069_v40 = vpack.c.bf16 %v6671_v31, %v6671_v31  ;;  %v8035_v41 = vpack.c.bf16 %v3260_v32, %v3260_v32  ;;  %v3199_v43 = vadd.f32 %v11135_v4, %v3082_v39  ;;  %v3233_v47 = vmul.f32 0.2, %v3201_v37  ;;  %v6500_v56 = vpop.f32.mrb[19].mxu1 }
 0x2fe   :  { %8002 = vst.msk [vmem:[%s11460_s3 + $0xb0] sm:$0xf] %vm3407_vm2, %v8066_v34  ;;  %3423 = vst.msk [vmem:[%s11460_s3 + $0x3c] sm:$0xf] %vm3407_vm2, %v8037_v35  ;;  %v8067_v46 = vpack.c.bf16 %v6669_v36, %v6669_v36  ;;  %v6608_v48 = vadd.f32 %v11135_v4, %v6497_v44  ;;  %v3202_v49 = vadd.f32 %v8685_v45, %v11135_v4  ;;  %v6642_v52 = vmul.f32 0.2, %v6610_v42 }
 0x2ff   :  { %8005 = vst.msk [vmem:[%s11460_s3 + $0xbc] sm:$0xf] %vm3407_vm2, %v8069_v40  ;;  %3421 = vst.msk [vmem:[%s11460_s3 + $0x34] sm:$0xf] %vm3407_vm2, %v8035_v41  ;;  %v3231_v53 = vmul.f32 0.2, %v3199_v43  ;;  %v6611_v54 = vadd.f32 %v8991_v50, %v11135_v4  ;;  %v3200_v55 = vadd.f32 %v11135_v4, %v3085_v51  ;;  %v3265_v57 = vmax.f32 %v3201_v37, %v3233_v47 }
 0x300   :  { %8003 = vst.msk [vmem:[%s11460_s3 + $0xb4] sm:$0xf] %vm3407_vm2, %v8067_v46  ;;  %v6640_v58 = vmul.f32 0.2, %v6608_v48  ;;  %v3234_v59 = vmul.f32 0.2, %v3202_v49  ;;  %v6609_v60 = vadd.f32 %v11135_v4, %v6500_v56  ;;  %v6674_v61 = vmax.f32 %v6610_v42, %v6642_v52 }
 0x301   :  { %v3263_v62 = vmax.f32 %v3199_v43, %v3231_v53  ;;  %v6643_v63 = vmul.f32 0.2, %v6611_v54  ;;  %v3232_v0 = vmul.f32 0.2, %v3200_v55  ;;  %v8040_v1 = vpack.c.bf16 %v3265_v57, %v3265_v57  ;;  %v8688_v10 = vpop.f32.mrb[20].mxu0 }
 0x302   :  { %v6672_v2 = vmax.f32 %v6608_v48, %v6640_v58  ;;  %v3266_v3 = vmax.f32 %v3202_v49, %v3234_v59  ;;  %v6641_v5 = vmul.f32 0.2, %v6609_v60  ;;  %v8072_v6 = vpack.c.bf16 %v6674_v61, %v6674_v61  ;;  %v8994_v15 = vpop.f32.mrb[20].mxu1  ;;  %v3098_v16 = vpop.f32.mrb[21].mxu0 }
 0x303   :  { %v8038_v7 = vpack.c.bf16 %v3263_v62, %v3263_v62  ;;  %v6675_v8 = vmax.f32 %v6611_v54, %v6643_v63  ;;  %v3264_v9 = vmax.f32 %v3200_v55, %v3232_v0  ;;  %3426 = vst.msk [vmem:[%s11460_s3 + $0x48] sm:$0xf] %vm3407_vm2, %v8040_v1  ;;  %v3205_v14 = vadd.f32 %v8688_v10, %v11135_v4  ;;  %v6513_v21 = vpop.f32.mrb[21].mxu1  ;;  %v8689_v22 = vpop.f32.mrb[22].mxu0 }
 0x304   :  { %v8070_v11 = vpack.c.bf16 %v6672_v2, %v6672_v2  ;;  %v8041_v12 = vpack.c.bf16 %v3266_v3, %v3266_v3  ;;  %v6673_v13 = vmax.f32 %v6609_v60, %v6641_v5  ;;  %8008 = vst.msk [vmem:[%s11460_s3 + $0xc8] sm:$0xf] %vm3407_vm2, %v8072_v6  ;;  %v6614_v19 = vadd.f32 %v8994_v15, %v11135_v4  ;;  %v8995_v27 = vpop.f32.mrb[22].mxu1  ;;  %v3101_v28 = vpop.f32.mrb[23].mxu0 }
 0x305   :  { %3424 = vst.msk [vmem:[%s11460_s3 + $0x40] sm:$0xf] %vm3407_vm2, %v8038_v7  ;;  %v8073_v17 = vpack.c.bf16 %v6675_v8, %v6675_v8  ;;  %v8039_v18 = vpack.c.bf16 %v3264_v9, %v3264_v9  ;;  %v3203_v20 = vadd.f32 %v11135_v4, %v3098_v16  ;;  %v3237_v24 = vmul.f32 0.2, %v3205_v14  ;;  %v6516_v33 = vpop.f32.mrb[23].mxu1 }
 0x306   :  { %8006 = vst.msk [vmem:[%s11460_s3 + $0xc0] sm:$0xf] %vm3407_vm2, %v8070_v11  ;;  %3427 = vst.msk [vmem:[%s11460_s3 + $0x4c] sm:$0xf] %vm3407_vm2, %v8041_v12  ;;  %v8071_v23 = vpack.c.bf16 %v6673_v13, %v6673_v13  ;;  %v6612_v25 = vadd.f32 %v11135_v4, %v6513_v21  ;;  %v3206_v26 = vadd.f32 %v8689_v22, %v11135_v4  ;;  %v6646_v29 = vmul.f32 0.2, %v6614_v19 }
 0x307   :  { %8009 = vst.msk [vmem:[%s11460_s3 + $0xcc] sm:$0xf] %vm3407_vm2, %v8073_v17  ;;  %3425 = vst.msk [vmem:[%s11460_s3 + $0x44] sm:$0xf] %vm3407_vm2, %v8039_v18  ;;  %v3235_v30 = vmul.f32 0.2, %v3203_v20  ;;  %v6615_v31 = vadd.f32 %v8995_v27, %v11135_v4  ;;  %v3204_v32 = vadd.f32 %v11135_v4, %v3101_v28  ;;  %v3269_v34 = vmax.f32 %v3205_v14, %v3237_v24 }
 0x308   :  { %8007 = vst.msk [vmem:[%s11460_s3 + $0xc4] sm:$0xf] %vm3407_vm2, %v8071_v23  ;;  %v6644_v35 = vmul.f32 0.2, %v6612_v25  ;;  %v3238_v36 = vmul.f32 0.2, %v3206_v26  ;;  %v6613_v37 = vadd.f32 %v11135_v4, %v6516_v33  ;;  %v6678_v38 = vmax.f32 %v6614_v19, %v6646_v29 }
 0x309   :  { %v3267_v39 = vmax.f32 %v3203_v20, %v3235_v30  ;;  %v6647_v40 = vmul.f32 0.2, %v6615_v31  ;;  %v3236_v41 = vmul.f32 0.2, %v3204_v32  ;;  %v8044_v42 = vpack.c.bf16 %v3269_v34, %v3269_v34  ;;  %v8692_v50 = vpop.f32.mrb[24].mxu0 }
 0x30a   :  { %v6676_v43 = vmax.f32 %v6612_v25, %v6644_v35  ;;  %v3270_v44 = vmax.f32 %v3206_v26, %v3238_v36  ;;  %v6645_v45 = vmul.f32 0.2, %v6613_v37  ;;  %v8076_v46 = vpack.c.bf16 %v6678_v38, %v6678_v38  ;;  %v8998_v55 = vpop.f32.mrb[24].mxu1  ;;  %v3114_v56 = vpop.f32.mrb[25].mxu0 }
 0x30b   :  { %v8042_v47 = vpack.c.bf16 %v3267_v39, %v3267_v39  ;;  %v6679_v48 = vmax.f32 %v6615_v31, %v6647_v40  ;;  %v3268_v49 = vmax.f32 %v3204_v32, %v3236_v41  ;;  %3430 = vst.msk [vmem:[%s11460_s3 + $0x58] sm:$0xf] %vm3407_vm2, %v8044_v42  ;;  %v3209_v54 = vadd.f32 %v8692_v50, %v11135_v4  ;;  %v6529_v61 = vpop.f32.mrb[25].mxu1  ;;  %v8693_v62 = vpop.f32.mrb[26].mxu0 }
 0x30c   :  { %v8074_v51 = vpack.c.bf16 %v6676_v43, %v6676_v43  ;;  %v8045_v52 = vpack.c.bf16 %v3270_v44, %v3270_v44  ;;  %v6677_v53 = vmax.f32 %v6613_v37, %v6645_v45  ;;  %8012 = vst.msk [vmem:[%s11460_s3 + $0xd8] sm:$0xf] %vm3407_vm2, %v8076_v46  ;;  %v6618_v59 = vadd.f32 %v8998_v55, %v11135_v4  ;;  %v8999_v3 = vpop.f32.mrb[26].mxu1  ;;  %v3117_v5 = vpop.f32.mrb[27].mxu0 }
 0x30d   :  { %3428 = vst.msk [vmem:[%s11460_s3 + $0x50] sm:$0xf] %vm3407_vm2, %v8042_v47  ;;  %v8077_v57 = vpack.c.bf16 %v6679_v48, %v6679_v48  ;;  %v8043_v58 = vpack.c.bf16 %v3268_v49, %v3268_v49  ;;  %v3207_v60 = vadd.f32 %v11135_v4, %v3114_v56  ;;  %v3241_v0 = vmul.f32 0.2, %v3209_v54  ;;  %v6532_v10 = vpop.f32.mrb[27].mxu1 }
 0x30e   :  { %8010 = vst.msk [vmem:[%s11460_s3 + $0xd0] sm:$0xf] %vm3407_vm2, %v8074_v51  ;;  %3431 = vst.msk [vmem:[%s11460_s3 + $0x5c] sm:$0xf] %vm3407_vm2, %v8045_v52  ;;  %v8075_v63 = vpack.c.bf16 %v6677_v53, %v6677_v53  ;;  %v6616_v1 = vadd.f32 %v11135_v4, %v6529_v61  ;;  %v3210_v2 = vadd.f32 %v8693_v62, %v11135_v4  ;;  %v6650_v6 = vmul.f32 0.2, %v6618_v59 }
 0x30f   :  { %8013 = vst.msk [vmem:[%s11460_s3 + $0xdc] sm:$0xf] %vm3407_vm2, %v8077_v57  ;;  %3429 = vst.msk [vmem:[%s11460_s3 + $0x54] sm:$0xf] %vm3407_vm2, %v8043_v58  ;;  %v3239_v7 = vmul.f32 0.2, %v3207_v60  ;;  %v6619_v8 = vadd.f32 %v8999_v3, %v11135_v4  ;;  %v3208_v9 = vadd.f32 %v11135_v4, %v3117_v5  ;;  %v3273_v11 = vmax.f32 %v3209_v54, %v3241_v0 }
 0x310   :  { %8011 = vst.msk [vmem:[%s11460_s3 + $0xd4] sm:$0xf] %vm3407_vm2, %v8075_v63  ;;  %v6648_v12 = vmul.f32 0.2, %v6616_v1  ;;  %v3242_v13 = vmul.f32 0.2, %v3210_v2  ;;  %v6617_v14 = vadd.f32 %v11135_v4, %v6532_v10  ;;  %v6682_v15 = vmax.f32 %v6618_v59, %v6650_v6 }
 0x311   :  { %v3271_v16 = vmax.f32 %v3207_v60, %v3239_v7  ;;  %v6651_v17 = vmul.f32 0.2, %v6619_v8  ;;  %v3240_v18 = vmul.f32 0.2, %v3208_v9  ;;  %v8048_v19 = vpack.c.bf16 %v3273_v11, %v3273_v11  ;;  %v8696_v27 = vpop.f32.mrb[28].mxu0 }
 0x312   :  { %v6680_v20 = vmax.f32 %v6616_v1, %v6648_v12  ;;  %v3274_v21 = vmax.f32 %v3210_v2, %v3242_v13  ;;  %v6649_v22 = vmul.f32 0.2, %v6617_v14  ;;  %v8080_v23 = vpack.c.bf16 %v6682_v15, %v6682_v15  ;;  %v9002_v32 = vpop.f32.mrb[28].mxu1  ;;  %v3130_v33 = vpop.f32.mrb[29].mxu0 }
 0x313   :  { %v8046_v24 = vpack.c.bf16 %v3271_v16, %v3271_v16  ;;  %v6683_v25 = vmax.f32 %v6619_v8, %v6651_v17  ;;  %v3272_v26 = vmax.f32 %v3208_v9, %v3240_v18  ;;  %3434 = vst.msk [vmem:[%s11460_s3 + $0x68] sm:$0xf] %vm3407_vm2, %v8048_v19  ;;  %v3213_v31 = vadd.f32 %v8696_v27, %v11135_v4  ;;  %v6545_v38 = vpop.f32.mrb[29].mxu1  ;;  %v8697_v39 = vpop.f32.mrb[30].mxu0 }
 0x314   :  { %v8078_v28 = vpack.c.bf16 %v6680_v20, %v6680_v20  ;;  %v8049_v29 = vpack.c.bf16 %v3274_v21, %v3274_v21  ;;  %v6681_v30 = vmax.f32 %v6617_v14, %v6649_v22  ;;  %8016 = vst.msk [vmem:[%s11460_s3 + $0xe8] sm:$0xf] %vm3407_vm2, %v8080_v23  ;;  %v6622_v36 = vadd.f32 %v9002_v32, %v11135_v4  ;;  %v9003_v44 = vpop.f32.mrb[30].mxu1  ;;  %v3133_v45 = vpop.f32.mrb[31].mxu0 }
 0x315   :  { %3432 = vst.msk [vmem:[%s11460_s3 + $0x60] sm:$0xf] %vm3407_vm2, %v8046_v24  ;;  %v8081_v34 = vpack.c.bf16 %v6683_v25, %v6683_v25  ;;  %v8047_v35 = vpack.c.bf16 %v3272_v26, %v3272_v26  ;;  %v3211_v37 = vadd.f32 %v11135_v4, %v3130_v33  ;;  %v3245_v41 = vmul.f32 0.2, %v3213_v31  ;;  %v6548_v50 = vpop.f32.mrb[31].mxu1 }
 0x316   :  { %8014 = vst.msk [vmem:[%s11460_s3 + $0xe0] sm:$0xf] %vm3407_vm2, %v8078_v28  ;;  %3435 = vst.msk [vmem:[%s11460_s3 + $0x6c] sm:$0xf] %vm3407_vm2, %v8049_v29  ;;  %v8079_v40 = vpack.c.bf16 %v6681_v30, %v6681_v30  ;;  %v6620_v42 = vadd.f32 %v11135_v4, %v6545_v38  ;;  %v3214_v43 = vadd.f32 %v8697_v39, %v11135_v4  ;;  %v6654_v46 = vmul.f32 0.2, %v6622_v36 }
 0x317   :  { %8017 = vst.msk [vmem:[%s11460_s3 + $0xec] sm:$0xf] %vm3407_vm2, %v8081_v34  ;;  %3433 = vst.msk [vmem:[%s11460_s3 + $0x64] sm:$0xf] %vm3407_vm2, %v8047_v35  ;;  %v3243_v47 = vmul.f32 0.2, %v3211_v37  ;;  %v6623_v48 = vadd.f32 %v9003_v44, %v11135_v4  ;;  %v3212_v49 = vadd.f32 %v11135_v4, %v3133_v45  ;;  %v3277_v51 = vmax.f32 %v3213_v31, %v3245_v41 }
 0x318   :  { %8015 = vst.msk [vmem:[%s11460_s3 + $0xe4] sm:$0xf] %vm3407_vm2, %v8079_v40  ;;  %v6652_v52 = vmul.f32 0.2, %v6620_v42  ;;  %v3246_v53 = vmul.f32 0.2, %v3214_v43  ;;  %v6621_v54 = vadd.f32 %v11135_v4, %v6548_v50  ;;  %v6686_v55 = vmax.f32 %v6622_v36, %v6654_v46 }
 0x319   :  { %v3275_v56 = vmax.f32 %v3211_v37, %v3243_v47  ;;  %v6655_v57 = vmul.f32 0.2, %v6623_v48  ;;  %v3244_v58 = vmul.f32 0.2, %v3212_v49  ;;  %v8052_v59 = vpack.c.bf16 %v3277_v51, %v3277_v51 }
 0x31a   :  { %v6684_v60 = vmax.f32 %v6620_v42, %v6652_v52  ;;  %v3278_v61 = vmax.f32 %v3214_v43, %v3246_v53  ;;  %v6653_v62 = vmul.f32 0.2, %v6621_v54  ;;  %v8084_v63 = vpack.c.bf16 %v6686_v55, %v6686_v55 }
 0x31b   :  { %v8050_v0 = vpack.c.bf16 %v3275_v56, %v3275_v56  ;;  %v6687_v1 = vmax.f32 %v6623_v48, %v6655_v57  ;;  %v3276_v2 = vmax.f32 %v3212_v49, %v3244_v58  ;;  %3438 = vst.msk [vmem:[%s11460_s3 + $0x78] sm:$0xf] %vm3407_vm2, %v8052_v59 }
 0x31c   :  { %v8082_v3 = vpack.c.bf16 %v6684_v60, %v6684_v60  ;;  %v8053_v5 = vpack.c.bf16 %v3278_v61, %v3278_v61  ;;  %v6685_v4 = vmax.f32 %v6621_v54, %v6653_v62  ;;  %8020 = vst.msk [vmem:[%s11460_s3 + $0xf8] sm:$0xf] %vm3407_vm2, %v8084_v63 }
 0x31d   :  { %3436 = vst.msk [vmem:[%s11460_s3 + $0x70] sm:$0xf] %vm3407_vm2, %v8050_v0  ;;  %v8085_v6 = vpack.c.bf16 %v6687_v1, %v6687_v1  ;;  %v8051_v7 = vpack.c.bf16 %v3276_v2, %v3276_v2 }
 0x31e   :  { %8018 = vst.msk [vmem:[%s11460_s3 + $0xf0] sm:$0xf] %vm3407_vm2, %v8082_v3  ;;  %3439 = vst.msk [vmem:[%s11460_s3 + $0x7c] sm:$0xf] %vm3407_vm2, %v8053_v5  ;;  %v8083_v8 = vpack.c.bf16 %v6685_v4, %v6685_v4 }
 0x31f   :  { %8021 = vst.msk [vmem:[%s11460_s3 + $0xfc] sm:$0xf] %vm3407_vm2, %v8085_v6  ;;  %3437 = vst.msk [vmem:[%s11460_s3 + $0x74] sm:$0xf] %vm3407_vm2, %v8051_v7 }
 0x320   :  { %8019 = vst.msk [vmem:[%s11460_s3 + $0xf4] sm:$0xf] %vm3407_vm2, %v8083_v8 }

// kernel: statistics_network_forward.9
= control target key start
LH: loop header
LB: loop body
LE: loop exit
PB: predicated region body
PF: predicated region fallthrough
CT: control target
= control target key end

     0   :  { %v359_v0 = vmov 0.0   ;;  %vm360_vm0 = vmmov 0   ;;  %vm157_vm1 = vcmask 130048   ;;  %vm268_vm2 = vcmask 254976   ;;  %s462_s2 = inlined_call_operand.vmem [shape: bf16[128,16], index: 2, kind: input, shape index: {}]   ;;  %s463_s4 = inlined_call_operand.vmem [shape: bf16[32,32], index: 4, kind: input, shape index: {}]   ;;  %s464_s1 = inlined_call_operand.vmem [shape: f32[2,16], index: 1, kind: input, shape index: {}]   ;;  %s465_s0 = inlined_call_operand.vmem [shape: bf16[2,128], index: 0, kind: input, shape index: {}]   ;;  %s466_s3 = inlined_call_operand.vmem [shape: f32[1,16], index: 3, kind: input, shape index: {}]   ;;  %s467_s7 = inlined_call_operand.<no memory space> [shape: f32[1,1], index: 7, kind: input, shape index: {}]   ;;  %s468_s5 = inlined_call_operand.vmem [shape: f32[1,32], index: 5, kind: input, shape index: {}]   ;;  %s469_s6 = inlined_call_operand.vmem [shape: f32[1,32], index: 6, kind: input, shape index: {}]   ;;  %s470_s8 = inlined_call_operand.vmem [shape: f32[2,1], index: 8, kind: output, shape index: {}]  }
   0x1   :  { %315 = vmatprep.subr.bf16.mxu0 %v359_v0  ;;  %v349_v1 = vld [vmem:[%s462_s2] sm:$0xff]   ;;  %331 = vmatprep.mubr.msk.bf16.mxu0 %vm360_vm0, %v359_v0  ;;  %v350_v2 = vld [vmem:[%s462_s2 + $0x8] sm:$0xff]   ;;  %v351_v3 = vld [vmem:[%s462_s2 + $0x10] sm:$0xff]   ;;  %v13_v25 = vstv %s467_s7  ;;  %vm280_vm3 = vcmask 1024  }
   0x2   :  { %335 = vmatprep.subr.bf16.mxu1 %v359_v0  ;;  %337 = vmatprep.mubr.msk.bf16.mxu1 %vm360_vm0, %v359_v0  ;;  %v357_v4 = vld [vmem:[%s463_s4 + $0x8] sm:$0xff]   ;;  %v147_v5 = vld [vmem:[%s464_s1] sm:$0x3]  ;;  %v352_v6 = vld [vmem:[%s462_s2 + $0x18] sm:$0xff]   ;;  %14 = vst [vmem:[#allocation2] sm:$0x1] %v13_v25 }
   0x3   :  { %316 = vmatpush3.bf16.msra.mxu0 %v349_v1  ;;  %v148_v7 = vpack.c.bf16 %v147_v5, %v147_v5  ;;  %336 = vmatpush3.bf16.msra.mxu1 %v357_v4  ;;  %v358_v8 = vld [vmem:[%s463_s4] sm:$0xff]   ;;  %v354_v10 = vld [vmem:[%s462_s2 + $0x28] sm:$0xff]   ;;  %v355_v11 = vld [vmem:[%s462_s2 + $0x30] sm:$0xff]  }
   0x4   :  { %317 = vmatprep.subr.bf16.mxu0 %v359_v0  ;;  %341 = vmatprep.subr.bf16.mxu1 %v359_v0  ;;  %v353_v9 = vld [vmem:[%s462_s2 + $0x20] sm:$0xff]   ;;  %v356_v12 = vld [vmem:[%s462_s2 + $0x38] sm:$0xff]  }
   0x5   :  { %v32_v13 = vld [vmem:[%s465_s0] sm:$0x1] }
   0x6   :  { %338 = vmatmul.mubr.msk.bf16.vlgmr.msra.gmra.mrb[0].mxu1 %vm157_vm1, %v148_v7  ;;  %v286_v18 = vld [vmem:[%s466_s3] ss:$0 sm:$0xff] }
   0x7   :  { %318 = vmatpush3.bf16.msra.mxu0 %v350_v2  ;;  %342 = vmatpush3.bf16.msra.mxu1 %v358_v8  ;;  %v299_v27 = vld [vmem:[%s468_s5] ss:$0 sm:$0xff] }
   0x8   :  { %319 = vmatprep.subr.bf16.mxu0 %v359_v0  ;;  %343 = vmatprep.mubr.msk.bf16.mxu1 %vm360_vm0, %v359_v0  ;;  %v300_v34 = vld [vmem:[%s469_s6] ss:$0 sm:$0xff] }
   0x9   :  { %v301_v38 = vld [vmem:[#allocation2] ss:$0 sm:$0xff] }
   0xb   :  { %320 = vmatpush3.bf16.msra.mxu0 %v351_v3 }
   0xc   :  { %321 = vmatprep.subr.bf16.mxu0 %v359_v0 }
   0xf   :  { %322 = vmatpush3.bf16.msra.mxu0 %v352_v6 }
  0x10   :  { %323 = vmatprep.subr.bf16.mxu0 %v359_v0 }
  0x13   :  { %324 = vmatpush3.bf16.msra.mxu0 %v353_v9 }
  0x14   :  { %325 = vmatprep.subr.bf16.mxu0 %v359_v0 }
  0x17   :  { %326 = vmatpush3.bf16.msra.mxu0 %v354_v10 }
  0x18   :  { %327 = vmatprep.subr.bf16.mxu0 %v359_v0 }
  0x1b   :  { %328 = vmatpush3.bf16.msra.mxu0 %v355_v11 }
  0x1c   :  { %329 = vmatprep.subr.bf16.mxu0 %v359_v0 }
  0x1f   :  { %330 = vmatpush3.bf16.msra.mxu0 %v356_v12 }
  0x22   :  { %332 = vmatmul.mubr.bf16.vlgmr.msra.gmra.mrb[0].mxu0 %v32_v13 }
  0xd9   :  { %v195_v14 = vpop.f32.mrb[0].mxu1 }
  0xda   :  { %v339_v15 = vpop.f32.mrb[1].mxu1 }
  0xdb   :  { %v198_v16 = vpop.f32.mrb[2].mxu1 }
  0xdc   :  { %v340_v17 = vpop.f32.mrb[3].mxu1 }
  0xf5   :  { %v138_v19 = vpop.f32.mrb[0].mxu0 }
  0xf6   :  { %v139_v20 = vadd.f32 %v286_v18, %v138_v19  ;;  %v333_v21 = vpop.f32.mrb[1].mxu0 }
  0xf7   :  { %v141_v22 = vpop.f32.mrb[2].mxu0 }
  0xf8   :  { %v144_v23 = vpack.c.bf16 %v139_v20, %v139_v20  ;;  %v334_v24 = vpop.f32.mrb[3].mxu0 }
  0xfa   :  { %344 = vmatmul.mubr.msk.bf16.vlgmr.msra.gmra.mrb[4].mxu1 %vm157_vm1, %v144_v23 }
 0x1cd   :  { %v244_v26 = vpop.f32.mrb[4].mxu1 }
 0x1ce   :  { %v245_v28 = vadd.f32 %v244_v26, %v195_v14  ;;  %v345_v29 = vpop.f32.mrb[5].mxu1 }
 0x1cf   :  { %v247_v30 = vpop.f32.mrb[6].mxu1 }
 0x1d0   :  { %v257_v31 = vadd.f32 %v299_v27, %v245_v28  ;;  %v346_v32 = vpop.f32.mrb[7].mxu1 }
 0x1d2   :  { %v258_v33 = vmul.f32 0.2, %v257_v31 }
 0x1d4   :  { %v259_v35 = vmax.f32 %v257_v31, %v258_v33 }
 0x1d6   :  { %v267_v36 = vmul.f32 %v300_v34, %v259_v35 }
 0x1d8   :  { %v269_v37 = vsel %vm268_vm2, %v267_v36, 0.0 }
 0x1d9   :  { %270 = vadd.xlane.f32.xlu0 %v269_v37 }
 0x266   :  { %v271_v39 = vpop.xlane.xlu0 %270 }
 0x267   :  { %v279_v40 = vadd.f32 %v301_v38, %v271_v39 }
 0x269   :  { %281 = vst.msk [vmem:[%s470_s8] sm:$0x3] %vm280_vm3, %v279_v40 }

// kernel: statistics_network_forward.8
= control target key start
LH: loop header
LB: loop body
LE: loop exit
PB: predicated region body
PF: predicated region fallthrough
CT: control target
= control target key end

     0   :  { %v2121_v0 = vmov 0.0   ;;  %vm2122_vm0 = vmmov 0   ;;  %vm60_vm1 = vcmask 523264   ;;  %vm752_vm2 = vcmask 254976   ;;  %s2550_s1 = inlined_call_operand.vmem [shape: bf16[9,64,32], index: 1, kind: input, shape index: {}]   ;;  %s2551_s0 = inlined_call_operand.vmem [shape: bf16[2,3,8,64], index: 0, kind: input, shape index: {}]   ;;  %s2552_s2 = inlined_call_operand.vmem [shape: f32[1,32], index: 2, kind: input, shape index: {}]   ;;  %s2553_s3 = inlined_call_operand.vmem [shape: bf16[2,4,32], index: 3, kind: output, shape index: {}]  }
   0x1   :  { %1819 = vmatprep.subr.bf16.mxu0 %v2121_v0  ;;  %1831 = vmatprep.subr.bf16.mxu1 %v2121_v0  ;;  %v2037_v1 = vld [vmem:[%s2550_s1 + $0x20] sm:$0xff]   ;;  %v2039_v3 = vld [vmem:[%s2550_s1 + $0x28] sm:$0xff]   ;;  %v2041_v5 = vld [vmem:[%s2550_s1 + $0x30] sm:$0xff]  }
   0x2   :  { %v2038_v2 = vld [vmem:[%s2550_s1] sm:$0xff]   ;;  %1827 = vmatprep.mubr.msk.bf16.mxu0 %vm2122_vm0, %v2121_v0  ;;  %1839 = vmatprep.mubr.msk.bf16.mxu1 %vm2122_vm0, %v2121_v0  ;;  %v2040_v4 = vld [vmem:[%s2550_s1 + $0x8] sm:$0xff]   ;;  %v2042_v6 = vld [vmem:[%s2550_s1 + $0x10] sm:$0xff]  }
   0x3   :  { %1820 = vmatpush3.bf16.msra.mxu0 %v2037_v1  ;;  %1832 = vmatpush3.bf16.msra.mxu1 %v2038_v2  ;;  %v2043_v7 = vld [vmem:[%s2550_s1 + $0x38] sm:$0xff]   ;;  %v1482_v9 = vld [vmem:[%s2551_s0 + $0x4] sm:$0x3]  ;;  %v16_v10 = vld [vmem:[%s2551_s0] sm:$0x3] }
   0x4   :  { %1821 = vmatprep.subr.bf16.mxu0 %v2121_v0  ;;  %1833 = vmatprep.subr.bf16.mxu1 %v2121_v0  ;;  %v2044_v8 = vld [vmem:[%s2550_s1 + $0x18] sm:$0xff]   ;;  %v2045_v11 = vld [vmem:[%s2550_s1 + $0x40] sm:$0xff]   ;;  %v2047_v13 = vld [vmem:[%s2550_s1 + $0x48] sm:$0xff]  }
   0x5   :  { %v2046_v12 = vld [vmem:[%s2550_s1 + $0x60] sm:$0xff]   ;;  %v2048_v14 = vld [vmem:[%s2550_s1 + $0x68] sm:$0xff]   ;;  %v2049_v15 = vld [vmem:[%s2550_s1 + $0x50] sm:$0xff]  }
   0x6   :  { %v2050_v16 = vld [vmem:[%s2550_s1 + $0x70] sm:$0xff]   ;;  %v2053_v17 = vld [vmem:[%s2551_s0] ss:$0 sps:$4 sm:$0x66]   ;;  %v2051_v18 = vld [vmem:[%s2550_s1 + $0x58] sm:$0xff]  }
   0x7   :  { %1822 = vmatpush3.bf16.msra.mxu0 %v2039_v3  ;;  %1834 = vmatpush3.bf16.msra.mxu1 %v2040_v4  ;;  %v2052_v19 = vld [vmem:[%s2550_s1 + $0x78] sm:$0xff]   ;;  %v1501_v20 = vld [vmem:[%s2551_s0 + $0x8] sm:$0x3]  ;;  %v263_v21 = vrot.slane %v2053_v17, 1  ;;  %v2054_v22 = vld [vmem:[%s2550_s1 + $0x80] sm:$0xff]  }
   0x8   :  { %1823 = vmatprep.subr.bf16.mxu0 %v2121_v0  ;;  %1835 = vmatprep.subr.bf16.mxu1 %v2121_v0  ;;  %v2055_v23 = vld [vmem:[%s2550_s1 + $0xa0] sm:$0xff]   ;;  %v2056_v24 = vld [vmem:[%s2550_s1 + $0x88] sm:$0xff]   ;;  %v2058_v26 = vld [vmem:[%s2550_s1 + $0x90] sm:$0xff]  }
   0x9   :  { %v2057_v25 = vld [vmem:[%s2550_s1 + $0xa8] sm:$0xff]   ;;  %v2059_v27 = vld [vmem:[%s2550_s1 + $0xb0] sm:$0xff]   ;;  %v2062_v28 = vld [vmem:[%s2551_s0 + $0x4] ss:$0 sps:$4 sm:$0x66]  }
   0xa   :  { %v2063_v29 = vld [vmem:[%s2551_s0 + $0x8] ss:$0 sps:$4 sm:$0x66]   ;;  %v2060_v30 = vld [vmem:[%s2550_s1 + $0x98] sm:$0xff]   ;;  %v345_v32 = vrot.slane %v2062_v28, 1  ;;  %v2064_v34 = vld [vmem:[%s2550_s1 + $0xc0] sm:$0xff]  }
   0xb   :  { %1824 = vmatpush3.bf16.msra.mxu0 %v2041_v5  ;;  %1836 = vmatpush3.bf16.msra.mxu1 %v2042_v6  ;;  %v2061_v31 = vld [vmem:[%s2550_s1 + $0xb8] sm:$0xff]   ;;  %v427_v33 = vrot.slane %v2063_v29, 1  ;;  %v2065_v35 = vld [vmem:[%s2550_s1 + $0xe0] sm:$0xff]   ;;  %v2066_v36 = vld [vmem:[%s2550_s1 + $0xc8] sm:$0xff]  }
   0xc   :  { %1825 = vmatprep.subr.bf16.mxu0 %v2121_v0  ;;  %1837 = vmatprep.subr.bf16.mxu1 %v2121_v0  ;;  %v2067_v37 = vld [vmem:[%s2550_s1 + $0xe8] sm:$0xff]   ;;  %v2068_v38 = vld [vmem:[%s2550_s1 + $0xd0] sm:$0xff]   ;;  %v2072_v40 = vld [vmem:[%s2551_s0] ss:$0 sps:$4 sm:$0xcc]  }
   0xd   :  { %v2069_v39 = vld [vmem:[%s2550_s1 + $0xf0] sm:$0xff]   ;;  %v2073_v41 = vld [vmem:[%s2551_s0 + $0x4] ss:$0 sps:$4 sm:$0xcc]   ;;  %v2070_v42 = vld [vmem:[%s2550_s1 + $0xd8] sm:$0xff]   ;;  %v509_v44 = vrot.slane %v2072_v40, 2 }
   0xe   :  { %v2071_v43 = vld [vmem:[%s2550_s1 + $0xf8] sm:$0xff]   ;;  %v591_v45 = vrot.slane %v2073_v41, 2  ;;  %v2074_v46 = vld [vmem:[%s2550_s1 + $0x100] sm:$0xff]   ;;  %v2076_v48 = vld [vmem:[%s2550_s1 + $0x108] sm:$0xff]  }
   0xf   :  { %1826 = vmatpush3.bf16.msra.mxu0 %v2043_v7  ;;  %1838 = vmatpush3.bf16.msra.mxu1 %v2044_v8  ;;  %v2075_v47 = vld [vmem:[%s2550_s1 + $0x20] sm:$0xff]   ;;  %v2077_v49 = vld [vmem:[%s2550_s1 + $0x28] sm:$0xff]   ;;  %v2078_v50 = vld [vmem:[%s2550_s1 + $0x110] sm:$0xff]  }
  0x10   :  { %1843 = vmatprep.subr.bf16.mxu0 %v2121_v0  ;;  %1855 = vmatprep.subr.bf16.mxu1 %v2121_v0  ;;  %v2079_v51 = vld [vmem:[%s2550_s1 + $0x30] sm:$0xff]   ;;  %v2082_v52 = vld [vmem:[%s2551_s0 + $0x8] ss:$0 sps:$4 sm:$0xcc]   ;;  %v2080_v53 = vld [vmem:[%s2550_s1 + $0x118] sm:$0xff]  }
  0x11   :  { %v2081_v54 = vld [vmem:[%s2550_s1 + $0x38] sm:$0xff]   ;;  %v673_v55 = vrot.slane %v2082_v52, 2  ;;  %v1605_v56 = vld [vmem:[%s2551_s0 + $0x10] sm:$0x3]  ;;  %v2083_v57 = vld [vmem:[%s2550_s1] sm:$0xff]  }
  0x12   :  { %1828 = vmatmul.mubr.msk.bf16.vlgmr.msra.gmra.mrb[0].mxu0 %vm60_vm1, %v1482_v9  ;;  %1840 = vmatmul.mubr.msk.bf16.vlgmr.msra.gmra.mrb[0].mxu1 %vm60_vm1, %v16_v10  ;;  %v2084_v58 = vld [vmem:[%s2550_s1 + $0x40] sm:$0xff]   ;;  %v2085_v59 = vld [vmem:[%s2550_s1 + $0x8] sm:$0xff]   ;;  %v2087_v61 = vld [vmem:[%s2550_s1 + $0x10] sm:$0xff]  }
  0x13   :  { %1844 = vmatpush3.bf16.msra.mxu0 %v2045_v11  ;;  %1856 = vmatpush3.bf16.msra.mxu1 %v2046_v12  ;;  %v2086_v60 = vld [vmem:[%s2550_s1 + $0x48] sm:$0xff]   ;;  %v2088_v62 = vld [vmem:[%s2550_s1 + $0x50] sm:$0xff]   ;;  %v2089_v63 = vld [vmem:[%s2550_s1 + $0x18] sm:$0xff]  }
  0x14   :  { %1845 = vmatprep.subr.bf16.mxu0 %v2121_v0  ;;  %1857 = vmatprep.subr.bf16.mxu1 %v2121_v0  ;;  %v2090_v1 = vld [vmem:[%s2550_s1 + $0x58] sm:$0xff]   ;;  %v1604_v2 = vld [vmem:[%s2551_s0 + $0xc] sm:$0x3]  ;;  %v2091_v3 = vld [vmem:[%s2550_s1 + $0x60] sm:$0xff]  }
  0x15   :  { %1851 = vmatprep.mubr.msk.bf16.mxu0 %vm2122_vm0, %v2121_v0  ;;  %1863 = vmatprep.mubr.msk.bf16.mxu1 %vm2122_vm0, %v2121_v0  ;;  %v1624_v4 = vld [vmem:[%s2551_s0 + $0x14] sm:$0x3]  ;;  %v2092_v5 = vld [vmem:[%s2550_s1 + $0x80] sm:$0xff]   ;;  %v2093_v6 = vld [vmem:[%s2550_s1 + $0x68] sm:$0xff]  }
  0x16   :  { %v2094_v7 = vld [vmem:[%s2550_s1 + $0x88] sm:$0xff]   ;;  %v2095_v8 = vld [vmem:[%s2550_s1 + $0x70] sm:$0xff]   ;;  %v2097_v11 = vld [vmem:[%s2550_s1 + $0x78] sm:$0xff]  }
  0x17   :  { %1846 = vmatpush3.bf16.msra.mxu0 %v2047_v13  ;;  %1858 = vmatpush3.bf16.msra.mxu1 %v2048_v14  ;;  %v2096_v9 = vld [vmem:[%s2550_s1 + $0x90] sm:$0xff]   ;;  %v2099_v10 = vld [vmem:[%s2551_s0 + $0xc] ss:$0 sps:$4 sm:$0x66]   ;;  %v2098_v13 = vld [vmem:[%s2550_s1 + $0x98] sm:$0xff]  }
  0x18   :  { %1847 = vmatprep.subr.bf16.mxu0 %v2121_v0  ;;  %1859 = vmatprep.subr.bf16.mxu1 %v2121_v0  ;;  %v2100_v12 = vld [vmem:[%s2551_s0 + $0x10] ss:$0 sps:$4 sm:$0x66]   ;;  %v998_v14 = vrot.slane %v2099_v10, 1  ;;  %v2102_v17 = vld [vmem:[%s2550_s1 + $0xc0] sm:$0xff]  }
  0x19   :  { %v2111_v28 = vld [vmem:[%s2550_s1 + $0xe0] sm:$0xff]  }
  0x1a   :  { %v2112_v29 = vld [vmem:[%s2550_s1 + $0x100] sm:$0xff]  }
  0x1b   :  { %1848 = vmatpush3.bf16.msra.mxu0 %v2049_v15  ;;  %1860 = vmatpush3.bf16.msra.mxu1 %v2050_v16  ;;  %v1079_v15 = vrot.slane %v2100_v12, 1  ;;  %v2101_v16 = vld [vmem:[%s2550_s1 + $0xa0] sm:$0xff]  }
  0x1c   :  { %1849 = vmatprep.subr.bf16.mxu0 %v2121_v0  ;;  %1861 = vmatprep.subr.bf16.mxu1 %v2121_v0 }
  0x1f   :  { %1850 = vmatpush3.bf16.msra.mxu0 %v2051_v18  ;;  %1862 = vmatpush3.bf16.msra.mxu1 %v2052_v19  ;;  %v2103_v18 = vld [vmem:[%s2550_s1 + $0xa8] sm:$0xff]  }
  0x20   :  { %1867 = vmatprep.subr.bf16.mxu0 %v2121_v0  ;;  %1879 = vmatprep.subr.bf16.mxu1 %v2121_v0  ;;  %v2104_v19 = vld [vmem:[%s2550_s1 + $0xc8] sm:$0xff]  }
  0x22   :  { %1852 = vmatmul.mubr.msk.bf16.vlgmr.msra.gmra.mrb[4].mxu0 %vm60_vm1, %v1501_v20  ;;  %1864 = vmatmul.mubr.msk.bf16.vlgmr.msra.gmra.mrb[4].mxu1 %vm60_vm1, %v263_v21  ;;  %v2105_v20 = vld [vmem:[%s2550_s1 + $0xb0] sm:$0xff]  }
  0x23   :  { %1868 = vmatpush3.bf16.msra.mxu0 %v2054_v22  ;;  %1880 = vmatpush3.bf16.msra.mxu1 %v2055_v23  ;;  %v2106_v21 = vld [vmem:[%s2550_s1 + $0xd0] sm:$0xff]   ;;  %v2107_v23 = vld [vmem:[%s2550_s1 + $0xb8] sm:$0xff]  }
  0x24   :  { %1869 = vmatprep.subr.bf16.mxu0 %v2121_v0  ;;  %1881 = vmatprep.subr.bf16.mxu1 %v2121_v0  ;;  %v2109_v22 = vld [vmem:[%s2551_s0 + $0x14] ss:$0 sps:$4 sm:$0x66]  }
  0x25   :  { %1875 = vmatprep.mubr.msk.bf16.mxu0 %vm2122_vm0, %v2121_v0  ;;  %1887 = vmatprep.mubr.msk.bf16.mxu1 %vm2122_vm0, %v2121_v0 }
  0x27   :  { %1870 = vmatpush3.bf16.msra.mxu0 %v2056_v24  ;;  %1882 = vmatpush3.bf16.msra.mxu1 %v2057_v25  ;;  %v2110_v24 = vld [vmem:[%s2551_s0 + $0xc] ss:$0 sps:$4 sm:$0xcc]   ;;  %v2108_v25 = vld [vmem:[%s2550_s1 + $0xd8] sm:$0xff]  }
  0x28   :  { %1871 = vmatprep.subr.bf16.mxu0 %v2121_v0  ;;  %1883 = vmatprep.subr.bf16.mxu1 %v2121_v0 }
  0x2b   :  { %1872 = vmatpush3.bf16.msra.mxu0 %v2058_v26  ;;  %1884 = vmatpush3.bf16.msra.mxu1 %v2059_v27  ;;  %v1160_v26 = vrot.slane %v2109_v22, 1  ;;  %v1241_v27 = vrot.slane %v2110_v24, 2 }
  0x2c   :  { %1873 = vmatprep.subr.bf16.mxu0 %v2121_v0  ;;  %1885 = vmatprep.subr.bf16.mxu1 %v2121_v0 }
  0x2f   :  { %1874 = vmatpush3.bf16.msra.mxu0 %v2060_v30  ;;  %1886 = vmatpush3.bf16.msra.mxu1 %v2061_v31  ;;  %v2113_v30 = vld [vmem:[%s2550_s1 + $0xe8] sm:$0xff]  }
  0x30   :  { %1891 = vmatprep.subr.bf16.mxu0 %v2121_v0  ;;  %1903 = vmatprep.subr.bf16.mxu1 %v2121_v0  ;;  %v2114_v31 = vld [vmem:[%s2550_s1 + $0x108] sm:$0xff]  }
  0x32   :  { %1876 = vmatmul.mubr.msk.bf16.vlgmr.msra.gmra.mrb[8].mxu0 %vm60_vm1, %v345_v32  ;;  %1888 = vmatmul.mubr.msk.bf16.vlgmr.msra.gmra.mrb[8].mxu1 %vm60_vm1, %v427_v33  ;;  %v2115_v32 = vld [vmem:[%s2550_s1 + $0xf0] sm:$0xff]  }
  0x33   :  { %1892 = vmatpush3.bf16.msra.mxu0 %v2064_v34  ;;  %1904 = vmatpush3.bf16.msra.mxu1 %v2065_v35  ;;  %v2116_v33 = vld [vmem:[%s2550_s1 + $0x110] sm:$0xff]   ;;  %v2117_v35 = vld [vmem:[%s2550_s1 + $0xf8] sm:$0xff]  }
  0x34   :  { %1893 = vmatprep.subr.bf16.mxu0 %v2121_v0  ;;  %1905 = vmatprep.subr.bf16.mxu1 %v2121_v0  ;;  %v2119_v34 = vld [vmem:[%s2551_s0 + $0x10] ss:$0 sps:$4 sm:$0xcc]  }
  0x35   :  { %1899 = vmatprep.mubr.msk.bf16.mxu0 %vm2122_vm0, %v2121_v0  ;;  %1911 = vmatprep.mubr.msk.bf16.mxu1 %vm2122_vm0, %v2121_v0 }
  0x37   :  { %1894 = vmatpush3.bf16.msra.mxu0 %v2066_v36  ;;  %1906 = vmatpush3.bf16.msra.mxu1 %v2067_v37  ;;  %v2120_v36 = vld [vmem:[%s2551_s0 + $0x14] ss:$0 sps:$4 sm:$0xcc]   ;;  %v2118_v37 = vld [vmem:[%s2550_s1 + $0x118] sm:$0xff]  }
  0x38   :  { %1895 = vmatprep.subr.bf16.mxu0 %v2121_v0  ;;  %1907 = vmatprep.subr.bf16.mxu1 %v2121_v0 }
  0x3b   :  { %1896 = vmatpush3.bf16.msra.mxu0 %v2068_v38  ;;  %1908 = vmatpush3.bf16.msra.mxu1 %v2069_v39  ;;  %v1322_v38 = vrot.slane %v2119_v34, 2  ;;  %v1403_v39 = vrot.slane %v2120_v36, 2 }
  0x3c   :  { %1897 = vmatprep.subr.bf16.mxu0 %v2121_v0  ;;  %1909 = vmatprep.subr.bf16.mxu1 %v2121_v0 }
  0x3f   :  { %1898 = vmatpush3.bf16.msra.mxu0 %v2070_v42  ;;  %1910 = vmatpush3.bf16.msra.mxu1 %v2071_v43 }
  0x40   :  { %1915 = vmatprep.subr.bf16.mxu0 %v2121_v0  ;;  %1927 = vmatprep.subr.bf16.mxu1 %v2121_v0 }
  0x42   :  { %1900 = vmatmul.mubr.msk.bf16.vlgmr.msra.gmra.mrb[12].mxu0 %vm60_vm1, %v509_v44  ;;  %1912 = vmatmul.mubr.msk.bf16.vlgmr.msra.gmra.mrb[12].mxu1 %vm60_vm1, %v591_v45 }
  0x43   :  { %1916 = vmatpush3.bf16.msra.mxu0 %v2074_v46  ;;  %1928 = vmatpush3.bf16.msra.mxu1 %v2075_v47 }
  0x44   :  { %1917 = vmatprep.subr.bf16.mxu0 %v2121_v0  ;;  %1929 = vmatprep.subr.bf16.mxu1 %v2121_v0 }
  0x45   :  { %1923 = vmatprep.mubr.msk.bf16.mxu0 %vm2122_vm0, %v2121_v0  ;;  %1935 = vmatprep.mubr.msk.bf16.mxu1 %vm2122_vm0, %v2121_v0 }
  0x47   :  { %1918 = vmatpush3.bf16.msra.mxu0 %v2076_v48  ;;  %1930 = vmatpush3.bf16.msra.mxu1 %v2077_v49 }
  0x48   :  { %1919 = vmatprep.subr.bf16.mxu0 %v2121_v0  ;;  %1931 = vmatprep.subr.bf16.mxu1 %v2121_v0 }
  0x4b   :  { %1920 = vmatpush3.bf16.msra.mxu0 %v2078_v50  ;;  %1932 = vmatpush3.bf16.msra.mxu1 %v2079_v51 }
  0x4c   :  { %1921 = vmatprep.subr.bf16.mxu0 %v2121_v0  ;;  %1933 = vmatprep.subr.bf16.mxu1 %v2121_v0 }
  0x4f   :  { %1922 = vmatpush3.bf16.msra.mxu0 %v2080_v53  ;;  %1934 = vmatpush3.bf16.msra.mxu1 %v2081_v54 }
  0x50   :  { %1939 = vmatprep.subr.bf16.mxu0 %v2121_v0  ;;  %1951 = vmatprep.subr.bf16.mxu1 %v2121_v0 }
  0x52   :  { %1924 = vmatmul.mubr.msk.bf16.vlgmr.msra.gmra.mrb[16].mxu0 %vm60_vm1, %v673_v55  ;;  %1936 = vmatmul.mubr.msk.bf16.vlgmr.msra.gmra.mrb[16].mxu1 %vm60_vm1, %v1605_v56 }
  0x53   :  { %1940 = vmatpush3.bf16.msra.mxu0 %v2083_v57  ;;  %1952 = vmatpush3.bf16.msra.mxu1 %v2084_v58 }
  0x54   :  { %1941 = vmatprep.subr.bf16.mxu0 %v2121_v0  ;;  %1953 = vmatprep.subr.bf16.mxu1 %v2121_v0 }
  0x55   :  { %1947 = vmatprep.mubr.msk.bf16.mxu0 %vm2122_vm0, %v2121_v0  ;;  %1959 = vmatprep.mubr.msk.bf16.mxu1 %vm2122_vm0, %v2121_v0 }
  0x57   :  { %1942 = vmatpush3.bf16.msra.mxu0 %v2085_v59  ;;  %1954 = vmatpush3.bf16.msra.mxu1 %v2086_v60 }
  0x58   :  { %1943 = vmatprep.subr.bf16.mxu0 %v2121_v0  ;;  %1955 = vmatprep.subr.bf16.mxu1 %v2121_v0 }
  0x5b   :  { %1944 = vmatpush3.bf16.msra.mxu0 %v2087_v61  ;;  %1956 = vmatpush3.bf16.msra.mxu1 %v2088_v62 }
  0x5c   :  { %1945 = vmatprep.subr.bf16.mxu0 %v2121_v0  ;;  %1957 = vmatprep.subr.bf16.mxu1 %v2121_v0 }
  0x5f   :  { %1946 = vmatpush3.bf16.msra.mxu0 %v2089_v63  ;;  %1958 = vmatpush3.bf16.msra.mxu1 %v2090_v1 }
  0x60   :  { %1963 = vmatprep.subr.bf16.mxu0 %v2121_v0  ;;  %1975 = vmatprep.subr.bf16.mxu1 %v2121_v0 }
  0x62   :  { %1948 = vmatmul.mubr.msk.bf16.vlgmr.msra.gmra.mrb[20].mxu0 %vm60_vm1, %v1604_v2  ;;  %1960 = vmatmul.mubr.msk.bf16.vlgmr.msra.gmra.mrb[20].mxu1 %vm60_vm1, %v1624_v4 }
  0x63   :  { %1964 = vmatpush3.bf16.msra.mxu0 %v2091_v3  ;;  %1976 = vmatpush3.bf16.msra.mxu1 %v2092_v5 }
  0x64   :  { %1965 = vmatprep.subr.bf16.mxu0 %v2121_v0  ;;  %1977 = vmatprep.subr.bf16.mxu1 %v2121_v0 }
  0x65   :  { %1971 = vmatprep.mubr.msk.bf16.mxu0 %vm2122_vm0, %v2121_v0  ;;  %1983 = vmatprep.mubr.msk.bf16.mxu1 %vm2122_vm0, %v2121_v0 }
  0x67   :  { %1966 = vmatpush3.bf16.msra.mxu0 %v2093_v6  ;;  %1978 = vmatpush3.bf16.msra.mxu1 %v2094_v7 }
  0x68   :  { %1967 = vmatprep.subr.bf16.mxu0 %v2121_v0  ;;  %1979 = vmatprep.subr.bf16.mxu1 %v2121_v0 }
  0x6b   :  { %1968 = vmatpush3.bf16.msra.mxu0 %v2095_v8  ;;  %1980 = vmatpush3.bf16.msra.mxu1 %v2096_v9 }
  0x6c   :  { %1969 = vmatprep.subr.bf16.mxu0 %v2121_v0  ;;  %1981 = vmatprep.subr.bf16.mxu1 %v2121_v0 }
  0x6f   :  { %1970 = vmatpush3.bf16.msra.mxu0 %v2097_v11  ;;  %1982 = vmatpush3.bf16.msra.mxu1 %v2098_v13 }
  0x70   :  { %1987 = vmatprep.subr.bf16.mxu0 %v2121_v0  ;;  %1999 = vmatprep.subr.bf16.mxu1 %v2121_v0 }
  0x72   :  { %1972 = vmatmul.mubr.msk.bf16.vlgmr.msra.gmra.mrb[24].mxu0 %vm60_vm1, %v998_v14  ;;  %1984 = vmatmul.mubr.msk.bf16.vlgmr.msra.gmra.mrb[24].mxu1 %vm60_vm1, %v1079_v15  ;;  %v1603_v15 = vld [vmem:[%s2552_s2] ss:$0 sm:$0xff] }
  0x73   :  { %1988 = vmatpush3.bf16.msra.mxu0 %v2101_v16  ;;  %2000 = vmatpush3.bf16.msra.mxu1 %v2102_v17 }
  0x74   :  { %1989 = vmatprep.subr.bf16.mxu0 %v2121_v0  ;;  %2001 = vmatprep.subr.bf16.mxu1 %v2121_v0 }
  0x75   :  { %1995 = vmatprep.mubr.msk.bf16.mxu0 %vm2122_vm0, %v2121_v0  ;;  %2007 = vmatprep.mubr.msk.bf16.mxu1 %vm2122_vm0, %v2121_v0 }
  0x77   :  { %1990 = vmatpush3.bf16.msra.mxu0 %v2103_v18  ;;  %2002 = vmatpush3.bf16.msra.mxu1 %v2104_v19 }
  0x78   :  { %1991 = vmatprep.subr.bf16.mxu0 %v2121_v0  ;;  %2003 = vmatprep.subr.bf16.mxu1 %v2121_v0 }
  0x7b   :  { %1992 = vmatpush3.bf16.msra.mxu0 %v2105_v20  ;;  %2004 = vmatpush3.bf16.msra.mxu1 %v2106_v21 }
  0x7c   :  { %1993 = vmatprep.subr.bf16.mxu0 %v2121_v0  ;;  %2005 = vmatprep.subr.bf16.mxu1 %v2121_v0 }
  0x7f   :  { %1994 = vmatpush3.bf16.msra.mxu0 %v2107_v23  ;;  %2006 = vmatpush3.bf16.msra.mxu1 %v2108_v25 }
  0x80   :  { %2011 = vmatprep.subr.bf16.mxu0 %v2121_v0  ;;  %2023 = vmatprep.subr.bf16.mxu1 %v2121_v0 }
  0x82   :  { %1996 = vmatmul.mubr.msk.bf16.vlgmr.msra.gmra.mrb[28].mxu0 %vm60_vm1, %v1160_v26  ;;  %2008 = vmatmul.mubr.msk.bf16.vlgmr.msra.gmra.mrb[28].mxu1 %vm60_vm1, %v1241_v27 }
  0x83   :  { %2012 = vmatpush3.bf16.msra.mxu0 %v2111_v28  ;;  %2024 = vmatpush3.bf16.msra.mxu1 %v2112_v29 }
  0x84   :  { %2013 = vmatprep.subr.bf16.mxu0 %v2121_v0  ;;  %2025 = vmatprep.subr.bf16.mxu1 %v2121_v0 }
  0x85   :  { %2019 = vmatprep.mubr.msk.bf16.mxu0 %vm2122_vm0, %v2121_v0  ;;  %2031 = vmatprep.mubr.msk.bf16.mxu1 %vm2122_vm0, %v2121_v0 }
  0x87   :  { %2014 = vmatpush3.bf16.msra.mxu0 %v2113_v30  ;;  %2026 = vmatpush3.bf16.msra.mxu1 %v2114_v31 }
  0x88   :  { %2015 = vmatprep.subr.bf16.mxu0 %v2121_v0  ;;  %2027 = vmatprep.subr.bf16.mxu1 %v2121_v0 }
  0x8b   :  { %2016 = vmatpush3.bf16.msra.mxu0 %v2115_v32  ;;  %2028 = vmatpush3.bf16.msra.mxu1 %v2116_v33 }
  0x8c   :  { %2017 = vmatprep.subr.bf16.mxu0 %v2121_v0  ;;  %2029 = vmatprep.subr.bf16.mxu1 %v2121_v0 }
  0x8f   :  { %2018 = vmatpush3.bf16.msra.mxu0 %v2117_v35  ;;  %2030 = vmatpush3.bf16.msra.mxu1 %v2118_v37 }
  0x92   :  { %2020 = vmatmul.mubr.msk.bf16.vlgmr.msra.gmra.mrb[32].mxu0 %vm60_vm1, %v1322_v38  ;;  %2032 = vmatmul.mubr.msk.bf16.vlgmr.msra.gmra.mrb[32].mxu1 %vm60_vm1, %v1403_v39 }
  0xe5   :  { %v98_v40 = vpop.f32.mrb[0].mxu0  ;;  %v165_v41 = vpop.f32.mrb[0].mxu1 }
  0xe6   :  { %v1829_v42 = vpop.f32.mrb[1].mxu0  ;;  %v166_v43 = vadd.f32 %v165_v41, %v98_v40  ;;  %v1841_v44 = vpop.f32.mrb[1].mxu1 }
  0xe7   :  { %v101_v45 = vpop.f32.mrb[2].mxu0  ;;  %v168_v46 = vpop.f32.mrb[2].mxu1 }
  0xe8   :  { %v1830_v47 = vpop.f32.mrb[3].mxu0  ;;  %v1842_v48 = vpop.f32.mrb[3].mxu1 }
  0xf5   :  { %v243_v49 = vpop.f32.mrb[4].mxu0  ;;  %v325_v0 = vpop.f32.mrb[4].mxu1 }
  0xf6   :  { %v249_v50 = vadd.f32 %v243_v49, %v166_v43  ;;  %v1853_v51 = vpop.f32.mrb[5].mxu0  ;;  %v1865_v52 = vpop.f32.mrb[5].mxu1 }
  0xf7   :  { %v246_v53 = vpop.f32.mrb[6].mxu0  ;;  %v328_v55 = vpop.f32.mrb[6].mxu1 }
  0xf8   :  { %v331_v54 = vadd.f32 %v325_v0, %v249_v50  ;;  %v1854_v56 = vpop.f32.mrb[7].mxu0  ;;  %v1866_v57 = vpop.f32.mrb[7].mxu1 }
 0x105   :  { %v407_v58 = vpop.f32.mrb[8].mxu0  ;;  %v489_v60 = vpop.f32.mrb[8].mxu1 }
 0x106   :  { %v413_v59 = vadd.f32 %v407_v58, %v331_v54  ;;  %v1877_v61 = vpop.f32.mrb[9].mxu0  ;;  %v1889_v62 = vpop.f32.mrb[9].mxu1 }
 0x107   :  { %v410_v63 = vpop.f32.mrb[10].mxu0  ;;  %v492_v2 = vpop.f32.mrb[10].mxu1 }
 0x108   :  { %v495_v1 = vadd.f32 %v489_v60, %v413_v59  ;;  %v1878_v3 = vpop.f32.mrb[11].mxu0  ;;  %v1890_v4 = vpop.f32.mrb[11].mxu1 }
 0x115   :  { %v571_v5 = vpop.f32.mrb[12].mxu0  ;;  %v653_v7 = vpop.f32.mrb[12].mxu1 }
 0x116   :  { %v577_v6 = vadd.f32 %v571_v5, %v495_v1  ;;  %v1901_v8 = vpop.f32.mrb[13].mxu0  ;;  %v1913_v9 = vpop.f32.mrb[13].mxu1 }
 0x117   :  { %v574_v10 = vpop.f32.mrb[14].mxu0  ;;  %v656_v12 = vpop.f32.mrb[14].mxu1 }
 0x118   :  { %v659_v11 = vadd.f32 %v653_v7, %v577_v6  ;;  %v1902_v13 = vpop.f32.mrb[15].mxu0  ;;  %v1914_v14 = vpop.f32.mrb[15].mxu1 }
 0x125   :  { %v735_v16 = vpop.f32.mrb[16].mxu0  ;;  %v835_v18 = vpop.f32.mrb[16].mxu1 }
 0x126   :  { %v741_v17 = vadd.f32 %v735_v16, %v659_v11  ;;  %v1925_v19 = vpop.f32.mrb[17].mxu0  ;;  %v1937_v20 = vpop.f32.mrb[17].mxu1 }
 0x127   :  { %v738_v21 = vpop.f32.mrb[18].mxu0  ;;  %v838_v23 = vpop.f32.mrb[18].mxu1 }
 0x128   :  { %v748_v22 = vadd.f32 %v1603_v15, %v741_v17  ;;  %v1926_v24 = vpop.f32.mrb[19].mxu0  ;;  %v1938_v25 = vpop.f32.mrb[19].mxu1 }
 0x12a   :  { %v749_v26 = vmul.f32 0.2, %v748_v22 }
 0x12c   :  { %v750_v27 = vmax.f32 %v748_v22, %v749_v26 }
 0x12e   :  { %v751_v28 = vpack.c.bf16 %v750_v27, %v750_v27 }
 0x130   :  { %753 = vst.msk [vmem:[%s2553_s3] sm:$0x3] %vm752_vm2, %v751_v28 }
 0x135   :  { %v902_v29 = vpop.f32.mrb[20].mxu0  ;;  %v979_v31 = vpop.f32.mrb[20].mxu1 }
 0x136   :  { %v903_v30 = vadd.f32 %v902_v29, %v835_v18  ;;  %v1949_v32 = vpop.f32.mrb[21].mxu0  ;;  %v1961_v33 = vpop.f32.mrb[21].mxu1 }
 0x137   :  { %v905_v34 = vpop.f32.mrb[22].mxu0  ;;  %v982_v36 = vpop.f32.mrb[22].mxu1 }
 0x138   :  { %v985_v35 = vadd.f32 %v979_v31, %v903_v30  ;;  %v1950_v37 = vpop.f32.mrb[23].mxu0  ;;  %v1962_v38 = vpop.f32.mrb[23].mxu1 }
 0x145   :  { %v1060_v39 = vpop.f32.mrb[24].mxu0  ;;  %v1141_v41 = vpop.f32.mrb[24].mxu1 }
 0x146   :  { %v1066_v40 = vadd.f32 %v1060_v39, %v985_v35  ;;  %v1973_v42 = vpop.f32.mrb[25].mxu0  ;;  %v1985_v43 = vpop.f32.mrb[25].mxu1 }
 0x147   :  { %v1063_v44 = vpop.f32.mrb[26].mxu0  ;;  %v1144_v46 = vpop.f32.mrb[26].mxu1 }
 0x148   :  { %v1147_v45 = vadd.f32 %v1141_v41, %v1066_v40  ;;  %v1974_v47 = vpop.f32.mrb[27].mxu0  ;;  %v1986_v48 = vpop.f32.mrb[27].mxu1 }
 0x155   :  { %v1222_v49 = vpop.f32.mrb[28].mxu0  ;;  %v1303_v0 = vpop.f32.mrb[28].mxu1 }
 0x156   :  { %v1228_v50 = vadd.f32 %v1222_v49, %v1147_v45  ;;  %v1997_v51 = vpop.f32.mrb[29].mxu0  ;;  %v2009_v52 = vpop.f32.mrb[29].mxu1 }
 0x157   :  { %v1225_v53 = vpop.f32.mrb[30].mxu0  ;;  %v1306_v55 = vpop.f32.mrb[30].mxu1 }
 0x158   :  { %v1309_v54 = vadd.f32 %v1303_v0, %v1228_v50  ;;  %v1998_v56 = vpop.f32.mrb[31].mxu0  ;;  %v2010_v57 = vpop.f32.mrb[31].mxu1 }
 0x165   :  { %v1384_v58 = vpop.f32.mrb[32].mxu0  ;;  %v1465_v60 = vpop.f32.mrb[32].mxu1 }
 0x166   :  { %v1390_v59 = vadd.f32 %v1384_v58, %v1309_v54  ;;  %v2021_v61 = vpop.f32.mrb[33].mxu0  ;;  %v2033_v62 = vpop.f32.mrb[33].mxu1 }
 0x167   :  { %v1387_v63 = vpop.f32.mrb[34].mxu0  ;;  %v1468_v2 = vpop.f32.mrb[34].mxu1 }
 0x168   :  { %v1471_v1 = vadd.f32 %v1465_v60, %v1390_v59  ;;  %v2022_v3 = vpop.f32.mrb[35].mxu0  ;;  %v2034_v4 = vpop.f32.mrb[35].mxu1 }
 0x16a   :  { %v1472_v5 = vadd.f32 %v1603_v15, %v1471_v1 }
 0x16c   :  { %v1473_v6 = vmul.f32 0.2, %v1472_v5 }
 0x16e   :  { %v1474_v7 = vmax.f32 %v1472_v5, %v1473_v6 }
 0x170   :  { %v1475_v8 = vpack.c.bf16 %v1474_v7, %v1474_v7 }
 0x172   :  { %1728 = vst.msk [vmem:[%s2553_s3 + $0x2] sm:$0x3] %vm752_vm2, %v1475_v8 }

</bundles_post_ra>
